<compile_context>
chip_gen: v7x
topology: tpu7x:2x2x1
jax: 0.10.0
libtpu: 0.0.40
codegen_flags: <defaults>
</compile_context>

<pallas_src>
import jax
import jax.numpy as jnp
from jax.experimental import pallas as pl
from jax.experimental.pallas import tpu as pltpu


# ---------------------------------------------------------------------------
# Kernels (single grid step, full blocks, fused epilogues)
# ---------------------------------------------------------------------------
def _conv_mm_kernel(w_ref, p_ref, b_ref, o_ref):
    # out = relu(W @ P + b);  W:(Cout,K) bf16, P:(K,X) bf16, b:(Cout,1) f32.
    acc = jnp.dot(w_ref[...], p_ref[...], preferred_element_type=jnp.float32)
    o_ref[...] = jnp.maximum(acc + b_ref[...], 0.0).astype(o_ref.dtype)


def _head_kernel(x_ref, w4_ref, b4_ref, w5_ref, b5_ref, o_ref):
    # logits = relu(X @ W4 + b4) @ W5 + b5  (FC1 + FC2 fused, f32 accumulate).
    h = jnp.dot(x_ref[...], w4_ref[...], preferred_element_type=jnp.float32)
    h = jnp.maximum(h + b4_ref[...], 0.0)
    o_ref[...] = (jnp.dot(h.astype(jnp.bfloat16), w5_ref[...],
                          preferred_element_type=jnp.float32) + b5_ref[...])


def _vmem_limit(in_arrays, out_bytes):
    in_bytes = sum(int(a.size) * a.dtype.itemsize for a in in_arrays)
    return int(min(32 << 20, max(4 << 20, 2 * (2 * in_bytes + 2 * out_bytes))))


def conv_matmul_relu(w_rows, patches_t, b_col):
    """relu(w_rows @ patches_t + b_col): (Cout,K)@(K,X)+(Cout,1) -> (Cout,X) bf16."""
    co, k = w_rows.shape
    _, x = patches_t.shape
    return pl.pallas_call(
        _conv_mm_kernel,
        out_shape=jax.ShapeDtypeStruct((co, x), jnp.bfloat16),
        grid=(1,),
        in_specs=[
            pl.BlockSpec((co, k), lambda i: (0, 0)),
            pl.BlockSpec((k, x), lambda i: (0, 0)),
            pl.BlockSpec((co, 1), lambda i: (0, 0)),
        ],
        out_specs=pl.BlockSpec((co, x), lambda i: (0, 0)),
        compiler_params=pltpu.CompilerParams(
            dimension_semantics=("arbitrary",),
            vmem_limit_bytes=_vmem_limit([w_rows, patches_t, b_col], co * x * 2),
        ),
    )(w_rows, patches_t, b_col)


def head_fc(x, w4, b4, w5, b5):
    """Fused head: relu(x @ w4 + b4) @ w5 + b5 -> (N, 4) f32."""
    m, k = x.shape
    _, n1 = w4.shape
    _, n2 = w5.shape
    return pl.pallas_call(
        _head_kernel,
        out_shape=jax.ShapeDtypeStruct((m, n2), jnp.float32),
        grid=(1,),
        in_specs=[
            pl.BlockSpec((m, k), lambda i: (0, 0)),
            pl.BlockSpec((k, n1), lambda i: (0, 0)),
            pl.BlockSpec((1, n1), lambda i: (0, 0)),
            pl.BlockSpec((n1, n2), lambda i: (0, 0)),
            pl.BlockSpec((1, n2), lambda i: (0, 0)),
        ],
        out_specs=pl.BlockSpec((m, n2), lambda i: (0, 0)),
        compiler_params=pltpu.CompilerParams(
            dimension_semantics=("arbitrary",),
            vmem_limit_bytes=_vmem_limit([x, w4, b4, w5, b5], m * n2 * 4),
        ),
    )(x, w4, b4, w5, b5)


# ---------------------------------------------------------------------------
# im2col (transposed) on channel-leading (C, N, H, W) bf16 activations:
# rows iterate (kh, kw, c), columns iterate (n, ho, wo). No big transposes.
# ---------------------------------------------------------------------------
def _im2col_T(x_cnhw, kh, kw, stride):
    C, N, H, W = x_cnhw.shape
    Ho = (H - kh) // stride + 1
    Wo = (W - kw) // stride + 1
    slices = []
    for i in range(kh):
        for j in range(kw):
            slices.append(
                x_cnhw[:, :, i: i + stride * (Ho - 1) + 1: stride,
                             j: j + stride * (Wo - 1) + 1: stride])
    patches = jnp.stack(slices, axis=0)          # (kh*kw, C, N, Ho, Wo)
    return patches.reshape(kh * kw * C, N * Ho * Wo), Ho, Wo


def conv2d_relu_cnhw(x_cnhw, w_rows, b_col, kh, kw, stride):
    """x: (Cin, N, H, W) bf16; w_rows: (Cout, kh*kw*Cin) bf16; b_col: (Cout, 1) f32.
    Returns (Cout, N, Ho, Wo) bf16."""
    _, N, _, _ = x_cnhw.shape
    patches_t, Ho, Wo = _im2col_T(x_cnhw, kh, kw, stride)
    out = conv_matmul_relu(w_rows, patches_t, b_col)        # (Cout, N*Ho*Wo)
    return out.reshape(w_rows.shape[0], N, Ho, Wo)


# ---------------------------------------------------------------------------
# Parameters: PyTorch-layout f32 source of truth + one-time kernel re-layout.
# ---------------------------------------------------------------------------
def init_params(key):
    ks = jax.random.split(key, 10)

    def kaiming(k, shape, fan_in):
        return ((2.0 / fan_in) ** 0.5) * jax.random.normal(k, shape, jnp.float32)

    def bias(k, n, fan_in):
        bound = 1.0 / (fan_in ** 0.5)
        return jax.random.uniform(k, (n,), jnp.float32, -bound, bound)

    return {
        "w1": kaiming(ks[0], (32, 4, 8, 8), 4 * 8 * 8), "b1": bias(ks[1], 32, 4 * 8 * 8),
        "w2": kaiming(ks[2], (64, 32, 4, 4), 32 * 4 * 4), "b2": bias(ks[3], 64, 32 * 4 * 4),
        "w3": kaiming(ks[4], (64, 64, 3, 3), 64 * 3 * 3), "b3": bias(ks[5], 64, 64 * 3 * 3),
        "w4": kaiming(ks[6], (512, 7 * 7 * 64), 7 * 7 * 64), "b4": bias(ks[7], 512, 7 * 7 * 64),
        "w5": kaiming(ks[8], (4, 512), 512), "b5": bias(ks[9], 4, 512),
    }


def prepare_params(p):
    """One-time re-layout/cast so the forward pass does no per-call weight
    transposes, reshapes, pads or casts."""
    def conv_rows(w):   # (Cout, Cin, kh, kw) -> (Cout, kh*kw*Cin), (kh,kw,c) order
        co, ci, kh, kw = w.shape
        return jnp.transpose(w, (0, 2, 3, 1)).reshape(co, kh * kw * ci).astype(jnp.bfloat16)

    return {
        "w1": conv_rows(p["w1"]), "b1": p["b1"].reshape(-1, 1).astype(jnp.float32),
        "w2": conv_rows(p["w2"]), "b2": p["b2"].reshape(-1, 1).astype(jnp.float32),
        "w3": conv_rows(p["w3"]), "b3": p["b3"].reshape(-1, 1).astype(jnp.float32),
        "w4": p["w4"].T.astype(jnp.bfloat16), "b4": p["b4"].reshape(1, -1).astype(jnp.float32),
        "w5": p["w5"].T.astype(jnp.bfloat16), "b5": p["b5"].reshape(1, -1).astype(jnp.float32),
    }


# ---------------------------------------------------------------------------
# DQN forward pass (PyTorch semantics; input is NCHW like the module).
# ---------------------------------------------------------------------------
def dqn_forward(kp, x_nchw):
    # bf16 cast ONCE, then channel-leading layout for transposed-im2col convs.
    x = jnp.transpose(x_nchw.astype(jnp.bfloat16), (1, 0, 2, 3))   # (C, N, H, W)
    x = conv2d_relu_cnhw(x, kp["w1"], kp["b1"], 8, 8, 4)           # (32, N, 20, 20)
    x = conv2d_relu_cnhw(x, kp["w2"], kp["b2"], 4, 4, 2)           # (64, N, 9, 9)
    x = conv2d_relu_cnhw(x, kp["w3"], kp["b3"], 3, 3, 1)           # (64, N, 7, 7)
    n = x.shape[1]
    # Flatten in PyTorch's (c, h, w) order: one tiny (6 KB) transpose.
    x = jnp.transpose(x, (1, 0, 2, 3)).reshape(n, -1)              # (N, 3136) bf16
    return head_fc(x, kp["w4"], kp["b4"], kp["w5"], kp["b5"])      # (N, 4) f32


if __name__ == "__main__":
    key = jax.random.PRNGKey(0)
    pkey, xkey = jax.random.split(key)
    params = init_params(pkey)
    kparams = prepare_params(params)
    # The head's 7*7*64 input dimension forces an 84x84 spatial input (Atari).
    x = jax.random.normal(xkey, (2, 4, 84, 84), dtype=jnp.float32)

    fwd = jax.jit(dqn_forward)
    out = jax.block_until_ready(fwd(kparams, x))
    assert out.shape == (2, 4), out.shape

    # Reference with the same numerics (bf16 matmul operands, f32 accumulate),
    # built from the original PyTorch-layout f32 parameters with lax.conv —
    # independently validates the weight re-layout and im2col orientation.
    def ref_forward(p, x):
        bf = jnp.bfloat16

        def conv(x, w, b, s):
            y = jax.lax.conv_general_dilated(
                x.astype(bf), w.astype(bf), (s, s), "VALID",
                dimension_numbers=("NCHW", "OIHW", "NCHW"),
                preferred_element_type=jnp.float32)
            return jax.nn.relu(y + b[None, :, None, None])

        y = conv(x, p["w1"], p["b1"], 4)
        y = conv(y, p["w2"], p["b2"], 2)
        y = conv(y, p["w3"], p["b3"], 1)
        y = y.reshape(y.shape[0], -1)
        y = jax.nn.relu(jnp.dot(y.astype(bf), p["w4"].T.astype(bf),
                                preferred_element_type=jnp.float32) + p["b4"])
        return jnp.dot(y.astype(bf), p["w5"].T.astype(bf),
                       preferred_element_type=jnp.float32) + p["b5"]

    ref = ref_forward(params, x)
    assert jnp.allclose(out, ref, atol=2e-2, rtol=2e-2), (out, ref)
    print("KERNEL_OK")
</pallas_src>

<mosaic_0001>
module attributes {stable_mosaic.version = 11 : i64} {
  func.func @_conv_mm_kernel(%arg0: i32, %arg1: memref<32x256xbf16, #tpu.memory_space<vmem>>, %arg2: memref<256x800xbf16, #tpu.memory_space<vmem>>, %arg3: memref<32x1xf32, #tpu.memory_space<vmem>>, %arg4: memref<32x800xbf16, #tpu.memory_space<vmem>>) attributes {dimension_semantics = [#tpu.dimension_semantics<arbitrary>], iteration_bounds = array<i64: 1>, scalar_prefetch = 0 : i64, scratch_operands = 0 : i64, tpu.core_type = #tpu.core_type<tc>, window_params = [{pipeline_mode = #tpu.pipeline_mode<synchronous>, transform_indices = @transform_0, window_bounds = array<i64: 32, 256>}, {pipeline_mode = #tpu.pipeline_mode<synchronous>, transform_indices = @transform_1, window_bounds = array<i64: 256, 800>}, {pipeline_mode = #tpu.pipeline_mode<synchronous>, transform_indices = @transform_2, window_bounds = array<i64: 32, 1>}, {pipeline_mode = #tpu.pipeline_mode<synchronous>, transform_indices = @transform_3, window_bounds = array<i64: 32, 800>}]} {
    %c0 = arith.constant 0 : index
    %c0_0 = arith.constant 0 : index
    %0 = vector.load %arg1[%c0, %c0_0] : memref<32x256xbf16, #tpu.memory_space<vmem>>, vector<32x256xbf16>
    %c0_1 = arith.constant 0 : index
    %c0_2 = arith.constant 0 : index
    %1 = vector.load %arg2[%c0_1, %c0_2] : memref<256x800xbf16, #tpu.memory_space<vmem>>, vector<256x800xbf16>
    %cst = arith.constant dense<0.000000e+00> : vector<32x800xf32>
    %2 = tpu.matmul %0, %1, %cst {dimension_numbers = #tpu.dot_dimension_numbers<[1], [0], [0], [1], [0, 0, 1, 1], [], []>} : vector<32x256xbf16>, vector<256x800xbf16>, vector<32x800xf32> -> vector<32x800xf32>
    %c0_3 = arith.constant 0 : index
    %c0_4 = arith.constant 0 : index
    %3 = vector.load %arg3[%c0_3, %c0_4] : memref<32x1xf32, #tpu.memory_space<vmem>>, vector<32x1xf32>
    %4 = vector.broadcast %3 : vector<32x1xf32> to vector<32x800xf32>
    %5 = arith.addf %2, %4 : vector<32x800xf32>
    %cst_5 = arith.constant 0.000000e+00 : f32
    %6 = vector.broadcast %cst_5 : f32 to vector<32x800xf32>
    %7 = arith.maximumf %5, %6 : vector<32x800xf32>
    %8 = arith.truncf %7 : vector<32x800xf32> to vector<32x800xbf16>
    %c0_6 = arith.constant 0 : index
    %c0_7 = arith.constant 0 : index
    %9 = vector.load %arg4[%c0_6, %c0_7] : memref<32x800xbf16, #tpu.memory_space<vmem>>, vector<32x800xbf16>
    tpu.vector_store %arg4[%c0_6, %c0_7], %8 {strides = array<i32>} : memref<32x800xbf16, #tpu.memory_space<vmem>>, vector<32x800xbf16>,
    return
  }
  func.func @transform_0(%arg0: i32) -> (i32, i32) {
    %c0_i32 = arith.constant 0 : i32
    %c0_i32_0 = arith.constant 0 : i32
    %c0_i32_1 = arith.constant 0 : i32
    return %c0_i32, %c0_i32_0 : i32, i32
  }
  func.func @transform_1(%arg0: i32) -> (i32, i32) {
    %c0_i32 = arith.constant 0 : i32
    %c0_i32_0 = arith.constant 0 : i32
    %c0_i32_1 = arith.constant 0 : i32
    return %c0_i32, %c0_i32_0 : i32, i32
  }
  func.func @transform_2(%arg0: i32) -> (i32, i32) {
    %c0_i32 = arith.constant 0 : i32
    %c0_i32_0 = arith.constant 0 : i32
    %c0_i32_1 = arith.constant 0 : i32
    return %c0_i32, %c0_i32_0 : i32, i32
  }
  func.func @transform_3(%arg0: i32) -> (i32, i32) {
    %c0_i32 = arith.constant 0 : i32
    %c0_i32_0 = arith.constant 0 : i32
    %c0_i32_1 = arith.constant 0 : i32
    return %c0_i32, %c0_i32_0 : i32, i32
  }
}

module attributes {stable_mosaic.version = 11 : i64} {
  func.func @_conv_mm_kernel(%arg0: i32, %arg1: memref<64x512xbf16, #tpu.memory_space<vmem>>, %arg2: memref<512x162xbf16, #tpu.memory_space<vmem>>, %arg3: memref<64x1xf32, #tpu.memory_space<vmem>>, %arg4: memref<64x162xbf16, #tpu.memory_space<vmem>>) attributes {dimension_semantics = [#tpu.dimension_semantics<arbitrary>], iteration_bounds = array<i64: 1>, scalar_prefetch = 0 : i64, scratch_operands = 0 : i64, tpu.core_type = #tpu.core_type<tc>, window_params = [{pipeline_mode = #tpu.pipeline_mode<synchronous>, transform_indices = @transform_0, window_bounds = array<i64: 64, 512>}, {pipeline_mode = #tpu.pipeline_mode<synchronous>, transform_indices = @transform_1, window_bounds = array<i64: 512, 162>}, {pipeline_mode = #tpu.pipeline_mode<synchronous>, transform_indices = @transform_2, window_bounds = array<i64: 64, 1>}, {pipeline_mode = #tpu.pipeline_mode<synchronous>, transform_indices = @transform_3, window_bounds = array<i64: 64, 162>}]} {
    %c0 = arith.constant 0 : index
    %c0_0 = arith.constant 0 : index
    %0 = vector.load %arg1[%c0, %c0_0] : memref<64x512xbf16, #tpu.memory_space<vmem>>, vector<64x512xbf16>
    %c0_1 = arith.constant 0 : index
    %c0_2 = arith.constant 0 : index
    %1 = vector.load %arg2[%c0_1, %c0_2] : memref<512x162xbf16, #tpu.memory_space<vmem>>, vector<512x162xbf16>
    %cst = arith.constant dense<0.000000e+00> : vector<64x162xf32>
    %2 = tpu.matmul %0, %1, %cst {dimension_numbers = #tpu.dot_dimension_numbers<[1], [0], [0], [1], [0, 0, 1, 1], [], []>} : vector<64x512xbf16>, vector<512x162xbf16>, vector<64x162xf32> -> vector<64x162xf32>
    %c0_3 = arith.constant 0 : index
    %c0_4 = arith.constant 0 : index
    %3 = vector.load %arg3[%c0_3, %c0_4] : memref<64x1xf32, #tpu.memory_space<vmem>>, vector<64x1xf32>
    %4 = vector.broadcast %3 : vector<64x1xf32> to vector<64x162xf32>
    %5 = arith.addf %2, %4 : vector<64x162xf32>
    %cst_5 = arith.constant 0.000000e+00 : f32
    %6 = vector.broadcast %cst_5 : f32 to vector<64x162xf32>
    %7 = arith.maximumf %5, %6 : vector<64x162xf32>
    %8 = arith.truncf %7 : vector<64x162xf32> to vector<64x162xbf16>
    %c0_6 = arith.constant 0 : index
    %c0_7 = arith.constant 0 : index
    %9 = vector.load %arg4[%c0_6, %c0_7] : memref<64x162xbf16, #tpu.memory_space<vmem>>, vector<64x162xbf16>
    tpu.vector_store %arg4[%c0_6, %c0_7], %8 {strides = array<i32>} : memref<64x162xbf16, #tpu.memory_space<vmem>>, vector<64x162xbf16>,
    return
  }
  func.func @transform_0(%arg0: i32) -> (i32, i32) {
    %c0_i32 = arith.constant 0 : i32
    %c0_i32_0 = arith.constant 0 : i32
    %c0_i32_1 = arith.constant 0 : i32
    return %c0_i32, %c0_i32_0 : i32, i32
  }
  func.func @transform_1(%arg0: i32) -> (i32, i32) {
    %c0_i32 = arith.constant 0 : i32
    %c0_i32_0 = arith.constant 0 : i32
    %c0_i32_1 = arith.constant 0 : i32
    return %c0_i32, %c0_i32_0 : i32, i32
  }
  func.func @transform_2(%arg0: i32) -> (i32, i32) {
    %c0_i32 = arith.constant 0 : i32
    %c0_i32_0 = arith.constant 0 : i32
    %c0_i32_1 = arith.constant 0 : i32
    return %c0_i32, %c0_i32_0 : i32, i32
  }
  func.func @transform_3(%arg0: i32) -> (i32, i32) {
    %c0_i32 = arith.constant 0 : i32
    %c0_i32_0 = arith.constant 0 : i32
    %c0_i32_1 = arith.constant 0 : i32
    return %c0_i32, %c0_i32_0 : i32, i32
  }
}

module attributes {stable_mosaic.version = 11 : i64} {
  func.func @_conv_mm_kernel(%arg0: i32, %arg1: memref<64x576xbf16, #tpu.memory_space<vmem>>, %arg2: memref<576x98xbf16, #tpu.memory_space<vmem>>, %arg3: memref<64x1xf32, #tpu.memory_space<vmem>>, %arg4: memref<64x98xbf16, #tpu.memory_space<vmem>>) attributes {dimension_semantics = [#tpu.dimension_semantics<arbitrary>], iteration_bounds = array<i64: 1>, scalar_prefetch = 0 : i64, scratch_operands = 0 : i64, tpu.core_type = #tpu.core_type<tc>, window_params = [{pipeline_mode = #tpu.pipeline_mode<synchronous>, transform_indices = @transform_0, window_bounds = array<i64: 64, 576>}, {pipeline_mode = #tpu.pipeline_mode<synchronous>, transform_indices = @transform_1, window_bounds = array<i64: 576, 98>}, {pipeline_mode = #tpu.pipeline_mode<synchronous>, transform_indices = @transform_2, window_bounds = array<i64: 64, 1>}, {pipeline_mode = #tpu.pipeline_mode<synchronous>, transform_indices = @transform_3, window_bounds = array<i64: 64, 98>}]} {
    %c0 = arith.constant 0 : index
    %c0_0 = arith.constant 0 : index
    %0 = vector.load %arg1[%c0, %c0_0] : memref<64x576xbf16, #tpu.memory_space<vmem>>, vector<64x576xbf16>
    %c0_1 = arith.constant 0 : index
    %c0_2 = arith.constant 0 : index
    %1 = vector.load %arg2[%c0_1, %c0_2] : memref<576x98xbf16, #tpu.memory_space<vmem>>, vector<576x98xbf16>
    %cst = arith.constant dense<0.000000e+00> : vector<64x98xf32>
    %2 = tpu.matmul %0, %1, %cst {dimension_numbers = #tpu.dot_dimension_numbers<[1], [0], [0], [1], [0, 0, 1, 1], [], []>} : vector<64x576xbf16>, vector<576x98xbf16>, vector<64x98xf32> -> vector<64x98xf32>
    %c0_3 = arith.constant 0 : index
    %c0_4 = arith.constant 0 : index
    %3 = vector.load %arg3[%c0_3, %c0_4] : memref<64x1xf32, #tpu.memory_space<vmem>>, vector<64x1xf32>
    %4 = vector.broadcast %3 : vector<64x1xf32> to vector<64x98xf32>
    %5 = arith.addf %2, %4 : vector<64x98xf32>
    %cst_5 = arith.constant 0.000000e+00 : f32
    %6 = vector.broadcast %cst_5 : f32 to vector<64x98xf32>
    %7 = arith.maximumf %5, %6 : vector<64x98xf32>
    %8 = arith.truncf %7 : vector<64x98xf32> to vector<64x98xbf16>
    %c0_6 = arith.constant 0 : index
    %c0_7 = arith.constant 0 : index
    %9 = vector.load %arg4[%c0_6, %c0_7] : memref<64x98xbf16, #tpu.memory_space<vmem>>, vector<64x98xbf16>
    tpu.vector_store %arg4[%c0_6, %c0_7], %8 {strides = array<i32>} : memref<64x98xbf16, #tpu.memory_space<vmem>>, vector<64x98xbf16>,
    return
  }
  func.func @transform_0(%arg0: i32) -> (i32, i32) {
    %c0_i32 = arith.constant 0 : i32
    %c0_i32_0 = arith.constant 0 : i32
    %c0_i32_1 = arith.constant 0 : i32
    return %c0_i32, %c0_i32_0 : i32, i32
  }
  func.func @transform_1(%arg0: i32) -> (i32, i32) {
    %c0_i32 = arith.constant 0 : i32
    %c0_i32_0 = arith.constant 0 : i32
    %c0_i32_1 = arith.constant 0 : i32
    return %c0_i32, %c0_i32_0 : i32, i32
  }
  func.func @transform_2(%arg0: i32) -> (i32, i32) {
    %c0_i32 = arith.constant 0 : i32
    %c0_i32_0 = arith.constant 0 : i32
    %c0_i32_1 = arith.constant 0 : i32
    return %c0_i32, %c0_i32_0 : i32, i32
  }
  func.func @transform_3(%arg0: i32) -> (i32, i32) {
    %c0_i32 = arith.constant 0 : i32
    %c0_i32_0 = arith.constant 0 : i32
    %c0_i32_1 = arith.constant 0 : i32
    return %c0_i32, %c0_i32_0 : i32, i32
  }
}

module attributes {stable_mosaic.version = 11 : i64} {
  func.func @_head_kernel(%arg0: i32, %arg1: memref<2x3136xbf16, #tpu.memory_space<vmem>>, %arg2: memref<3136x512xbf16, #tpu.memory_space<vmem>>, %arg3: memref<1x512xf32, #tpu.memory_space<vmem>>, %arg4: memref<512x4xbf16, #tpu.memory_space<vmem>>, %arg5: memref<1x4xf32, #tpu.memory_space<vmem>>, %arg6: memref<2x4xf32, #tpu.memory_space<vmem>>) attributes {dimension_semantics = [#tpu.dimension_semantics<arbitrary>], iteration_bounds = array<i64: 1>, scalar_prefetch = 0 : i64, scratch_operands = 0 : i64, tpu.core_type = #tpu.core_type<tc>, window_params = [{pipeline_mode = #tpu.pipeline_mode<synchronous>, transform_indices = @transform_0, window_bounds = array<i64: 2, 3136>}, {pipeline_mode = #tpu.pipeline_mode<synchronous>, transform_indices = @transform_1, window_bounds = array<i64: 3136, 512>}, {pipeline_mode = #tpu.pipeline_mode<synchronous>, transform_indices = @transform_2, window_bounds = array<i64: 1, 512>}, {pipeline_mode = #tpu.pipeline_mode<synchronous>, transform_indices = @transform_3, window_bounds = array<i64: 512, 4>}, {pipeline_mode = #tpu.pipeline_mode<synchronous>, transform_indices = @transform_4, window_bounds = array<i64: 1, 4>}, {pipeline_mode = #tpu.pipeline_mode<synchronous>, transform_indices = @transform_5, window_bounds = array<i64: 2, 4>}]} {
    %c0 = arith.constant 0 : index
    %c0_0 = arith.constant 0 : index
    %0 = vector.load %arg1[%c0, %c0_0] : memref<2x3136xbf16, #tpu.memory_space<vmem>>, vector<2x3136xbf16>
    %c0_1 = arith.constant 0 : index
    %c0_2 = arith.constant 0 : index
    %1 = vector.load %arg2[%c0_1, %c0_2] : memref<3136x512xbf16, #tpu.memory_space<vmem>>, vector<3136x512xbf16>
    %cst = arith.constant dense<0.000000e+00> : vector<2x512xf32>
    %2 = tpu.matmul %0, %1, %cst {dimension_numbers = #tpu.dot_dimension_numbers<[1], [0], [0], [1], [0, 0, 1, 1], [], []>} : vector<2x3136xbf16>, vector<3136x512xbf16>, vector<2x512xf32> -> vector<2x512xf32>
    %c0_3 = arith.constant 0 : index
    %c0_4 = arith.constant 0 : index
    %3 = vector.load %arg3[%c0_3, %c0_4] : memref<1x512xf32, #tpu.memory_space<vmem>>, vector<1x512xf32>
    %4 = vector.broadcast %3 : vector<1x512xf32> to vector<2x512xf32>
    %5 = arith.addf %2, %4 : vector<2x512xf32>
    %cst_5 = arith.constant 0.000000e+00 : f32
    %6 = vector.broadcast %cst_5 : f32 to vector<2x512xf32>
    %7 = arith.maximumf %5, %6 : vector<2x512xf32>
    %8 = arith.truncf %7 : vector<2x512xf32> to vector<2x512xbf16>
    %c0_6 = arith.constant 0 : index
    %c0_7 = arith.constant 0 : index
    %9 = vector.load %arg4[%c0_6, %c0_7] : memref<512x4xbf16, #tpu.memory_space<vmem>>, vector<512x4xbf16>
    %cst_8 = arith.constant dense<0.000000e+00> : vector<2x4xf32>
    %10 = tpu.matmul %8, %9, %cst_8 {dimension_numbers = #tpu.dot_dimension_numbers<[1], [0], [0], [1], [0, 0, 1, 1], [], []>} : vector<2x512xbf16>, vector<512x4xbf16>, vector<2x4xf32> -> vector<2x4xf32>
    %c0_9 = arith.constant 0 : index
    %c0_10 = arith.constant 0 : index
    %11 = vector.load %arg5[%c0_9, %c0_10] : memref<1x4xf32, #tpu.memory_space<vmem>>, vector<1x4xf32>
    %12 = vector.broadcast %11 : vector<1x4xf32> to vector<2x4xf32>
    %13 = arith.addf %10, %12 : vector<2x4xf32>
    %c0_11 = arith.constant 0 : index
    %c0_12 = arith.constant 0 : index
    %14 = vector.load %arg6[%c0_11, %c0_12] : memref<2x4xf32, #tpu.memory_space<vmem>>, vector<2x4xf32>
    tpu.vector_store %arg6[%c0_11, %c0_12], %13 {strides = array<i32>} : memref<2x4xf32, #tpu.memory_space<vmem>>, vector<2x4xf32>,
    return
  }
  func.func @transform_0(%arg0: i32) -> (i32, i32) {
    %c0_i32 = arith.constant 0 : i32
    %c0_i32_0 = arith.constant 0 : i32
    %c0_i32_1 = arith.constant 0 : i32
    return %c0_i32, %c0_i32_0 : i32, i32
  }
  func.func @transform_1(%arg0: i32) -> (i32, i32) {
    %c0_i32 = arith.constant 0 : i32
    %c0_i32_0 = arith.constant 0 : i32
    %c0_i32_1 = arith.constant 0 : i32
    return %c0_i32, %c0_i32_0 : i32, i32
  }
  func.func @transform_2(%arg0: i32) -> (i32, i32) {
    %c0_i32 = arith.constant 0 : i32
    %c0_i32_0 = arith.constant 0 : i32
    %c0_i32_1 = arith.constant 0 : i32
    return %c0_i32, %c0_i32_0 : i32, i32
  }
  func.func @transform_3(%arg0: i32) -> (i32, i32) {
    %c0_i32 = arith.constant 0 : i32
    %c0_i32_0 = arith.constant 0 : i32
    %c0_i32_1 = arith.constant 0 : i32
    return %c0_i32, %c0_i32_0 : i32, i32
  }
  func.func @transform_4(%arg0: i32) -> (i32, i32) {
    %c0_i32 = arith.constant 0 : i32
    %c0_i32_0 = arith.constant 0 : i32
    %c0_i32_1 = arith.constant 0 : i32
    return %c0_i32, %c0_i32_0 : i32, i32
  }
  func.func @transform_5(%arg0: i32) -> (i32, i32) {
    %c0_i32 = arith.constant 0 : i32
    %c0_i32_0 = arith.constant 0 : i32
    %c0_i32_1 = arith.constant 0 : i32
    return %c0_i32, %c0_i32_0 : i32, i32
  }
}

</mosaic_0001>

<bundles_post_ra>
// kernel: dqn_forward.4
= control target key start
LH: loop header
LB: loop body
LE: loop exit
PB: predicated region body
PF: predicated region fallthrough
CT: control target
= control target key end

     0   :  { %v1457_v11 = vmov 0   ;;  %vm1094_vm0 = vcmask 257024   ;;  %s1950_s1 = inlined_call_operand.vmem [shape: bf16[256,800], index: 1, kind: input, shape index: {}]   ;;  %s1951_s0 = inlined_call_operand.vmem [shape: bf16[32,256], index: 0, kind: input, shape index: {}]   ;;  %s1952_s2 = inlined_call_operand.vmem [shape: f32[32,1], index: 2, kind: input, shape index: {}]   ;;  %s1953_s3 = inlined_call_operand.vmem [shape: bf16[32,800], index: 3, kind: output, shape index: {}]  }
   0x1   :  { %v1291_v0 = vld [vmem:[%s1950_s1 + $0x4] ss:$28 sps:$4 sm:$0xff]   ;;  %v1294_v2 = vld [vmem:[%s1950_s1 + $0x3c] ss:$28 sps:$4 sm:$0xff]   ;;  %v1297_v4 = vld [vmem:[%s1950_s1 + $0x74] ss:$28 sps:$4 sm:$0xff]   ;;  %1289 = vset.pattern.permute.xlu0 %v1457_v11  ;;  %1290 = vset.pattern.permute.xlu1 %v1457_v11 }
   0x2   :  { %v1293_v1 = vld [vmem:[%s1950_s1] ss:$28 sps:$4 sm:$0xff]   ;;  %767 = vmatprep.subr.bf16.mxu0 %v1291_v0  ;;  %v1296_v3 = vld [vmem:[%s1950_s1 + $0x38] ss:$28 sps:$4 sm:$0xff]   ;;  %v1299_v5 = vld [vmem:[%s1950_s1 + $0x70] ss:$28 sps:$4 sm:$0xff]  }
   0x3   :  { %768 = vmatpush1.bf16.msra.mxu0 %v1293_v1  ;;  %v1300_v6 = vld [vmem:[%s1950_s1 + $0xac] ss:$28 sps:$4 sm:$0xff]   ;;  %v1303_v10 = vld [vmem:[%s1950_s1 + $0xe4] ss:$28 sps:$4 sm:$0xff]   ;;  %v1324_v15 = vld [vmem:[%s1950_s1 + $0x7c] ss:$28 sps:$4 sm:$0xff]  }
   0x4   :  { %769 = vmatprep.subr.bf16.mxu0 %v1294_v2  ;;  %v1312_v7 = vld [vmem:[%s1950_s1 + $0xc] ss:$28 sps:$4 sm:$0xff]   ;;  %v1318_v12 = vld [vmem:[%s1950_s1 + $0x44] ss:$28 sps:$4 sm:$0xff]   ;;  %v1306_v16 = vld [vmem:[%s1950_s1 + $0x11c] ss:$28 sps:$4 sm:$0xff]  }
   0x5   :  { %v1314_v8 = vld [vmem:[%s1950_s1 + $0x8] ss:$28 sps:$4 sm:$0xff]   ;;  %820 = vmatprep.subr.bf16.mxu1 %v1312_v7  ;;  %v1320_v13 = vld [vmem:[%s1950_s1 + $0x40] ss:$28 sps:$4 sm:$0xff]   ;;  %v1326_v17 = vld [vmem:[%s1950_s1 + $0x78] ss:$28 sps:$4 sm:$0xff]  }
   0x6   :  { %v1302_v9 = vld [vmem:[%s1950_s1 + $0xa8] ss:$28 sps:$4 sm:$0xff]   ;;  %821 = vmatpush1.bf16.msra.mxu1 %v1314_v8  ;;  %v1305_v14 = vld [vmem:[%s1950_s1 + $0xe0] ss:$28 sps:$4 sm:$0xff]   ;;  %v1330_v18 = vld [vmem:[%s1950_s1 + $0xb4] ss:$28 sps:$4 sm:$0xff]  }
   0x7   :  { %770 = vmatpush1.bf16.msra.mxu0 %v1296_v3  ;;  %822 = vmatprep.subr.bf16.mxu1 %v1318_v12  ;;  %v1308_v19 = vld [vmem:[%s1950_s1 + $0x118] ss:$28 sps:$4 sm:$0xff]   ;;  %v1332_v21 = vld [vmem:[%s1950_s1 + $0xb0] ss:$28 sps:$4 sm:$0xff]   ;;  %v1338_v25 = vld [vmem:[%s1950_s1 + $0xe8] ss:$28 sps:$4 sm:$0xff]  }
   0x8   :  { %771 = vmatprep.subr.bf16.mxu0 %v1297_v4  ;;  %v1309_v20 = vld [vmem:[%s1950_s1 + $0x154] ss:$28 sps:$4 sm:$0xff]   ;;  %v1336_v22 = vld [vmem:[%s1950_s1 + $0xec] ss:$28 sps:$4 sm:$0xff]   ;;  %v1342_v26 = vld [vmem:[%s1950_s1 + $0x124] ss:$28 sps:$4 sm:$0xff]  }
   0x9   :  { %v1311_v23 = vld [vmem:[%s1950_s1 + $0x150] ss:$28 sps:$4 sm:$0xff]   ;;  %v1317_v27 = vld [vmem:[%s1950_s1 + $0x188] ss:$28 sps:$4 sm:$0xff]   ;;  %v1344_v29 = vld [vmem:[%s1950_s1 + $0x120] ss:$28 sps:$4 sm:$0xff]  }
   0xa   :  { %823 = vmatpush1.bf16.msra.mxu1 %v1320_v13  ;;  %v1315_v24 = vld [vmem:[%s1950_s1 + $0x18c] ss:$28 sps:$4 sm:$0xff]   ;;  %v1321_v28 = vld [vmem:[%s1950_s1 + $0x1c4] ss:$28 sps:$4 sm:$0xff]   ;;  %v1348_v30 = vld [vmem:[%s1950_s1 + $0x15c] ss:$28 sps:$4 sm:$0xff]  }
   0xb   :  { %772 = vmatpush1.bf16.msra.mxu0 %v1299_v5  ;;  %824 = vmatprep.subr.bf16.mxu1 %v1324_v15  ;;  %v1323_v31 = vld [vmem:[%s1950_s1 + $0x1c0] ss:$28 sps:$4 sm:$0xff]   ;;  %v1350_v33 = vld [vmem:[%s1950_s1 + $0x158] ss:$28 sps:$4 sm:$0xff]   ;;  %v1586_v36 = vld [vmem:[%s1951_s0 + $0x4] ss:$8 sps:$4 sm:$0xff]  }
   0xc   :  { %773 = vmatprep.subr.bf16.mxu0 %v1300_v6  ;;  %v1327_v32 = vld [vmem:[%s1950_s1 + $0x1fc] ss:$28 sps:$4 sm:$0xff]   ;;  %v1354_v34 = vld [vmem:[%s1950_s1 + $0x194] ss:$28 sps:$4 sm:$0xff]   ;;  %799 = vmatprep.mubr.bf16.mxu0 %v1586_v36  ;;  %v1360_v39 = vld [vmem:[%s1950_s1 + $0x1cc] ss:$28 sps:$4 sm:$0xff]  }
   0xd   :  { %v1329_v35 = vld [vmem:[%s1950_s1 + $0x1f8] ss:$28 sps:$4 sm:$0xff]   ;;  %v1356_v38 = vld [vmem:[%s1950_s1 + $0x190] ss:$28 sps:$4 sm:$0xff]   ;;  %852 = vmatprep.mubr.bf16.mxu1 %v1586_v36  ;;  %v1362_v42 = vld [vmem:[%s1950_s1 + $0x1c8] ss:$28 sps:$4 sm:$0xff]  }
   0xe   :  { %825 = vmatpush1.bf16.msra.mxu1 %v1326_v17  ;;  %v1333_v37 = vld [vmem:[%s1950_s1 + $0x234] ss:$28 sps:$4 sm:$0xff]   ;;  %v1339_v41 = vld [vmem:[%s1950_s1 + $0x26c] ss:$28 sps:$4 sm:$0xff]   ;;  %v1366_v43 = vld [vmem:[%s1950_s1 + $0x204] ss:$28 sps:$4 sm:$0xff]  }
   0xf   :  { %774 = vmatpush1.bf16.msra.mxu0 %v1302_v9  ;;  %826 = vmatprep.subr.bf16.mxu1 %v1330_v18  ;;  %v1335_v40 = vld [vmem:[%s1950_s1 + $0x230] ss:$28 sps:$4 sm:$0xff]   ;;  %v1341_v44 = vld [vmem:[%s1950_s1 + $0x268] ss:$28 sps:$4 sm:$0xff]   ;;  %v1370_v46 = vld [vmem:[%s1950_s1 + $0x200] ss:$28 sps:$4 sm:$0xff]  }
  0x10   :  { %775 = vmatprep.subr.bf16.mxu0 %v1303_v10  ;;  %v1345_v45 = vld [vmem:[%s1950_s1 + $0x2a4] ss:$28 sps:$4 sm:$0xff]   ;;  %v1375_v47 = vld [vmem:[%s1950_s1 + $0x23c] ss:$28 sps:$4 sm:$0xff]   ;;  %v1381_v51 = vld [vmem:[%s1950_s1 + $0x274] ss:$28 sps:$4 sm:$0xff]  }
  0x11   :  { %v1347_v48 = vld [vmem:[%s1950_s1 + $0x2a0] ss:$28 sps:$4 sm:$0xff]   ;;  %v1377_v50 = vld [vmem:[%s1950_s1 + $0x238] ss:$28 sps:$4 sm:$0xff]   ;;  %v1383_v54 = vld [vmem:[%s1950_s1 + $0x270] ss:$28 sps:$4 sm:$0xff]  }
  0x12   :  { %827 = vmatpush1.bf16.msra.mxu1 %v1332_v21  ;;  %v1351_v49 = vld [vmem:[%s1950_s1 + $0x2dc] ss:$28 sps:$4 sm:$0xff]   ;;  %v1357_v53 = vld [vmem:[%s1950_s1 + $0x314] ss:$28 sps:$4 sm:$0xff]   ;;  %v1387_v55 = vld [vmem:[%s1950_s1 + $0x2ac] ss:$28 sps:$4 sm:$0xff]  }
  0x13   :  { %776 = vmatpush1.bf16.msra.mxu0 %v1305_v14  ;;  %828 = vmatprep.subr.bf16.mxu1 %v1336_v22  ;;  %v1353_v52 = vld [vmem:[%s1950_s1 + $0x2d8] ss:$28 sps:$4 sm:$0xff]   ;;  %v1359_v56 = vld [vmem:[%s1950_s1 + $0x310] ss:$28 sps:$4 sm:$0xff]   ;;  %v1389_v58 = vld [vmem:[%s1950_s1 + $0x2a8] ss:$28 sps:$4 sm:$0xff]  }
  0x14   :  { %777 = vmatprep.subr.bf16.mxu0 %v1306_v16  ;;  %v1363_v57 = vld [vmem:[%s1950_s1 + $0x34c] ss:$28 sps:$4 sm:$0xff]   ;;  %v1393_v59 = vld [vmem:[%s1950_s1 + $0x2e4] ss:$28 sps:$4 sm:$0xff]   ;;  %v1374_v62 = vld [vmem:[%s1950_s1 + $0x14] ss:$28 sps:$4 sm:$0xff]  }
  0x15   :  { %v1365_v60 = vld [vmem:[%s1950_s1 + $0x348] ss:$28 sps:$4 sm:$0xff]   ;;  %v1395_v63 = vld [vmem:[%s1950_s1 + $0x2e0] ss:$28 sps:$4 sm:$0xff]   ;;  %v1372_v1 = vld [vmem:[%s1950_s1 + $0x10] ss:$28 sps:$4 sm:$0xff]  }
  0x16   :  { %829 = vmatpush1.bf16.msra.mxu1 %v1338_v25  ;;  %v1665_v61 = vld [vmem:[%s1951_s0] ss:$8 sps:$4 sm:$0xff]   ;;  %v1399_v0 = vld [vmem:[%s1950_s1 + $0x31c] ss:$28 sps:$4 sm:$0xff]   ;;  %v1405_v4 = vld [vmem:[%s1950_s1 + $0x354] ss:$28 sps:$4 sm:$0xff]  }
  0x17   :  { %778 = vmatpush1.bf16.msra.mxu0 %v1308_v19  ;;  %830 = vmatprep.subr.bf16.mxu1 %v1342_v26  ;;  %v1380_v2 = vld [vmem:[%s1950_s1 + $0x4c] ss:$28 sps:$4 sm:$0xff]   ;;  %v1401_v3 = vld [vmem:[%s1950_s1 + $0x318] ss:$28 sps:$4 sm:$0xff]   ;;  %v1386_v6 = vld [vmem:[%s1950_s1 + $0x84] ss:$28 sps:$4 sm:$0xff]  }
  0x18   :  { %779 = vmatprep.subr.bf16.mxu0 %v1309_v20  ;;  %v1378_v5 = vld [vmem:[%s1950_s1 + $0x48] ss:$28 sps:$4 sm:$0xff]   ;;  %v1407_v7 = vld [vmem:[%s1950_s1 + $0x350] ss:$28 sps:$4 sm:$0xff]   ;;  %v1411_v8 = vld [vmem:[%s1950_s1 + $0x1d8] ss:$28 sps:$4 sm:$0xff]  }
  0x19   :  { %v1384_v9 = vld [vmem:[%s1950_s1 + $0x80] ss:$28 sps:$4 sm:$0xff]   ;;  %v1412_v11 = vld [vmem:[%s1950_s1 + $0x18] ss:$28 sps:$4 sm:$0xff]   ;;  %v1416_v12 = vld [vmem:[%s1950_s1 + $0x210] ss:$28 sps:$4 sm:$0xff]  }
  0x1a   :  { %831 = vmatpush1.bf16.msra.mxu1 %v1344_v29  ;;  %v1392_v10 = vld [vmem:[%s1950_s1 + $0xbc] ss:$28 sps:$4 sm:$0xff]   ;;  %v1398_v15 = vld [vmem:[%s1950_s1 + $0xf4] ss:$28 sps:$4 sm:$0xff]   ;;  %v1421_v17 = vld [vmem:[%s1950_s1 + $0x248] ss:$28 sps:$4 sm:$0xff]  }
  0x1b   :  { %780 = vmatpush1.bf16.msra.mxu0 %v1311_v23  ;;  %832 = vmatprep.subr.bf16.mxu1 %v1348_v30  ;;  %v1716_v13 = vld [vmem:[%s1951_s0 + $0x14] ss:$8 sps:$4 sm:$0xff]   ;;  %v1417_v16 = vld [vmem:[%s1950_s1 + $0x50] ss:$28 sps:$4 sm:$0xff]   ;;  %v1422_v21 = vld [vmem:[%s1950_s1 + $0x88] ss:$28 sps:$4 sm:$0xff]  }
  0x1c   :  { %781 = vmatprep.subr.bf16.mxu0 %v1315_v24  ;;  %v1390_v14 = vld [vmem:[%s1950_s1 + $0xb8] ss:$28 sps:$4 sm:$0xff]   ;;  %v1396_v19 = vld [vmem:[%s1950_s1 + $0xf0] ss:$28 sps:$4 sm:$0xff]   ;;  %v1426_v22 = vld [vmem:[%s1950_s1 + $0x280] ss:$28 sps:$4 sm:$0xff]  }
  0x1d   :  { %v1735_v18 = vld [vmem:[%s1951_s0 + $0x10] ss:$8 sps:$4 sm:$0xff]   ;;  %v1404_v20 = vld [vmem:[%s1950_s1 + $0x12c] ss:$28 sps:$4 sm:$0xff]   ;;  %v147_v23 = vld [vmem:[%s1952_s2] sm:$0xff] }
  0x1e   :  { %833 = vmatpush1.bf16.msra.mxu1 %v1350_v33  ;;  %v1402_v24 = vld [vmem:[%s1950_s1 + $0x128] ss:$28 sps:$4 sm:$0xff]   ;;  %153 = vperm.xlu0 %1289, %v147_v23   ;;  %v149_v25 = vld [vmem:[%s1952_s2 + $0x10] sm:$0xff]  ;;  %v1408_v30 = vld [vmem:[%s1950_s1 + $0x160] ss:$28 sps:$4 sm:$0xff]  }
  0x1f   :  { %782 = vmatpush1.bf16.msra.mxu0 %v1317_v27  ;;  %834 = vmatprep.subr.bf16.mxu1 %v1354_v34  ;;  %v1410_v26 = vld [vmem:[%s1950_s1 + $0x164] ss:$28 sps:$4 sm:$0xff]   ;;  %v148_v27 = vld [vmem:[%s1952_s2 + $0x8] sm:$0xff]  ;;  %v1431_v29 = vld [vmem:[%s1950_s1 + $0x2b8] ss:$28 sps:$4 sm:$0xff]  }
  0x20   :  { %783 = vmatprep.subr.bf16.mxu0 %v1321_v28  ;;  %v1427_v28 = vld [vmem:[%s1950_s1 + $0xc0] ss:$28 sps:$4 sm:$0xff]   ;;  %163 = vperm.xlu1 %1290, %v149_v25   ;;  %v1432_v33 = vld [vmem:[%s1950_s1 + $0xf8] ss:$28 sps:$4 sm:$0xff]   ;;  %v1436_v34 = vld [vmem:[%s1950_s1 + $0x2f0] ss:$28 sps:$4 sm:$0xff]  }
  0x22   :  { %835 = vmatpush1.bf16.msra.mxu1 %v1356_v38  ;;  %158 = vperm.xlu0 %1289, %v148_v27   ;;  %v1444_v38 = vld [vmem:[%s1950_s1 + $0x328] ss:$28 sps:$4 sm:$0xff]  }
  0x23   :  { %784 = vmatpush1.bf16.msra.mxu0 %v1323_v31  ;;  %836 = vmatprep.subr.bf16.mxu1 %v1360_v39  ;;  %v150_v31 = vld [vmem:[%s1952_s2 + $0x18] sm:$0xff]  ;;  %v1418_v39 = vld [vmem:[%s1950_s1 + $0x1d0] ss:$28 sps:$4 sm:$0xff]  }
  0x24   :  { %785 = vmatprep.subr.bf16.mxu0 %v1327_v32  ;;  %v1415_v32 = vld [vmem:[%s1950_s1 + $0x19c] ss:$28 sps:$4 sm:$0xff]   ;;  %168 = vperm.xlu1 %1290, %v150_v31  }
  0x26   :  { %837 = vmatpush1.bf16.msra.mxu1 %v1362_v42  ;;  %v1449_v42 = vld [vmem:[%s1950_s1 + $0x360] ss:$28 sps:$4 sm:$0xff]  }
  0x27   :  { %786 = vmatpush1.bf16.msra.mxu0 %v1329_v35  ;;  %838 = vmatprep.subr.bf16.mxu1 %v1366_v43  ;;  %v1413_v35 = vld [vmem:[%s1950_s1 + $0x198] ss:$28 sps:$4 sm:$0xff]   ;;  %v1423_v43 = vld [vmem:[%s1950_s1 + $0x208] ss:$28 sps:$4 sm:$0xff]  }
  0x28   :  { %787 = vmatprep.subr.bf16.mxu0 %v1333_v37  ;;  %v1437_v37 = vld [vmem:[%s1950_s1 + $0x130] ss:$28 sps:$4 sm:$0xff]  }
  0x2a   :  { %839 = vmatpush1.bf16.msra.mxu1 %v1370_v46  ;;  %v1428_v46 = vld [vmem:[%s1950_s1 + $0x240] ss:$28 sps:$4 sm:$0xff]  }
  0x2b   :  { %788 = vmatpush1.bf16.msra.mxu0 %v1335_v40  ;;  %840 = vmatprep.subr.bf16.mxu1 %v1375_v47  ;;  %v1425_v40 = vld [vmem:[%s1950_s1 + $0x20c] ss:$28 sps:$4 sm:$0xff]   ;;  %v1435_v47 = vld [vmem:[%s1950_s1 + $0x27c] ss:$28 sps:$4 sm:$0xff]  }
  0x2c   :  { %789 = vmatprep.subr.bf16.mxu0 %v1339_v41  ;;  %v1445_v41 = vld [vmem:[%s1950_s1 + $0x168] ss:$28 sps:$4 sm:$0xff]  }
  0x2e   :  { %841 = vmatpush1.bf16.msra.mxu1 %v1377_v50  ;;  %v1438_v50 = vld [vmem:[%s1950_s1 + $0x2b0] ss:$28 sps:$4 sm:$0xff]  }
  0x2f   :  { %790 = vmatpush1.bf16.msra.mxu0 %v1341_v44  ;;  %842 = vmatprep.subr.bf16.mxu1 %v1381_v51  ;;  %v1430_v44 = vld [vmem:[%s1950_s1 + $0x244] ss:$28 sps:$4 sm:$0xff]   ;;  %v1448_v51 = vld [vmem:[%s1950_s1 + $0x2ec] ss:$28 sps:$4 sm:$0xff]  }
  0x30   :  { %791 = vmatprep.subr.bf16.mxu0 %v1345_v45  ;;  %v1450_v45 = vld [vmem:[%s1950_s1 + $0x1a0] ss:$28 sps:$4 sm:$0xff]  }
  0x32   :  { %843 = vmatpush1.bf16.msra.mxu1 %v1383_v54  ;;  %v1451_v54 = vld [vmem:[%s1950_s1 + $0x320] ss:$28 sps:$4 sm:$0xff]  }
  0x33   :  { %792 = vmatpush1.bf16.msra.mxu0 %v1347_v48  ;;  %844 = vmatprep.subr.bf16.mxu1 %v1387_v55  ;;  %v1433_v48 = vld [vmem:[%s1950_s1 + $0x278] ss:$28 sps:$4 sm:$0xff]  }
  0x34   :  { %793 = vmatprep.subr.bf16.mxu0 %v1351_v49  ;;  %v1440_v49 = vld [vmem:[%s1950_s1 + $0x2b4] ss:$28 sps:$4 sm:$0xff]   ;;  %v1456_v55 = vld [vmem:[%s1950_s1 + $0x35c] ss:$28 sps:$4 sm:$0xff]  }
  0x36   :  { %845 = vmatpush1.bf16.msra.mxu1 %v1389_v58 }
  0x37   :  { %794 = vmatpush1.bf16.msra.mxu0 %v1353_v52  ;;  %846 = vmatprep.subr.bf16.mxu1 %v1393_v59  ;;  %v1446_v52 = vld [vmem:[%s1950_s1 + $0x2e8] ss:$28 sps:$4 sm:$0xff]  }
  0x38   :  { %795 = vmatprep.subr.bf16.mxu0 %v1357_v53  ;;  %v1453_v53 = vld [vmem:[%s1950_s1 + $0x324] ss:$28 sps:$4 sm:$0xff]  }
  0x3a   :  { %847 = vmatpush1.bf16.msra.mxu1 %v1395_v63 }
  0x3b   :  { %796 = vmatpush1.bf16.msra.mxu0 %v1359_v56  ;;  %848 = vmatprep.subr.bf16.mxu1 %v1399_v0  ;;  %v1454_v56 = vld [vmem:[%s1950_s1 + $0x358] ss:$28 sps:$4 sm:$0xff]  }
  0x3c   :  { %797 = vmatprep.subr.bf16.mxu0 %v1363_v57 }
  0x3e   :  { %849 = vmatpush1.bf16.msra.mxu1 %v1401_v3 }
  0x3f   :  { %798 = vmatpush1.bf16.msra.mxu0 %v1365_v60  ;;  %850 = vmatprep.subr.bf16.mxu1 %v1405_v4 }
  0x40   :  { %873 = vmatprep.subr.bf16.mxu0 %v1374_v62 }
  0x42   :  { %800 = vmatmul.mubr.bf16.vlgmr.msra.gmra.mrb[0].mxu0 %v1665_v61  ;;  %851 = vmatpush1.bf16.msra.mxu1 %v1407_v7 }
  0x43   :  { %874 = vmatpush1.bf16.msra.mxu0 %v1372_v1  ;;  %1260 = vmatprep.subr.bf16.mxu1 %v1411_v8 }
  0x44   :  { %875 = vmatprep.subr.bf16.mxu0 %v1380_v2  ;;  %809 = vmatprep.mubr.bf16.mxu0 %v1716_v13 }
  0x45   :  { %853 = vmatmul.mubr.bf16.vlgmr.msra.gmra.mrb[0].mxu1 %v1665_v61 }
  0x46   :  { %1261 = vmatpush3.bf16.msra.mxu1 %v1412_v11  ;;  %862 = vmatprep.mubr.bf16.mxu1 %v1716_v13 }
  0x47   :  { %876 = vmatpush1.bf16.msra.mxu0 %v1378_v5  ;;  %1262 = vmatprep.subr.bf16.mxu1 %v1416_v12 }
  0x48   :  { %877 = vmatprep.subr.bf16.mxu0 %v1386_v6 }
  0x4a   :  { %810 = vmatmul.mubr.bf16.gmra.mrb[4].mxu0 %v1735_v18  ;;  %1263 = vmatpush3.bf16.msra.mxu1 %v1417_v16 }
  0x4b   :  { %878 = vmatpush1.bf16.msra.mxu0 %v1384_v9  ;;  %905 = vmatprep.mubr.bf16.mxu0 %v1586_v36 }
  0x4c   :  { %879 = vmatprep.subr.bf16.mxu0 %v1392_v10  ;;  %1264 = vmatprep.subr.bf16.mxu1 %v1421_v17 }
  0x4d   :  { %863 = vmatmul.mubr.bf16.gmra.mrb[4].mxu1 %v1735_v18 }
  0x4e   :  { %1265 = vmatpush3.bf16.msra.mxu1 %v1422_v21  ;;  %958 = vmatprep.mubr.bf16.mxu1 %v1586_v36  ;;  %v1420_v36 = vld [vmem:[%s1950_s1 + $0x1d4] ss:$28 sps:$4 sm:$0xff]  }
  0x4f   :  { %880 = vmatpush1.bf16.msra.mxu0 %v1390_v14  ;;  %1266 = vmatprep.subr.bf16.mxu1 %v1426_v22 }
  0x50   :  { %881 = vmatprep.subr.bf16.mxu0 %v1398_v15 }
  0x52   :  { %1267 = vmatpush3.bf16.msra.mxu1 %v1427_v28 }
  0x53   :  { %882 = vmatpush1.bf16.msra.mxu0 %v1396_v19  ;;  %1268 = vmatprep.subr.bf16.mxu1 %v1431_v29 }
  0x54   :  { %883 = vmatprep.subr.bf16.mxu0 %v1404_v20 }
  0x56   :  { %1269 = vmatpush3.bf16.msra.mxu1 %v1432_v33 }
  0x57   :  { %884 = vmatpush1.bf16.msra.mxu0 %v1402_v24  ;;  %1270 = vmatprep.subr.bf16.mxu1 %v1436_v34 }
  0x58   :  { %885 = vmatprep.subr.bf16.mxu0 %v1410_v26 }
  0x5a   :  { %1271 = vmatpush3.bf16.msra.mxu1 %v1437_v37 }
  0x5b   :  { %886 = vmatpush1.bf16.msra.mxu0 %v1408_v30  ;;  %1272 = vmatprep.subr.bf16.mxu1 %v1444_v38 }
  0x5c   :  { %887 = vmatprep.subr.bf16.mxu0 %v1415_v32 }
  0x5e   :  { %1273 = vmatpush3.bf16.msra.mxu1 %v1445_v41 }
  0x5f   :  { %888 = vmatpush1.bf16.msra.mxu0 %v1413_v35  ;;  %1274 = vmatprep.subr.bf16.mxu1 %v1449_v42 }
  0x60   :  { %889 = vmatprep.subr.bf16.mxu0 %v1420_v36 }
  0x62   :  { %1275 = vmatpush3.bf16.msra.mxu1 %v1450_v45 }
  0x63   :  { %890 = vmatpush1.bf16.msra.mxu0 %v1418_v39 }
  0x64   :  { %891 = vmatprep.subr.bf16.mxu0 %v1425_v40 }
  0x65   :  { %959 = vmatmul.mubr.bf16.vlgmr.msra.gmra.mrb[8].mxu1 %v1665_v61 }
  0x66   :  { %966 = vmatprep.mubr.bf16.mxu1 %v1716_v13 }
  0x67   :  { %892 = vmatpush1.bf16.msra.mxu0 %v1423_v43 }
  0x68   :  { %893 = vmatprep.subr.bf16.mxu0 %v1430_v44 }
  0x6b   :  { %894 = vmatpush1.bf16.msra.mxu0 %v1428_v46 }
  0x6c   :  { %895 = vmatprep.subr.bf16.mxu0 %v1435_v47 }
  0x6d   :  { %967 = vmatmul.mubr.bf16.gmra.mrb[12].mxu1 %v1735_v18 }
  0x6f   :  { %896 = vmatpush1.bf16.msra.mxu0 %v1433_v48 }
  0x70   :  { %897 = vmatprep.subr.bf16.mxu0 %v1440_v49 }
  0x73   :  { %898 = vmatpush1.bf16.msra.mxu0 %v1438_v50 }
  0x74   :  { %899 = vmatprep.subr.bf16.mxu0 %v1448_v51 }
  0x77   :  { %900 = vmatpush1.bf16.msra.mxu0 %v1446_v52 }
  0x78   :  { %901 = vmatprep.subr.bf16.mxu0 %v1453_v53 }
  0x7b   :  { %902 = vmatpush1.bf16.msra.mxu0 %v1451_v54 }
  0x7c   :  { %903 = vmatprep.subr.bf16.mxu0 %v1456_v55 }
  0x7f   :  { %904 = vmatpush1.bf16.msra.mxu0 %v1454_v56 }
  0x82   :  { %906 = vmatmul.mubr.bf16.vlgmr.msra.gmra.mrb[8].mxu0 %v1665_v61 }
  0x83   :  { %915 = vmatprep.mubr.bf16.mxu0 %v1716_v13 }
  0x8a   :  { %916 = vmatmul.mubr.bf16.gmra.mrb[12].mxu0 %v1735_v18 }
  0x9d   :  { %v1862_v57 = vpop.permute.xlu0 %153 }
  0x9f   :  { %v1876_v10 = vpop.permute.xlu1 %163 }
  0xa1   :  { %v1864_v59 = vpop.permute.xlu0 %158 }
  0xa3   :  { %v1883_v26 = vpop.permute.xlu1 %168 }
 0x115   :  { %v801_v58 = vpop.f32.mrb[0].mxu0 }
 0x116   :  { %v802_v60 = vadd.f32 %v801_v58, %v1862_v57  ;;  %v803_v62 = vpop.f32.mrb[1].mxu0 }
 0x117   :  { %v804_v63 = vadd.f32 %v803_v62, %v1862_v57  ;;  %v805_v0 = vpop.f32.mrb[2].mxu0 }
 0x118   :  { %v975_v1 = vmax.f32 %v802_v60, 0.0  ;;  %v806_v2 = vadd.f32 %v805_v0, %v1864_v59  ;;  %v807_v3 = vpop.f32.mrb[3].mxu0  ;;  %v854_v9 = vpop.f32.mrb[0].mxu1 }
 0x119   :  { %v976_v61 = vmax.f32 %v804_v63, 0.0  ;;  %v808_v4 = vadd.f32 %v807_v3, %v1864_v59  ;;  %v855_v11 = vadd.f32 %v854_v9, %v1862_v57  ;;  %v856_v12 = vpop.f32.mrb[1].mxu1 }
 0x11a   :  { %v982_v5 = vmax.f32 %v806_v2, 0.0  ;;  %v857_v13 = vadd.f32 %v856_v12, %v1862_v57  ;;  %v858_v14 = vpop.f32.mrb[2].mxu1 }
 0x11b   :  { %v1244_v6 = vpack.c.bf16 %v976_v61, %v975_v1  ;;  %v983_v7 = vmax.f32 %v808_v4, 0.0  ;;  %v977_v15 = vmax.f32 %v855_v11, 0.0  ;;  %v859_v16 = vadd.f32 %v858_v14, %v1864_v59  ;;  %v860_v17 = vpop.f32.mrb[3].mxu1 }
 0x11c   :  { %v978_v18 = vmax.f32 %v857_v13, 0.0  ;;  %v861_v19 = vadd.f32 %v860_v17, %v1864_v59 }
 0x11d   :  { %1091 = vst [vmem:[%s1953_s3] sm:$0xff] %v1244_v6  ;;  %v1248_v8 = vpack.c.bf16 %v983_v7, %v982_v5  ;;  %v811_v20 = vpop.f32.mrb[4].mxu0  ;;  %v984_v21 = vmax.f32 %v859_v16, 0.0 }
 0x11e   :  { %v812_v22 = vadd.f32 %v811_v20, %v1876_v10  ;;  %v813_v23 = vpop.f32.mrb[5].mxu0  ;;  %v1245_v24 = vpack.c.bf16 %v978_v18, %v977_v15  ;;  %v985_v25 = vmax.f32 %v861_v19, 0.0 }
 0x11f   :  { %1096 = vst [vmem:[%s1953_s3 + $0x1c] sm:$0xff] %v1248_v8  ;;  %v814_v27 = vadd.f32 %v813_v23, %v1876_v10  ;;  %v815_v28 = vpop.f32.mrb[6].mxu0 }
 0x120   :  { %v989_v29 = vmax.f32 %v812_v22, 0.0  ;;  %v816_v30 = vadd.f32 %v815_v28, %v1883_v26  ;;  %v817_v31 = vpop.f32.mrb[7].mxu0  ;;  %1092 = vst [vmem:[%s1953_s3 + $0x8] sm:$0xff] %v1245_v24  ;;  %v1249_v32 = vpack.c.bf16 %v985_v25, %v984_v21  ;;  %v864_v33 = vpop.f32.mrb[4].mxu1 }
 0x121   :  { %v990_v34 = vmax.f32 %v814_v27, 0.0  ;;  %v818_v35 = vadd.f32 %v817_v31, %v1883_v26  ;;  %v865_v36 = vadd.f32 %v864_v33, %v1876_v10  ;;  %v866_v37 = vpop.f32.mrb[5].mxu1 }
 0x122   :  { %v996_v38 = vmax.f32 %v816_v30, 0.0  ;;  %1097 = vst [vmem:[%s1953_s3 + $0x24] sm:$0xff] %v1249_v32  ;;  %v867_v39 = vadd.f32 %v866_v37, %v1876_v10  ;;  %v868_v40 = vpop.f32.mrb[6].mxu1 }
 0x123   :  { %v1252_v41 = vpack.c.bf16 %v990_v34, %v989_v29  ;;  %v997_v42 = vmax.f32 %v818_v35, 0.0  ;;  %v991_v43 = vmax.f32 %v865_v36, 0.0  ;;  %v869_v44 = vadd.f32 %v868_v40, %v1883_v26  ;;  %v870_v45 = vpop.f32.mrb[7].mxu1 }
 0x124   :  { %v992_v46 = vmax.f32 %v867_v39, 0.0  ;;  %v871_v47 = vadd.f32 %v870_v45, %v1883_v26 }
 0x125   :  { %1100 = vst [vmem:[%s1953_s3 + $0x38] sm:$0xff] %v1252_v41  ;;  %v1256_v48 = vpack.c.bf16 %v997_v42, %v996_v38  ;;  %v998_v49 = vmax.f32 %v869_v44, 0.0 }
 0x126   :  { %v1253_v50 = vpack.c.bf16 %v992_v46, %v991_v43  ;;  %v999_v51 = vmax.f32 %v871_v47, 0.0 }
 0x127   :  { %1104 = vst [vmem:[%s1953_s3 + $0x54] sm:$0xff] %v1256_v48 }
 0x128   :  { %1101 = vst [vmem:[%s1953_s3 + $0x40] sm:$0xff] %v1253_v50  ;;  %v1257_v52 = vpack.c.bf16 %v999_v51, %v998_v49 }
 0x12a   :  { %1105 = vst [vmem:[%s1953_s3 + $0x5c] sm:$0xff] %v1257_v52 }
 0x138   :  { %v1276_v53 = vpop.f32.mrb[8].mxu1 }
 0x139   :  { %v1277_v54 = vpop.f32.mrb[9].mxu1 }
 0x13a   :  { %v1278_v55 = vadd.f32 %v1277_v54, %v1276_v53  ;;  %v1279_v56 = vpop.f32.mrb[10].mxu1 }
 0x13b   :  { %v1280_v58 = vpop.f32.mrb[11].mxu1 }
 0x13c   :  { %v961_v60 = vadd.f32 %v1278_v55, %v1862_v57  ;;  %v1281_v62 = vadd.f32 %v1280_v58, %v1279_v56 }
 0x13e   :  { %v981_v63 = vmax.f32 %v961_v60, 0.0  ;;  %v964_v0 = vadd.f32 %v1281_v62, %v1864_v59 }
 0x140   :  { %v1247_v1 = vpack.c.bf16 %v981_v63, %v981_v63  ;;  %v988_v2 = vmax.f32 %v964_v0, 0.0  ;;  %v1282_v3 = vpop.f32.mrb[12].mxu1 }
 0x141   :  { %v1283_v61 = vpop.f32.mrb[13].mxu1 }
 0x142   :  { %1095 = vst.msk [vmem:[%s1953_s3 + $0x18] sm:$0xf] %vm1094_vm0, %v1247_v1  ;;  %v1251_v4 = vpack.c.bf16 %v988_v2, %v988_v2  ;;  %v1284_v5 = vadd.f32 %v1283_v61, %v1282_v3  ;;  %v1285_v6 = vpop.f32.mrb[14].mxu1 }
 0x143   :  { %v1286_v7 = vpop.f32.mrb[15].mxu1 }
 0x144   :  { %1099 = vst.msk [vmem:[%s1953_s3 + $0x34] sm:$0xf] %vm1094_vm0, %v1251_v4  ;;  %v969_v8 = vadd.f32 %v1284_v5, %v1876_v10  ;;  %v1287_v9 = vadd.f32 %v1286_v7, %v1285_v6 }
 0x146   :  { %v995_v11 = vmax.f32 %v969_v8, 0.0  ;;  %v972_v12 = vadd.f32 %v1287_v9, %v1883_v26 }
 0x148   :  { %v1255_v13 = vpack.c.bf16 %v995_v11, %v995_v11  ;;  %v1002_v14 = vmax.f32 %v972_v12, 0.0 }
 0x14a   :  { %1103 = vst.msk [vmem:[%s1953_s3 + $0x50] sm:$0xf] %vm1094_vm0, %v1255_v13  ;;  %v1259_v15 = vpack.c.bf16 %v1002_v14, %v1002_v14 }
 0x14c   :  { %1107 = vst.msk [vmem:[%s1953_s3 + $0x6c] sm:$0xf] %vm1094_vm0, %v1259_v15 }
 0x155   :  { %v907_v16 = vpop.f32.mrb[8].mxu0 }
 0x156   :  { %v908_v17 = vadd.f32 %v907_v16, %v1862_v57  ;;  %v909_v18 = vpop.f32.mrb[9].mxu0 }
 0x157   :  { %v910_v19 = vadd.f32 %v909_v18, %v1862_v57  ;;  %v911_v20 = vpop.f32.mrb[10].mxu0 }
 0x158   :  { %v979_v21 = vmax.f32 %v908_v17, 0.0  ;;  %v912_v22 = vadd.f32 %v911_v20, %v1864_v59  ;;  %v913_v23 = vpop.f32.mrb[11].mxu0 }
 0x159   :  { %v980_v24 = vmax.f32 %v910_v19, 0.0  ;;  %v914_v25 = vadd.f32 %v913_v23, %v1864_v59 }
 0x15a   :  { %v986_v27 = vmax.f32 %v912_v22, 0.0 }
 0x15b   :  { %v1246_v28 = vpack.c.bf16 %v980_v24, %v979_v21  ;;  %v987_v29 = vmax.f32 %v914_v25, 0.0 }
 0x15d   :  { %1093 = vst [vmem:[%s1953_s3 + $0x10] sm:$0xff] %v1246_v28  ;;  %v1250_v30 = vpack.c.bf16 %v987_v29, %v986_v27  ;;  %v917_v31 = vpop.f32.mrb[12].mxu0 }
 0x15e   :  { %v918_v32 = vadd.f32 %v917_v31, %v1876_v10  ;;  %v919_v57 = vpop.f32.mrb[13].mxu0 }
 0x15f   :  { %1098 = vst [vmem:[%s1953_s3 + $0x2c] sm:$0xff] %v1250_v30  ;;  %v920_v33 = vadd.f32 %v919_v57, %v1876_v10  ;;  %v921_v34 = vpop.f32.mrb[14].mxu0 }
 0x160   :  { %v993_v59 = vmax.f32 %v918_v32, 0.0  ;;  %v922_v35 = vadd.f32 %v921_v34, %v1883_v26  ;;  %v923_v36 = vpop.f32.mrb[15].mxu0 }
 0x161   :  { %v994_v37 = vmax.f32 %v920_v33, 0.0  ;;  %v924_v38 = vadd.f32 %v923_v36, %v1883_v26 }
 0x162   :  { %v1000_v39 = vmax.f32 %v922_v35, 0.0 }
 0x163   :  { %v1254_v40 = vpack.c.bf16 %v994_v37, %v993_v59  ;;  %v1001_v41 = vmax.f32 %v924_v38, 0.0 }
 0x165   :  { %1102 = vst [vmem:[%s1953_s3 + $0x48] sm:$0xff] %v1254_v40  ;;  %v1258_v42 = vpack.c.bf16 %v1001_v41, %v1000_v39 }
 0x167   :  { %1106 = vst [vmem:[%s1953_s3 + $0x64] sm:$0xff] %v1258_v42 }

// kernel: dqn_forward.5
= control target key start
LH: loop header
LB: loop body
LE: loop exit
PB: predicated region body
PF: predicated region fallthrough
CT: control target
= control target key end

     0   :  { %v1018_v1 = vmov 0   ;;  %vm752_vm0 = vcmask 1043456   ;;  %vm753_vm1 = vcmask 277508   ;;  %s1347_s1 = inlined_call_operand.vmem [shape: bf16[512,162], index: 1, kind: input, shape index: {}]   ;;  %s1348_s0 = inlined_call_operand.vmem [shape: bf16[64,512], index: 0, kind: input, shape index: {}]   ;;  %s1349_s2 = inlined_call_operand.vmem [shape: f32[64,1], index: 2, kind: input, shape index: {}]   ;;  %s1350_s3 = inlined_call_operand.vmem [shape: bf16[64,162], index: 3, kind: output, shape index: {}]  }
   0x1   :  { %v898_v0 = vld [vmem:[%s1347_s1 + $0x4] ss:$8 sps:$4 sm:$0xff]   ;;  %896 = vset.pattern.permute.xlu0 %v1018_v1  ;;  %897 = vset.pattern.permute.xlu1 %v1018_v1  ;;  %v902_v3 = vld [vmem:[%s1347_s1] ss:$8 sps:$4 sm:$0xff]   ;;  %v904_v5 = vld [vmem:[%s1347_s1 + $0x14] ss:$8 sps:$4 sm:$0xff]  }
   0x2   :  { %v900_v2 = vld [vmem:[%s1347_s1 + $0x104] ss:$8 sps:$4 sm:$0xff]   ;;  %542 = vmatprep.subr.bf16.mxu1 %v898_v0  ;;  %v903_v4 = vld [vmem:[%s1347_s1 + $0x100] ss:$8 sps:$4 sm:$0xff]   ;;  %v906_v6 = vld [vmem:[%s1347_s1 + $0x114] ss:$8 sps:$4 sm:$0xff]  }
   0x3   :  { %615 = vmatprep.subr.bf16.mxu0 %v900_v2  ;;  %543 = vmatpush1.bf16.msra.mxu1 %v902_v3  ;;  %v908_v7 = vld [vmem:[%s1347_s1 + $0x10] ss:$8 sps:$4 sm:$0xff]   ;;  %v910_v9 = vld [vmem:[%s1347_s1 + $0x24] ss:$8 sps:$4 sm:$0xff]   ;;  %v914_v11 = vld [vmem:[%s1347_s1 + $0x20] ss:$8 sps:$4 sm:$0xff]  }
   0x4   :  { %616 = vmatpush1.bf16.msra.mxu0 %v903_v4  ;;  %544 = vmatprep.subr.bf16.mxu1 %v904_v5  ;;  %v909_v8 = vld [vmem:[%s1347_s1 + $0x110] ss:$8 sps:$4 sm:$0xff]   ;;  %v912_v10 = vld [vmem:[%s1347_s1 + $0x124] ss:$8 sps:$4 sm:$0xff]   ;;  %v915_v12 = vld [vmem:[%s1347_s1 + $0x120] ss:$8 sps:$4 sm:$0xff]  }
   0x5   :  { %617 = vmatprep.subr.bf16.mxu0 %v906_v6  ;;  %v916_v13 = vld [vmem:[%s1347_s1 + $0x34] ss:$8 sps:$4 sm:$0xff]   ;;  %v920_v15 = vld [vmem:[%s1347_s1 + $0x30] ss:$8 sps:$4 sm:$0xff]   ;;  %v922_v17 = vld [vmem:[%s1347_s1 + $0x44] ss:$8 sps:$4 sm:$0xff]  }
   0x6   :  { %v918_v14 = vld [vmem:[%s1347_s1 + $0x134] ss:$8 sps:$4 sm:$0xff]   ;;  %v921_v16 = vld [vmem:[%s1347_s1 + $0x130] ss:$8 sps:$4 sm:$0xff]   ;;  %v924_v18 = vld [vmem:[%s1347_s1 + $0x144] ss:$8 sps:$4 sm:$0xff]  }
   0x7   :  { %545 = vmatpush1.bf16.msra.mxu1 %v908_v7  ;;  %v926_v19 = vld [vmem:[%s1347_s1 + $0x40] ss:$8 sps:$4 sm:$0xff]   ;;  %v928_v21 = vld [vmem:[%s1347_s1 + $0x54] ss:$8 sps:$4 sm:$0xff]   ;;  %v932_v23 = vld [vmem:[%s1347_s1 + $0x50] ss:$8 sps:$4 sm:$0xff]  }
   0x8   :  { %618 = vmatpush1.bf16.msra.mxu0 %v909_v8  ;;  %546 = vmatprep.subr.bf16.mxu1 %v910_v9  ;;  %v927_v20 = vld [vmem:[%s1347_s1 + $0x140] ss:$8 sps:$4 sm:$0xff]   ;;  %v930_v22 = vld [vmem:[%s1347_s1 + $0x154] ss:$8 sps:$4 sm:$0xff]   ;;  %v933_v24 = vld [vmem:[%s1347_s1 + $0x150] ss:$8 sps:$4 sm:$0xff]  }
   0x9   :  { %619 = vmatprep.subr.bf16.mxu0 %v912_v10  ;;  %v934_v25 = vld [vmem:[%s1347_s1 + $0x64] ss:$8 sps:$4 sm:$0xff]   ;;  %v938_v27 = vld [vmem:[%s1347_s1 + $0x60] ss:$8 sps:$4 sm:$0xff]   ;;  %v940_v29 = vld [vmem:[%s1347_s1 + $0x74] ss:$8 sps:$4 sm:$0xff]  }
   0xa   :  { %v936_v26 = vld [vmem:[%s1347_s1 + $0x164] ss:$8 sps:$4 sm:$0xff]   ;;  %v939_v28 = vld [vmem:[%s1347_s1 + $0x160] ss:$8 sps:$4 sm:$0xff]   ;;  %v942_v30 = vld [vmem:[%s1347_s1 + $0x174] ss:$8 sps:$4 sm:$0xff]  }
   0xb   :  { %547 = vmatpush1.bf16.msra.mxu1 %v914_v11  ;;  %v944_v31 = vld [vmem:[%s1347_s1 + $0x70] ss:$8 sps:$4 sm:$0xff]   ;;  %v946_v33 = vld [vmem:[%s1347_s1 + $0x84] ss:$8 sps:$4 sm:$0xff]   ;;  %v950_v35 = vld [vmem:[%s1347_s1 + $0x80] ss:$8 sps:$4 sm:$0xff]  }
   0xc   :  { %620 = vmatpush1.bf16.msra.mxu0 %v915_v12  ;;  %548 = vmatprep.subr.bf16.mxu1 %v916_v13  ;;  %v945_v32 = vld [vmem:[%s1347_s1 + $0x170] ss:$8 sps:$4 sm:$0xff]   ;;  %v948_v34 = vld [vmem:[%s1347_s1 + $0x184] ss:$8 sps:$4 sm:$0xff]   ;;  %v951_v36 = vld [vmem:[%s1347_s1 + $0x180] ss:$8 sps:$4 sm:$0xff]  }
   0xd   :  { %621 = vmatprep.subr.bf16.mxu0 %v918_v14  ;;  %v952_v37 = vld [vmem:[%s1347_s1 + $0x94] ss:$8 sps:$4 sm:$0xff]   ;;  %v956_v39 = vld [vmem:[%s1347_s1 + $0x90] ss:$8 sps:$4 sm:$0xff]   ;;  %v958_v41 = vld [vmem:[%s1347_s1 + $0xa4] ss:$8 sps:$4 sm:$0xff]  }
   0xe   :  { %v954_v38 = vld [vmem:[%s1347_s1 + $0x194] ss:$8 sps:$4 sm:$0xff]   ;;  %v957_v40 = vld [vmem:[%s1347_s1 + $0x190] ss:$8 sps:$4 sm:$0xff]   ;;  %v960_v42 = vld [vmem:[%s1347_s1 + $0x1a4] ss:$8 sps:$4 sm:$0xff]  }
   0xf   :  { %549 = vmatpush1.bf16.msra.mxu1 %v920_v15  ;;  %v962_v43 = vld [vmem:[%s1347_s1 + $0xa0] ss:$8 sps:$4 sm:$0xff]   ;;  %v964_v45 = vld [vmem:[%s1347_s1 + $0xb4] ss:$8 sps:$4 sm:$0xff]   ;;  %v968_v47 = vld [vmem:[%s1347_s1 + $0xb0] ss:$8 sps:$4 sm:$0xff]  }
  0x10   :  { %622 = vmatpush1.bf16.msra.mxu0 %v921_v16  ;;  %550 = vmatprep.subr.bf16.mxu1 %v922_v17  ;;  %v963_v44 = vld [vmem:[%s1347_s1 + $0x1a0] ss:$8 sps:$4 sm:$0xff]   ;;  %v966_v46 = vld [vmem:[%s1347_s1 + $0x1b4] ss:$8 sps:$4 sm:$0xff]   ;;  %v969_v48 = vld [vmem:[%s1347_s1 + $0x1b0] ss:$8 sps:$4 sm:$0xff]  }
  0x11   :  { %623 = vmatprep.subr.bf16.mxu0 %v924_v18  ;;  %v970_v49 = vld [vmem:[%s1347_s1 + $0xc4] ss:$8 sps:$4 sm:$0xff]   ;;  %v974_v53 = vld [vmem:[%s1347_s1 + $0xc0] ss:$8 sps:$4 sm:$0xff]   ;;  %v976_v55 = vld [vmem:[%s1347_s1 + $0xd4] ss:$8 sps:$4 sm:$0xff]  }
  0x12   :  { %v996_v50 = vld [vmem:[%s1348_s0 + $0x4] ss:$16 sps:$4 sm:$0xff]   ;;  %v999_v52 = vld [vmem:[%s1348_s0 + $0xc] ss:$16 sps:$4 sm:$0xff]   ;;  %v975_v54 = vld [vmem:[%s1347_s1 + $0x1c0] ss:$8 sps:$4 sm:$0xff]  }
  0x13   :  { %551 = vmatpush1.bf16.msra.mxu1 %v926_v19  ;;  %v972_v51 = vld [vmem:[%s1347_s1 + $0x1c4] ss:$8 sps:$4 sm:$0xff]   ;;  %574 = vmatprep.mubr.bf16.mxu1 %v996_v50  ;;  %v978_v56 = vld [vmem:[%s1347_s1 + $0x1d4] ss:$8 sps:$4 sm:$0xff]   ;;  %v980_v57 = vld [vmem:[%s1347_s1 + $0xd0] ss:$8 sps:$4 sm:$0xff]  }
  0x14   :  { %624 = vmatpush1.bf16.msra.mxu0 %v927_v20  ;;  %552 = vmatprep.subr.bf16.mxu1 %v928_v21  ;;  %v981_v58 = vld [vmem:[%s1347_s1 + $0x1d0] ss:$8 sps:$4 sm:$0xff]   ;;  %v982_v59 = vld [vmem:[%s1347_s1 + $0xe4] ss:$8 sps:$4 sm:$0xff]   ;;  %v986_v0 = vld [vmem:[%s1347_s1 + $0xe0] ss:$8 sps:$4 sm:$0xff]  }
  0x15   :  { %625 = vmatprep.subr.bf16.mxu0 %v930_v22  ;;  %647 = vmatprep.mubr.bf16.mxu0 %v999_v52  ;;  %v984_v60 = vld [vmem:[%s1347_s1 + $0x1e4] ss:$8 sps:$4 sm:$0xff]   ;;  %v96_v62 = vld [vmem:[%s1349_s2 + $0x10] sm:$0xff]  ;;  %v987_v1 = vld [vmem:[%s1347_s1 + $0x1e0] ss:$8 sps:$4 sm:$0xff]  }
  0x16   :  { %v94_v61 = vld [vmem:[%s1349_s2] sm:$0xff]  ;;  %v95_v63 = vld [vmem:[%s1349_s2 + $0x8] sm:$0xff]  ;;  %114 = vperm.xlu1 %897, %v96_v62   ;;  %v97_v2 = vld [vmem:[%s1349_s2 + $0x18] sm:$0xff] }
  0x17   :  { %553 = vmatpush1.bf16.msra.mxu1 %v932_v23  ;;  %104 = vperm.xlu0 %896, %v94_v61   ;;  %v988_v3 = vld [vmem:[%s1347_s1 + $0xf4] ss:$8 sps:$4 sm:$0xff]   ;;  %v98_v5 = vld [vmem:[%s1349_s2 + $0x20] sm:$0xff]  ;;  %v992_v6 = vld [vmem:[%s1347_s1 + $0xf0] ss:$8 sps:$4 sm:$0xff]  }
  0x18   :  { %626 = vmatpush1.bf16.msra.mxu0 %v933_v24  ;;  %554 = vmatprep.subr.bf16.mxu1 %v934_v25  ;;  %v990_v4 = vld [vmem:[%s1347_s1 + $0x1f4] ss:$8 sps:$4 sm:$0xff]   ;;  %v993_v7 = vld [vmem:[%s1347_s1 + $0x1f0] ss:$8 sps:$4 sm:$0xff]   ;;  %v99_v8 = vld [vmem:[%s1349_s2 + $0x28] sm:$0xff] }
  0x19   :  { %627 = vmatprep.subr.bf16.mxu0 %v936_v26  ;;  %v994_v9 = vld [vmem:[%s1348_s0] ss:$16 sps:$4 sm:$0xff]   ;;  %v997_v10 = vld [vmem:[%s1348_s0 + $0x8] ss:$16 sps:$4 sm:$0xff]   ;;  %v1000_v12 = vld [vmem:[%s1348_s0 + $0x24] ss:$16 sps:$4 sm:$0xff]  }
  0x1a   :  { %119 = vperm.xlu1 %897, %v97_v2   ;;  %v100_v11 = vld [vmem:[%s1349_s2 + $0x30] sm:$0xff]  ;;  %v1002_v13 = vld [vmem:[%s1348_s0 + $0x2c] ss:$16 sps:$4 sm:$0xff]   ;;  %v1005_v16 = vld [vmem:[%s1348_s0 + $0x28] ss:$16 sps:$4 sm:$0xff]  }
  0x1b   :  { %555 = vmatpush1.bf16.msra.mxu1 %v938_v27  ;;  %109 = vperm.xlu0 %896, %v95_v63   ;;  %v101_v14 = vld [vmem:[%s1349_s2 + $0x38] sm:$0xff]  ;;  %v1004_v15 = vld [vmem:[%s1348_s0 + $0x20] ss:$16 sps:$4 sm:$0xff]   ;;  %v1006_v17 = vld [vmem:[%s1348_s0 + $0x44] ss:$16 sps:$4 sm:$0xff]  }
  0x1c   :  { %628 = vmatpush1.bf16.msra.mxu0 %v939_v28  ;;  %556 = vmatprep.subr.bf16.mxu1 %v940_v29  ;;  %v1008_v18 = vld [vmem:[%s1348_s0 + $0x4c] ss:$16 sps:$4 sm:$0xff]   ;;  %v1010_v19 = vld [vmem:[%s1348_s0 + $0x40] ss:$16 sps:$4 sm:$0xff]   ;;  %v1011_v20 = vld [vmem:[%s1348_s0 + $0x48] ss:$16 sps:$4 sm:$0xff]  }
  0x1d   :  { %629 = vmatprep.subr.bf16.mxu0 %v942_v30  ;;  %v1012_v21 = vld [vmem:[%s1348_s0 + $0x64] ss:$16 sps:$4 sm:$0xff]   ;;  %v1014_v22 = vld [vmem:[%s1348_s0 + $0x6c] ss:$16 sps:$4 sm:$0xff]   ;;  %v1016_v23 = vld [vmem:[%s1348_s0 + $0x60] ss:$16 sps:$4 sm:$0xff]  }
  0x1e   :  { %129 = vperm.xlu1 %897, %v99_v8   ;;  %v1017_v24 = vld [vmem:[%s1348_s0 + $0x68] ss:$16 sps:$4 sm:$0xff]   ;;  %vm1303_vm2 = vmor %vm753_vm1, %vm752_vm0 }
  0x1f   :  { %557 = vmatpush1.bf16.msra.mxu1 %v944_v31  ;;  %124 = vperm.xlu0 %896, %v98_v5  }
  0x20   :  { %630 = vmatpush1.bf16.msra.mxu0 %v945_v32  ;;  %558 = vmatprep.subr.bf16.mxu1 %v946_v33 }
  0x21   :  { %631 = vmatprep.subr.bf16.mxu0 %v948_v34 }
  0x22   :  { %139 = vperm.xlu1 %897, %v101_v14  }
  0x23   :  { %559 = vmatpush1.bf16.msra.mxu1 %v950_v35  ;;  %134 = vperm.xlu0 %896, %v100_v11  }
  0x24   :  { %632 = vmatpush1.bf16.msra.mxu0 %v951_v36  ;;  %560 = vmatprep.subr.bf16.mxu1 %v952_v37 }
  0x25   :  { %633 = vmatprep.subr.bf16.mxu0 %v954_v38 }
  0x27   :  { %561 = vmatpush1.bf16.msra.mxu1 %v956_v39 }
  0x28   :  { %634 = vmatpush1.bf16.msra.mxu0 %v957_v40  ;;  %562 = vmatprep.subr.bf16.mxu1 %v958_v41 }
  0x29   :  { %635 = vmatprep.subr.bf16.mxu0 %v960_v42 }
  0x2b   :  { %563 = vmatpush1.bf16.msra.mxu1 %v962_v43 }
  0x2c   :  { %636 = vmatpush1.bf16.msra.mxu0 %v963_v44  ;;  %564 = vmatprep.subr.bf16.mxu1 %v964_v45 }
  0x2d   :  { %637 = vmatprep.subr.bf16.mxu0 %v966_v46 }
  0x2f   :  { %565 = vmatpush1.bf16.msra.mxu1 %v968_v47 }
  0x30   :  { %638 = vmatpush1.bf16.msra.mxu0 %v969_v48  ;;  %566 = vmatprep.subr.bf16.mxu1 %v970_v49 }
  0x31   :  { %639 = vmatprep.subr.bf16.mxu0 %v972_v51 }
  0x33   :  { %567 = vmatpush1.bf16.msra.mxu1 %v974_v53 }
  0x34   :  { %640 = vmatpush1.bf16.msra.mxu0 %v975_v54  ;;  %568 = vmatprep.subr.bf16.mxu1 %v976_v55 }
  0x35   :  { %641 = vmatprep.subr.bf16.mxu0 %v978_v56 }
  0x37   :  { %569 = vmatpush1.bf16.msra.mxu1 %v980_v57 }
  0x38   :  { %642 = vmatpush1.bf16.msra.mxu0 %v981_v58  ;;  %570 = vmatprep.subr.bf16.mxu1 %v982_v59 }
  0x39   :  { %643 = vmatprep.subr.bf16.mxu0 %v984_v60 }
  0x3b   :  { %571 = vmatpush1.bf16.msra.mxu1 %v986_v0 }
  0x3c   :  { %644 = vmatpush1.bf16.msra.mxu0 %v987_v1  ;;  %572 = vmatprep.subr.bf16.mxu1 %v988_v3 }
  0x3d   :  { %645 = vmatprep.subr.bf16.mxu0 %v990_v4 }
  0x3f   :  { %573 = vmatpush1.bf16.msra.mxu1 %v992_v6 }
  0x40   :  { %646 = vmatpush1.bf16.msra.mxu0 %v993_v7 }
  0x42   :  { %575 = vmatmul.mubr.bf16.vlgmr.msra.gmra.mrb[0].mxu1 %v994_v9 }
  0x43   :  { %648 = vmatmul.mubr.bf16.vlgmr.msra.gmra.mrb[0].mxu0 %v997_v10  ;;  %584 = vmatprep.mubr.bf16.mxu1 %v1000_v12 }
  0x44   :  { %657 = vmatprep.mubr.bf16.mxu0 %v1002_v13 }
  0x4a   :  { %585 = vmatmul.mubr.bf16.gmra.mrb[4].mxu1 %v1004_v15 }
  0x4b   :  { %658 = vmatmul.mubr.bf16.gmra.mrb[4].mxu0 %v1005_v16  ;;  %594 = vmatprep.mubr.bf16.mxu1 %v1006_v17 }
  0x4c   :  { %667 = vmatprep.mubr.bf16.mxu0 %v1008_v18 }
  0x52   :  { %595 = vmatmul.mubr.bf16.gmra.mrb[8].mxu1 %v1010_v19 }
  0x53   :  { %668 = vmatmul.mubr.bf16.gmra.mrb[8].mxu0 %v1011_v20  ;;  %604 = vmatprep.mubr.bf16.mxu1 %v1012_v21 }
  0x54   :  { %677 = vmatprep.mubr.bf16.mxu0 %v1014_v22 }
  0x5a   :  { %605 = vmatmul.mubr.bf16.gmra.mrb[12].mxu1 %v1016_v23 }
  0x5b   :  { %678 = vmatmul.mubr.bf16.gmra.mrb[12].mxu0 %v1017_v24 }
  0x95   :  { %v115_v27 = vpop.permute.xlu1 %114 }
  0x96   :  { %v105_v25 = vpop.permute.xlu0 %104 }
  0x99   :  { %v120_v48 = vpop.permute.xlu1 %119 }
  0x9a   :  { %v110_v26 = vpop.permute.xlu0 %109 }
  0x9d   :  { %v130_v7 = vpop.permute.xlu1 %129 }
  0x9e   :  { %v125_v8 = vpop.permute.xlu0 %124 }
 0x115   :  { %v576_v28 = vpop.f32.mrb[0].mxu1 }
 0x116   :  { %v649_v29 = vpop.f32.mrb[0].mxu0  ;;  %v577_v30 = vadd.f32 %v576_v28, %v105_v25  ;;  %v578_v31 = vpop.f32.mrb[1].mxu1 }
 0x117   :  { %v651_v32 = vpop.f32.mrb[1].mxu0  ;;  %v579_v33 = vadd.f32 %v578_v31, %v105_v25  ;;  %v580_v34 = vpop.f32.mrb[2].mxu1 }
 0x118   :  { %v653_v35 = vpop.f32.mrb[2].mxu0  ;;  %v650_v36 = vadd.f32 %v649_v29, %v577_v30  ;;  %v581_v37 = vadd.f32 %v580_v34, %v110_v26  ;;  %v582_v38 = vpop.f32.mrb[3].mxu1 }
 0x119   :  { %v655_v39 = vpop.f32.mrb[3].mxu0  ;;  %v652_v40 = vadd.f32 %v651_v32, %v579_v33  ;;  %v583_v41 = vadd.f32 %v582_v38, %v110_v26  ;;  %v140_v30 = vpop.permute.xlu1 %139 }
 0x11a   :  { %v688_v42 = vmax.f32 %v650_v36, 0.0  ;;  %v654_v43 = vadd.f32 %v653_v35, %v581_v37  ;;  %v135_v31 = vpop.permute.xlu0 %134 }
 0x11b   :  { %v689_v44 = vmax.f32 %v652_v40, 0.0  ;;  %v656_v45 = vadd.f32 %v655_v39, %v583_v41 }
 0x11c   :  { %v690_v47 = vmax.f32 %v654_v43, 0.0 }
 0x11d   :  { %v855_v49 = vpack.c.bf16 %v689_v44, %v688_v42  ;;  %v691_v50 = vmax.f32 %v656_v45, 0.0  ;;  %v586_v51 = vpop.f32.mrb[4].mxu1 }
 0x11e   :  { %v659_v52 = vpop.f32.mrb[4].mxu0  ;;  %v587_v53 = vadd.f32 %v586_v51, %v115_v27  ;;  %v588_v54 = vpop.f32.mrb[5].mxu1 }
 0x11f   :  { %v661_v55 = vpop.f32.mrb[5].mxu0  ;;  %755 = vst.msk [vmem:[%s1350_s3] sm:$0xff] %vm1303_vm2, %v855_v49  ;;  %v856_v56 = vpack.c.bf16 %v691_v50, %v690_v47  ;;  %v589_v57 = vadd.f32 %v588_v54, %v115_v27  ;;  %v590_v58 = vpop.f32.mrb[6].mxu1 }
 0x120   :  { %v663_v59 = vpop.f32.mrb[6].mxu0  ;;  %v660_v60 = vadd.f32 %v659_v52, %v587_v53  ;;  %v591_v61 = vadd.f32 %v590_v58, %v120_v48  ;;  %v592_v62 = vpop.f32.mrb[7].mxu1 }
 0x121   :  { %v665_v63 = vpop.f32.mrb[7].mxu0  ;;  %756 = vst.msk [vmem:[%s1350_s3 + $0x8] sm:$0xff] %vm1303_vm2, %v856_v56  ;;  %v662_v0 = vadd.f32 %v661_v55, %v589_v57  ;;  %v593_v1 = vadd.f32 %v592_v62, %v120_v48 }
 0x122   :  { %v692_v2 = vmax.f32 %v660_v60, 0.0  ;;  %v664_v3 = vadd.f32 %v663_v59, %v591_v61 }
 0x123   :  { %v693_v4 = vmax.f32 %v662_v0, 0.0  ;;  %v666_v5 = vadd.f32 %v665_v63, %v593_v1 }
 0x124   :  { %v694_v6 = vmax.f32 %v664_v3, 0.0 }
 0x125   :  { %v857_v9 = vpack.c.bf16 %v693_v4, %v692_v2  ;;  %v695_v10 = vmax.f32 %v666_v5, 0.0  ;;  %v596_v11 = vpop.f32.mrb[8].mxu1 }
 0x126   :  { %v669_v12 = vpop.f32.mrb[8].mxu0  ;;  %v597_v13 = vadd.f32 %v596_v11, %v125_v8  ;;  %v598_v14 = vpop.f32.mrb[9].mxu1 }
 0x127   :  { %v671_v15 = vpop.f32.mrb[9].mxu0  ;;  %757 = vst.msk [vmem:[%s1350_s3 + $0x10] sm:$0xff] %vm1303_vm2, %v857_v9  ;;  %v858_v16 = vpack.c.bf16 %v695_v10, %v694_v6  ;;  %v599_v17 = vadd.f32 %v598_v14, %v125_v8  ;;  %v600_v18 = vpop.f32.mrb[10].mxu1 }
 0x128   :  { %v673_v19 = vpop.f32.mrb[10].mxu0  ;;  %v670_v20 = vadd.f32 %v669_v12, %v597_v13  ;;  %v601_v21 = vadd.f32 %v600_v18, %v130_v7  ;;  %v602_v22 = vpop.f32.mrb[11].mxu1 }
 0x129   :  { %v675_v23 = vpop.f32.mrb[11].mxu0  ;;  %758 = vst.msk [vmem:[%s1350_s3 + $0x18] sm:$0xff] %vm1303_vm2, %v858_v16  ;;  %v672_v24 = vadd.f32 %v671_v15, %v599_v17  ;;  %v603_v25 = vadd.f32 %v602_v22, %v130_v7 }
 0x12a   :  { %v696_v26 = vmax.f32 %v670_v20, 0.0  ;;  %v674_v27 = vadd.f32 %v673_v19, %v601_v21 }
 0x12b   :  { %v697_v28 = vmax.f32 %v672_v24, 0.0  ;;  %v676_v29 = vadd.f32 %v675_v23, %v603_v25 }
 0x12c   :  { %v698_v32 = vmax.f32 %v674_v27, 0.0 }
 0x12d   :  { %v859_v33 = vpack.c.bf16 %v697_v28, %v696_v26  ;;  %v699_v34 = vmax.f32 %v676_v29, 0.0  ;;  %v606_v35 = vpop.f32.mrb[12].mxu1 }
 0x12e   :  { %v679_v36 = vpop.f32.mrb[12].mxu0  ;;  %v607_v37 = vadd.f32 %v606_v35, %v135_v31  ;;  %v608_v38 = vpop.f32.mrb[13].mxu1 }
 0x12f   :  { %v681_v39 = vpop.f32.mrb[13].mxu0  ;;  %759 = vst.msk [vmem:[%s1350_s3 + $0x20] sm:$0xff] %vm1303_vm2, %v859_v33  ;;  %v860_v40 = vpack.c.bf16 %v699_v34, %v698_v32  ;;  %v609_v41 = vadd.f32 %v608_v38, %v135_v31  ;;  %v610_v42 = vpop.f32.mrb[14].mxu1 }
 0x130   :  { %v683_v43 = vpop.f32.mrb[14].mxu0  ;;  %v680_v44 = vadd.f32 %v679_v36, %v607_v37  ;;  %v611_v45 = vadd.f32 %v610_v42, %v140_v30  ;;  %v612_v47 = vpop.f32.mrb[15].mxu1 }
 0x131   :  { %v685_v48 = vpop.f32.mrb[15].mxu0  ;;  %760 = vst.msk [vmem:[%s1350_s3 + $0x28] sm:$0xff] %vm1303_vm2, %v860_v40  ;;  %v682_v49 = vadd.f32 %v681_v39, %v609_v41  ;;  %v613_v50 = vadd.f32 %v612_v47, %v140_v30 }
 0x132   :  { %v700_v51 = vmax.f32 %v680_v44, 0.0  ;;  %v684_v52 = vadd.f32 %v683_v43, %v611_v45 }
 0x133   :  { %v701_v53 = vmax.f32 %v682_v49, 0.0  ;;  %v686_v54 = vadd.f32 %v685_v48, %v613_v50 }
 0x134   :  { %v702_v55 = vmax.f32 %v684_v52, 0.0 }
 0x135   :  { %v861_v56 = vpack.c.bf16 %v701_v53, %v700_v51  ;;  %v703_v57 = vmax.f32 %v686_v54, 0.0 }
 0x137   :  { %761 = vst.msk [vmem:[%s1350_s3 + $0x30] sm:$0xff] %vm1303_vm2, %v861_v56  ;;  %v862_v58 = vpack.c.bf16 %v703_v57, %v702_v55 }
 0x139   :  { %762 = vst.msk [vmem:[%s1350_s3 + $0x38] sm:$0xff] %vm1303_vm2, %v862_v58 }

// kernel: dqn_forward.6
= control target key start
LH: loop header
LB: loop body
LE: loop exit
PB: predicated region body
PF: predicated region fallthrough
CT: control target
= control target key end

     0   :  { %v991_v1 = vmov 0   ;;  %vm475_vm0 = vcmask 523264   ;;  %vm723_vm1 = vcmask 797696   ;;  %s1243_s1 = inlined_call_operand.vmem [shape: bf16[576,98], index: 1, kind: input, shape index: {}]   ;;  %s1244_s0 = inlined_call_operand.vmem [shape: bf16[64,576], index: 0, kind: input, shape index: {}]   ;;  %s1245_s2 = inlined_call_operand.vmem [shape: f32[64,1], index: 2, kind: input, shape index: {}]   ;;  %s1246_s3 = inlined_call_operand.vmem [shape: bf16[64,98], index: 3, kind: output, shape index: {}]  }
   0x1   :  { %v927_v0 = vld [vmem:[%s1243_s1 + $0x40] sm:$0xff]   ;;  %925 = vset.pattern.permute.xlu0 %v991_v1  ;;  %926 = vset.pattern.permute.xlu1 %v991_v1  ;;  %v931_v5 = vld [vmem:[%s1243_s1 + $0x48] sm:$0xff]   ;;  %v935_v9 = vld [vmem:[%s1243_s1 + $0x50] sm:$0xff]  }
   0x2   :  { %v928_v2 = vld [vmem:[%s1243_s1 + $0xc0] sm:$0xff]   ;;  %812 = vmatprep.subr.bf16.mxu0 %v927_v0  ;;  %v932_v6 = vld [vmem:[%s1243_s1 + $0xc8] sm:$0xff]   ;;  %v936_v10 = vld [vmem:[%s1243_s1 + $0xd0] sm:$0xff]  }
   0x3   :  { %v929_v3 = vld [vmem:[%s1243_s1] sm:$0xff]   ;;  %852 = vmatprep.subr.bf16.mxu1 %v928_v2  ;;  %v933_v7 = vld [vmem:[%s1243_s1 + $0x8] sm:$0xff]   ;;  %v937_v11 = vld [vmem:[%s1243_s1 + $0x10] sm:$0xff]  }
   0x4   :  { %v930_v4 = vld [vmem:[%s1243_s1 + $0x80] sm:$0xff]   ;;  %813 = vmatpush3.bf16.msra.mxu0 %v929_v3  ;;  %v934_v8 = vld [vmem:[%s1243_s1 + $0x88] sm:$0xff]   ;;  %v938_v12 = vld [vmem:[%s1243_s1 + $0x90] sm:$0xff]  }
   0x5   :  { %853 = vmatpush3.bf16.msra.mxu1 %v930_v4  ;;  %814 = vmatprep.subr.bf16.mxu0 %v931_v5  ;;  %v939_v13 = vld [vmem:[%s1243_s1 + $0x58] sm:$0xff]   ;;  %v943_v17 = vld [vmem:[%s1243_s1 + $0x60] sm:$0xff]   ;;  %v947_v21 = vld [vmem:[%s1243_s1 + $0x68] sm:$0xff]  }
   0x6   :  { %854 = vmatprep.subr.bf16.mxu1 %v932_v6  ;;  %v940_v14 = vld [vmem:[%s1243_s1 + $0xd8] sm:$0xff]   ;;  %v944_v18 = vld [vmem:[%s1243_s1 + $0xe0] sm:$0xff]   ;;  %v948_v22 = vld [vmem:[%s1243_s1 + $0xe8] sm:$0xff]  }
   0x7   :  { %v941_v15 = vld [vmem:[%s1243_s1 + $0x18] sm:$0xff]   ;;  %v945_v19 = vld [vmem:[%s1243_s1 + $0x20] sm:$0xff]   ;;  %v949_v23 = vld [vmem:[%s1243_s1 + $0x28] sm:$0xff]  }
   0x8   :  { %815 = vmatpush3.bf16.msra.mxu0 %v933_v7  ;;  %v942_v16 = vld [vmem:[%s1243_s1 + $0x98] sm:$0xff]   ;;  %v946_v20 = vld [vmem:[%s1243_s1 + $0xa0] sm:$0xff]   ;;  %v950_v24 = vld [vmem:[%s1243_s1 + $0xa8] sm:$0xff]  }
   0x9   :  { %855 = vmatpush3.bf16.msra.mxu1 %v934_v8  ;;  %816 = vmatprep.subr.bf16.mxu0 %v935_v9  ;;  %v951_v25 = vld [vmem:[%s1243_s1 + $0x70] sm:$0xff]   ;;  %v955_v29 = vld [vmem:[%s1243_s1 + $0x78] sm:$0xff]   ;;  %v964_v36 = vld [vmem:[%s1244_s0 + $0xc] ss:$20 sps:$4 sm:$0xff]  }
   0xa   :  { %856 = vmatprep.subr.bf16.mxu1 %v936_v10  ;;  %v952_v26 = vld [vmem:[%s1243_s1 + $0xf0] sm:$0xff]   ;;  %v956_v30 = vld [vmem:[%s1243_s1 + $0xf8] sm:$0xff]   ;;  %v965_v37 = vld [vmem:[%s1243_s1 + $0x100] sm:$0xff]   ;;  %585 = vmatprep.mubr.bf16.mxu1 %v964_v36 }
   0xb   :  { %v953_v27 = vld [vmem:[%s1243_s1 + $0x30] sm:$0xff]   ;;  %v957_v31 = vld [vmem:[%s1243_s1 + $0x38] sm:$0xff]   ;;  %v966_v38 = vld [vmem:[%s1244_s0 + $0x2c] ss:$20 sps:$4 sm:$0xff]  }
   0xc   :  { %817 = vmatpush3.bf16.msra.mxu0 %v937_v11  ;;  %v954_v28 = vld [vmem:[%s1243_s1 + $0xb0] sm:$0xff]   ;;  %v958_v32 = vld [vmem:[%s1243_s1 + $0xb8] sm:$0xff]   ;;  %v972_v40 = vld [vmem:[%s1243_s1 + $0x108] sm:$0xff]  }
   0xd   :  { %857 = vmatpush3.bf16.msra.mxu1 %v938_v12  ;;  %818 = vmatprep.subr.bf16.mxu0 %v939_v13  ;;  %v959_v33 = vld [vmem:[%s1244_s0] ss:$20 sps:$4 sm:$0xff]   ;;  %v961_v34 = vld [vmem:[%s1244_s0 + $0x4] ss:$20 sps:$4 sm:$0xff]   ;;  %v962_v35 = vld [vmem:[%s1244_s0 + $0x8] ss:$20 sps:$4 sm:$0xff]  }
   0xe   :  { %858 = vmatprep.subr.bf16.mxu1 %v940_v14  ;;  %520 = vmatprep.mubr.bf16.mxu0 %v961_v34  ;;  %v968_v39 = vld [vmem:[%s1244_s0 + $0x34] ss:$20 sps:$4 sm:$0xff]   ;;  %v971_v42 = vld [vmem:[%s1244_s0 + $0x30] ss:$20 sps:$4 sm:$0xff]   ;;  %v986_v46 = vld [vmem:[%s1243_s1 + $0x118] sm:$0xff]  }
   0xf   :  { %v970_v41 = vld [vmem:[%s1244_s0 + $0x28] ss:$20 sps:$4 sm:$0xff]   ;;  %v979_v45 = vld [vmem:[%s1243_s1 + $0x110] sm:$0xff]   ;;  %v978_v48 = vld [vmem:[%s1244_s0 + $0x58] ss:$20 sps:$4 sm:$0xff]  }
  0x10   :  { %819 = vmatpush3.bf16.msra.mxu0 %v941_v15  ;;  %v973_v43 = vld [vmem:[%s1244_s0 + $0x54] ss:$20 sps:$4 sm:$0xff]   ;;  %v975_v44 = vld [vmem:[%s1244_s0 + $0x5c] ss:$20 sps:$4 sm:$0xff]   ;;  %v982_v50 = vld [vmem:[%s1244_s0 + $0x84] ss:$20 sps:$4 sm:$0xff]  }
  0x11   :  { %859 = vmatpush3.bf16.msra.mxu1 %v942_v16  ;;  %820 = vmatprep.subr.bf16.mxu0 %v943_v17  ;;  %v977_v47 = vld [vmem:[%s1244_s0 + $0x50] ss:$20 sps:$4 sm:$0xff]   ;;  %v112_v53 = vld [vmem:[%s1245_s2 + $0x8] sm:$0xff]  ;;  %v114_v54 = vld [vmem:[%s1245_s2 + $0x18] sm:$0xff] }
  0x12   :  { %860 = vmatprep.subr.bf16.mxu1 %v944_v18  ;;  %v980_v49 = vld [vmem:[%s1244_s0 + $0x7c] ss:$20 sps:$4 sm:$0xff]   ;;  %v111_v51 = vld [vmem:[%s1245_s2] sm:$0xff]  ;;  %v984_v55 = vld [vmem:[%s1244_s0 + $0x78] ss:$20 sps:$4 sm:$0xff]  }
  0x13   :  { %v113_v52 = vld [vmem:[%s1245_s2 + $0x10] sm:$0xff]  ;;  %121 = vperm.xlu0 %925, %v111_v51   ;;  %v115_v58 = vld [vmem:[%s1245_s2 + $0x20] sm:$0xff]  ;;  %v116_v60 = vld [vmem:[%s1245_s2 + $0x28] sm:$0xff] }
  0x14   :  { %821 = vmatpush3.bf16.msra.mxu0 %v945_v19  ;;  %131 = vperm.xlu1 %926, %v113_v52   ;;  %v985_v56 = vld [vmem:[%s1244_s0 + $0x80] ss:$20 sps:$4 sm:$0xff]   ;;  %v987_v57 = vld [vmem:[%s1244_s0 + $0x10] ss:$20 sps:$4 sm:$0xff]   ;;  %v118_v62 = vld [vmem:[%s1245_s2 + $0x38] sm:$0xff] }
  0x15   :  { %861 = vmatpush3.bf16.msra.mxu1 %v946_v20  ;;  %822 = vmatprep.subr.bf16.mxu0 %v947_v21  ;;  %v988_v59 = vld [vmem:[%s1244_s0 + $0x60] ss:$20 sps:$4 sm:$0xff]   ;;  %v989_v63 = vld [vmem:[%s1244_s0 + $0x38] ss:$20 sps:$4 sm:$0xff]   ;;  %v990_v0 = vld [vmem:[%s1244_s0 + $0x88] ss:$20 sps:$4 sm:$0xff]  }
  0x16   :  { %862 = vmatprep.subr.bf16.mxu1 %v948_v22  ;;  %v117_v61 = vld [vmem:[%s1245_s2 + $0x30] sm:$0xff] }
  0x17   :  { %126 = vperm.xlu0 %925, %v112_v53  }
  0x18   :  { %823 = vmatpush3.bf16.msra.mxu0 %v949_v23  ;;  %136 = vperm.xlu1 %926, %v114_v54  }
  0x19   :  { %863 = vmatpush3.bf16.msra.mxu1 %v950_v24  ;;  %824 = vmatprep.subr.bf16.mxu0 %v951_v25 }
  0x1a   :  { %864 = vmatprep.subr.bf16.mxu1 %v952_v26 }
  0x1b   :  { %141 = vperm.xlu0 %925, %v115_v58  }
  0x1c   :  { %825 = vmatpush3.bf16.msra.mxu0 %v953_v27  ;;  %146 = vperm.xlu1 %926, %v116_v60  }
  0x1d   :  { %865 = vmatpush3.bf16.msra.mxu1 %v954_v28  ;;  %826 = vmatprep.subr.bf16.mxu0 %v955_v29 }
  0x1e   :  { %866 = vmatprep.subr.bf16.mxu1 %v956_v30 }
  0x1f   :  { %151 = vperm.xlu0 %925, %v117_v61  }
  0x20   :  { %827 = vmatpush3.bf16.msra.mxu0 %v957_v31  ;;  %156 = vperm.xlu1 %926, %v118_v62  }
  0x21   :  { %867 = vmatpush3.bf16.msra.mxu1 %v958_v32  ;;  %900 = vmatprep.subr.bf16.mxu0 %v965_v37 }
  0x22   :  { %916 = vmatprep.subr.bf16.mxu1 %v965_v37 }
  0x23   :  { %521 = vmatmul.mubr.bf16.vlgmr.msra.gmra.mrb[0].mxu0 %v959_v33 }
  0x24   :  { %586 = vmatmul.mubr.bf16.vlgmr.msra.gmra.mrb[0].mxu1 %v962_v35  ;;  %901 = vmatpush3.bf16.msra.mxu0 %v965_v37 }
  0x25   :  { %920 = vmatpush3.bf16.msra.mxu1 %v965_v37  ;;  %528 = vmatprep.mubr.bf16.mxu0 %v966_v38 }
  0x26   :  { %593 = vmatprep.mubr.bf16.mxu1 %v968_v39  ;;  %902 = vmatprep.subr.bf16.mxu0 %v972_v40 }
  0x27   :  { %917 = vmatprep.subr.bf16.mxu1 %v972_v40 }
  0x28   :  { %903 = vmatpush3.bf16.msra.mxu0 %v972_v40 }
  0x29   :  { %921 = vmatpush3.bf16.msra.mxu1 %v972_v40  ;;  %904 = vmatprep.subr.bf16.mxu0 %v979_v45 }
  0x2a   :  { %918 = vmatprep.subr.bf16.mxu1 %v979_v45 }
  0x2b   :  { %529 = vmatmul.mubr.bf16.gmra.mrb[4].mxu0 %v970_v41 }
  0x2c   :  { %594 = vmatmul.mubr.bf16.gmra.mrb[4].mxu1 %v971_v42  ;;  %536 = vmatprep.mubr.bf16.mxu0 %v973_v43 }
  0x2d   :  { %601 = vmatprep.mubr.bf16.mxu1 %v975_v44  ;;  %905 = vmatpush3.bf16.msra.mxu0 %v979_v45 }
  0x2e   :  { %922 = vmatpush3.bf16.msra.mxu1 %v979_v45  ;;  %906 = vmatprep.subr.bf16.mxu0 %v986_v46 }
  0x2f   :  { %919 = vmatprep.subr.bf16.mxu1 %v986_v46 }
  0x31   :  { %907 = vmatpush3.bf16.msra.mxu0 %v986_v46 }
  0x32   :  { %923 = vmatpush3.bf16.msra.mxu1 %v986_v46 }
  0x33   :  { %537 = vmatmul.mubr.bf16.gmra.mrb[8].mxu0 %v977_v47 }
  0x34   :  { %602 = vmatmul.mubr.bf16.gmra.mrb[8].mxu1 %v978_v48  ;;  %544 = vmatprep.mubr.bf16.mxu0 %v980_v49 }
  0x35   :  { %609 = vmatprep.mubr.bf16.mxu1 %v982_v50 }
  0x3b   :  { %545 = vmatmul.mubr.bf16.gmra.mrb[12].mxu0 %v984_v55 }
  0x3c   :  { %610 = vmatmul.mubr.bf16.gmra.mrb[12].mxu1 %v985_v56  ;;  %908 = vmatprep.mubr.msk.bf16.mxu0 %vm475_vm0, %v987_v57 }
  0x3d   :  { %912 = vmatprep.mubr.msk.bf16.mxu1 %vm475_vm0, %v988_v59 }
  0x43   :  { %909 = vmatmul.mubr.msk.bf16.vlgmr.msra.gmra.mrb[16].mxu0 %vm475_vm0, %v989_v63 }
  0x44   :  { %913 = vmatmul.mubr.msk.bf16.vlgmr.msra.gmra.mrb[16].mxu1 %vm475_vm0, %v990_v0 }
  0x92   :  { %v122_v1 = vpop.permute.xlu0 %121 }
  0x93   :  { %v132_v18 = vpop.permute.xlu1 %131 }
  0x96   :  { %v127_v3 = vpop.permute.xlu0 %126 }
  0x97   :  { %v137_v33 = vpop.permute.xlu1 %136 }
  0x9a   :  { %v142_v36 = vpop.permute.xlu0 %141 }
  0x9b   :  { %v147_v50 = vpop.permute.xlu1 %146 }
  0x9e   :  { %v152_v54 = vpop.permute.xlu0 %151 }
  0xf6   :  { %v828_v2 = vpop.f32.mrb[0].mxu0 }
  0xf7   :  { %v868_v4 = vpop.f32.mrb[0].mxu1  ;;  %v829_v5 = vpop.f32.mrb[1].mxu0 }
  0xf8   :  { %v830_v6 = vadd.f32 %v829_v5, %v828_v2  ;;  %v869_v7 = vpop.f32.mrb[1].mxu1  ;;  %v831_v8 = vpop.f32.mrb[2].mxu0 }
  0xf9   :  { %v870_v9 = vadd.f32 %v869_v7, %v868_v4  ;;  %v871_v10 = vpop.f32.mrb[2].mxu1  ;;  %v832_v11 = vpop.f32.mrb[3].mxu0 }
  0xfa   :  { %v523_v12 = vadd.f32 %v830_v6, %v122_v1  ;;  %v833_v13 = vadd.f32 %v832_v11, %v831_v8  ;;  %v872_v14 = vpop.f32.mrb[3].mxu1  ;;  %v157_v4 = vpop.permute.xlu1 %156 }
  0xfb   :  { %v873_v15 = vadd.f32 %v872_v14, %v871_v10 }
  0xfc   :  { %v526_v16 = vadd.f32 %v833_v13, %v127_v3  ;;  %v588_v17 = vadd.f32 %v870_v9, %v523_v12 }
  0xfe   :  { %v834_v19 = vpop.f32.mrb[4].mxu0  ;;  %v1208_v20 = vadd.f32 %v873_v15, %v526_v16 }
  0xff   :  { %v874_v21 = vpop.f32.mrb[4].mxu1  ;;  %v835_v22 = vpop.f32.mrb[5].mxu0 }
 0x100   :  { %v836_v23 = vadd.f32 %v835_v22, %v834_v19  ;;  %v875_v24 = vpop.f32.mrb[5].mxu1  ;;  %v837_v25 = vpop.f32.mrb[6].mxu0 }
 0x101   :  { %v876_v26 = vadd.f32 %v875_v24, %v874_v21  ;;  %v877_v27 = vpop.f32.mrb[6].mxu1  ;;  %v838_v28 = vpop.f32.mrb[7].mxu0 }
 0x102   :  { %v531_v29 = vadd.f32 %v836_v23, %v132_v18  ;;  %v839_v30 = vadd.f32 %v838_v28, %v837_v25  ;;  %v878_v31 = vpop.f32.mrb[7].mxu1 }
 0x103   :  { %v879_v32 = vadd.f32 %v878_v31, %v877_v27 }
 0x104   :  { %v534_v34 = vadd.f32 %v839_v30, %v137_v33  ;;  %v596_v35 = vadd.f32 %v876_v26, %v531_v29 }
 0x106   :  { %v840_v37 = vpop.f32.mrb[8].mxu0  ;;  %v599_v38 = vadd.f32 %v879_v32, %v534_v34 }
 0x107   :  { %v880_v39 = vpop.f32.mrb[8].mxu1  ;;  %v841_v40 = vpop.f32.mrb[9].mxu0 }
 0x108   :  { %v842_v41 = vadd.f32 %v841_v40, %v840_v37  ;;  %v881_v42 = vpop.f32.mrb[9].mxu1  ;;  %v843_v43 = vpop.f32.mrb[10].mxu0 }
 0x109   :  { %v882_v44 = vadd.f32 %v881_v42, %v880_v39  ;;  %v883_v45 = vpop.f32.mrb[10].mxu1  ;;  %v844_v46 = vpop.f32.mrb[11].mxu0 }
 0x10a   :  { %v539_v47 = vadd.f32 %v842_v41, %v142_v36  ;;  %v845_v48 = vadd.f32 %v844_v46, %v843_v43  ;;  %v884_v49 = vpop.f32.mrb[11].mxu1 }
 0x10b   :  { %v885_v51 = vadd.f32 %v884_v49, %v883_v45 }
 0x10c   :  { %v542_v52 = vadd.f32 %v845_v48, %v147_v50  ;;  %v604_v53 = vadd.f32 %v882_v44, %v539_v47 }
 0x10e   :  { %v846_v55 = vpop.f32.mrb[12].mxu0  ;;  %v607_v56 = vadd.f32 %v885_v51, %v542_v52 }
 0x10f   :  { %v886_v57 = vpop.f32.mrb[12].mxu1  ;;  %v847_v58 = vpop.f32.mrb[13].mxu0 }
 0x110   :  { %v848_v59 = vadd.f32 %v847_v58, %v846_v55  ;;  %v887_v60 = vpop.f32.mrb[13].mxu1  ;;  %v849_v61 = vpop.f32.mrb[14].mxu0 }
 0x111   :  { %v888_v62 = vadd.f32 %v887_v60, %v886_v57  ;;  %v889_v63 = vpop.f32.mrb[14].mxu1  ;;  %v850_v0 = vpop.f32.mrb[15].mxu0 }
 0x112   :  { %v547_v1 = vadd.f32 %v848_v59, %v152_v54  ;;  %v851_v2 = vadd.f32 %v850_v0, %v849_v61  ;;  %v890_v3 = vpop.f32.mrb[15].mxu1 }
 0x113   :  { %v891_v5 = vadd.f32 %v890_v3, %v889_v63 }
 0x114   :  { %v550_v6 = vadd.f32 %v851_v2, %v157_v4  ;;  %v612_v7 = vadd.f32 %v888_v62, %v547_v1 }
 0x116   :  { %v910_v8 = vpop.f32.mrb[16].mxu0  ;;  %v615_v9 = vadd.f32 %v891_v5, %v550_v6 }
 0x117   :  { %v661_v10 = vadd.f32 %v910_v8, %v596_v35  ;;  %v914_v11 = vpop.f32.mrb[16].mxu1  ;;  %v652_v12 = vpop.f32.mrb[17].mxu0 }
 0x118   :  { %v677_v13 = vadd.f32 %v914_v11, %v612_v7  ;;  %v653_v14 = vadd.f32 %v652_v12, %v588_v17  ;;  %v668_v15 = vpop.f32.mrb[17].mxu1  ;;  %v911_v16 = vpop.f32.mrb[18].mxu0 }
 0x119   :  { %v685_v18 = vmax.f32 %v661_v10, 0.0  ;;  %v669_v19 = vadd.f32 %v668_v15, %v604_v53  ;;  %v664_v21 = vadd.f32 %v911_v16, %v599_v38  ;;  %v915_v22 = vpop.f32.mrb[18].mxu1  ;;  %v655_v23 = vpop.f32.mrb[19].mxu0 }
 0x11a   :  { %v689_v24 = vmax.f32 %v677_v13, 0.0  ;;  %v683_v25 = vmax.f32 %v653_v14, 0.0  ;;  %v680_v26 = vadd.f32 %v915_v22, %v615_v9  ;;  %v656_v27 = vadd.f32 %v655_v23, %v1208_v20  ;;  %v671_v28 = vpop.f32.mrb[19].mxu1 }
 0x11b   :  { %v806_v29 = vpack.c.bf16 %v685_v18, %v685_v18  ;;  %v687_v30 = vmax.f32 %v669_v19, 0.0  ;;  %v686_v31 = vmax.f32 %v664_v21, 0.0  ;;  %v672_v32 = vadd.f32 %v671_v28, %v607_v56 }
 0x11c   :  { %v810_v33 = vpack.c.bf16 %v689_v24, %v689_v24  ;;  %v804_v17 = vpack.c.bf16 %v683_v25, %v683_v25  ;;  %v690_v34 = vmax.f32 %v680_v26, 0.0  ;;  %v684_v35 = vmax.f32 %v656_v27, 0.0 }
 0x11d   :  { %726 = vst.msk [vmem:[%s1246_s3 + $0x8] sm:$0xf] %vm723_vm1, %v806_v29  ;;  %v808_v36 = vpack.c.bf16 %v687_v30, %v687_v30  ;;  %v807_v37 = vpack.c.bf16 %v686_v31, %v686_v31  ;;  %v688_v38 = vmax.f32 %v672_v32, 0.0 }
 0x11e   :  { %730 = vst.msk [vmem:[%s1246_s3 + $0x18] sm:$0xf] %vm723_vm1, %v810_v33  ;;  %724 = vst.msk [vmem:[%s1246_s3] sm:$0xf] %vm723_vm1, %v804_v17  ;;  %v811_v20 = vpack.c.bf16 %v690_v34, %v690_v34  ;;  %v805_v39 = vpack.c.bf16 %v684_v35, %v684_v35 }
 0x11f   :  { %728 = vst.msk [vmem:[%s1246_s3 + $0x10] sm:$0xf] %vm723_vm1, %v808_v36  ;;  %727 = vst.msk [vmem:[%s1246_s3 + $0xc] sm:$0xf] %vm723_vm1, %v807_v37  ;;  %v809_v40 = vpack.c.bf16 %v688_v38, %v688_v38 }
 0x120   :  { %731 = vst.msk [vmem:[%s1246_s3 + $0x1c] sm:$0xf] %vm723_vm1, %v811_v20  ;;  %725 = vst.msk [vmem:[%s1246_s3 + $0x4] sm:$0xf] %vm723_vm1, %v805_v39 }
 0x121   :  { %729 = vst.msk [vmem:[%s1246_s3 + $0x14] sm:$0xf] %vm723_vm1, %v809_v40 }

// kernel: dqn_forward.7
= control target key start
LH: loop header
LB: loop body
LE: loop exit
PB: predicated region body
PF: predicated region fallthrough
CT: control target
= control target key end

     0   :  { %v812_v36 = vlaneseq  ;;  %v8582_v37 = vmov 1966171168   ;;  %s11224_s0 = inlined_call_operand.vmem [shape: bf16[2,3136], index: 0, kind: input, shape index: {}]   ;;  %s11225_s1 = inlined_call_operand.vmem [shape: bf16[3136,512], index: 1, kind: input, shape index: {}]   ;;  %s11226_s2 = inlined_call_operand.vmem [shape: f32[1,512], index: 2, kind: input, shape index: {}]   ;;  %s11227_s3 = inlined_call_operand.vmem [shape: bf16[512,4], index: 3, kind: input, shape index: {}]   ;;  %s11228_s4 = inlined_call_operand.vmem [shape: f32[1,4], index: 4, kind: input, shape index: {}]   ;;  %s11229_s5 = inlined_call_operand.hbm [shape: f32[2,4], index: 5, kind: output, shape index: {}]  }
   0x1   :  { %v7345_v0 = vld [vmem:[%s11225_s1 + $0x4] ss:$16 sps:$4 sm:$0xff]   ;;  %v7347_v1 = vld [vmem:[%s11225_s1 + $0xc] ss:$16 sps:$4 sm:$0xff]   ;;  %v7349_v2 = vld [vmem:[%s11225_s1] ss:$16 sps:$4 sm:$0xff]   ;;  %v838_v38 = vunpack.c.l.s4 %v8582_v37 }
   0x2   :  { %4945 = vmatprep.subr.bf16.mxu0 %v7345_v0  ;;  %v7350_v3 = vld [vmem:[%s11225_s1 + $0x8] ss:$16 sps:$4 sm:$0xff]   ;;  %5478 = vmatprep.subr.bf16.mxu1 %v7347_v1  ;;  %v7351_v4 = vld [vmem:[%s11225_s1 + $0x24] ss:$16 sps:$4 sm:$0xff]   ;;  %v7353_v5 = vld [vmem:[%s11225_s1 + $0x2c] ss:$16 sps:$4 sm:$0xff]  }
   0x3   :  { %4946 = vmatpush1.bf16.msra.mxu0 %v7349_v2  ;;  %5479 = vmatpush1.bf16.msra.mxu1 %v7350_v3  ;;  %v7355_v6 = vld [vmem:[%s11225_s1 + $0x20] ss:$16 sps:$4 sm:$0xff]   ;;  %v7356_v7 = vld [vmem:[%s11225_s1 + $0x28] ss:$16 sps:$4 sm:$0xff]   ;;  %v7357_v8 = vld [vmem:[%s11225_s1 + $0x44] ss:$16 sps:$4 sm:$0xff]   ;;  %v839_v43 = vunpack.c.0.s8 %v838_v38 }
   0x4   :  { %4947 = vmatprep.subr.bf16.mxu0 %v7351_v4  ;;  %5480 = vmatprep.subr.bf16.mxu1 %v7353_v5  ;;  %v7359_v9 = vld [vmem:[%s11225_s1 + $0x4c] ss:$16 sps:$4 sm:$0xff]   ;;  %v7361_v10 = vld [vmem:[%s11225_s1 + $0x40] ss:$16 sps:$4 sm:$0xff]   ;;  %v7362_v11 = vld [vmem:[%s11225_s1 + $0x48] ss:$16 sps:$4 sm:$0xff]  }
   0x5   :  { %v7363_v12 = vld [vmem:[%s11225_s1 + $0x64] ss:$16 sps:$4 sm:$0xff]   ;;  %v7365_v13 = vld [vmem:[%s11225_s1 + $0x6c] ss:$16 sps:$4 sm:$0xff]   ;;  %v7367_v14 = vld [vmem:[%s11225_s1 + $0x60] ss:$16 sps:$4 sm:$0xff]  }
   0x6   :  { %v7368_v15 = vld [vmem:[%s11225_s1 + $0x68] ss:$16 sps:$4 sm:$0xff]   ;;  %v7369_v16 = vld [vmem:[%s11225_s1 + $0x84] ss:$16 sps:$4 sm:$0xff]   ;;  %v7371_v17 = vld [vmem:[%s11225_s1 + $0x8c] ss:$16 sps:$4 sm:$0xff]  }
   0x7   :  { %4948 = vmatpush1.bf16.msra.mxu0 %v7355_v6  ;;  %5481 = vmatpush1.bf16.msra.mxu1 %v7356_v7  ;;  %v7373_v18 = vld [vmem:[%s11225_s1 + $0x80] ss:$16 sps:$4 sm:$0xff]   ;;  %v7374_v19 = vld [vmem:[%s11225_s1 + $0x88] ss:$16 sps:$4 sm:$0xff]   ;;  %v7375_v20 = vld [vmem:[%s11225_s1 + $0xa4] ss:$16 sps:$4 sm:$0xff]  }
   0x8   :  { %4949 = vmatprep.subr.bf16.mxu0 %v7357_v8  ;;  %5482 = vmatprep.subr.bf16.mxu1 %v7359_v9  ;;  %v7377_v21 = vld [vmem:[%s11225_s1 + $0xac] ss:$16 sps:$4 sm:$0xff]   ;;  %v7379_v22 = vld [vmem:[%s11225_s1 + $0xa0] ss:$16 sps:$4 sm:$0xff]   ;;  %v7380_v23 = vld [vmem:[%s11225_s1 + $0xa8] ss:$16 sps:$4 sm:$0xff]  }
   0x9   :  { %v7381_v24 = vld [vmem:[%s11225_s1 + $0xc4] ss:$16 sps:$4 sm:$0xff]   ;;  %v7383_v25 = vld [vmem:[%s11225_s1 + $0xcc] ss:$16 sps:$4 sm:$0xff]   ;;  %v7385_v26 = vld [vmem:[%s11225_s1 + $0xc0] ss:$16 sps:$4 sm:$0xff]  }
   0xa   :  { %v7386_v27 = vld [vmem:[%s11225_s1 + $0xc8] ss:$16 sps:$4 sm:$0xff]   ;;  %v7387_v28 = vld [vmem:[%s11225_s1 + $0xe4] ss:$16 sps:$4 sm:$0xff]   ;;  %v7389_v29 = vld [vmem:[%s11225_s1 + $0xec] ss:$16 sps:$4 sm:$0xff]  }
   0xb   :  { %4950 = vmatpush1.bf16.msra.mxu0 %v7361_v10  ;;  %5483 = vmatpush1.bf16.msra.mxu1 %v7362_v11  ;;  %v7391_v30 = vld [vmem:[%s11225_s1 + $0xe0] ss:$16 sps:$4 sm:$0xff]   ;;  %v7392_v31 = vld [vmem:[%s11225_s1 + $0xe8] ss:$16 sps:$4 sm:$0xff]   ;;  %v7393_v32 = vld [vmem:[%s11225_s1 + $0x104] ss:$16 sps:$4 sm:$0xff]  }
   0xc   :  { %4951 = vmatprep.subr.bf16.mxu0 %v7363_v12  ;;  %5484 = vmatprep.subr.bf16.mxu1 %v7365_v13  ;;  %v7395_v33 = vld [vmem:[%s11225_s1 + $0x10c] ss:$16 sps:$4 sm:$0xff]   ;;  %v7397_v34 = vld [vmem:[%s11225_s1 + $0x100] ss:$16 sps:$4 sm:$0xff]   ;;  %v7398_v35 = vld [vmem:[%s11225_s1 + $0x108] ss:$16 sps:$4 sm:$0xff]  }
   0xd   :  { %v7399_v39 = vld [vmem:[%s11225_s1 + $0x124] ss:$16 sps:$4 sm:$0xff]   ;;  %v7401_v40 = vld [vmem:[%s11225_s1 + $0x12c] ss:$16 sps:$4 sm:$0xff]   ;;  %v7403_v41 = vld [vmem:[%s11225_s1 + $0x120] ss:$16 sps:$4 sm:$0xff]  }
   0xe   :  { %v8732_v42 = vshrl.u32 %v812_v36, 7  ;;  %v7404_v44 = vld [vmem:[%s11225_s1 + $0x128] ss:$16 sps:$4 sm:$0xff]   ;;  %v7405_v45 = vld [vmem:[%s11225_s1 + $0x144] ss:$16 sps:$4 sm:$0xff]  }
   0xf   :  { %4952 = vmatpush1.bf16.msra.mxu0 %v7367_v14  ;;  %5485 = vmatpush1.bf16.msra.mxu1 %v7368_v15  ;;  %v7407_v46 = vld [vmem:[%s11225_s1 + $0x14c] ss:$16 sps:$4 sm:$0xff]   ;;  %v7409_v47 = vld [vmem:[%s11225_s1 + $0x140] ss:$16 sps:$4 sm:$0xff]   ;;  %v7410_v48 = vld [vmem:[%s11225_s1 + $0x148] ss:$16 sps:$4 sm:$0xff]  }
  0x10   :  { %4953 = vmatprep.subr.bf16.mxu0 %v7369_v16  ;;  %5486 = vmatprep.subr.bf16.mxu1 %v7371_v17  ;;  %v8750_v49 = vsub.s32 %v839_v43, %v8732_v42  ;;  %v7411_v50 = vld [vmem:[%s11225_s1 + $0x164] ss:$16 sps:$4 sm:$0xff]   ;;  %v7413_v51 = vld [vmem:[%s11225_s1 + $0x16c] ss:$16 sps:$4 sm:$0xff]   ;;  %v7415_v53 = vld [vmem:[%s11225_s1 + $0x160] ss:$16 sps:$4 sm:$0xff]  }
  0x11   :  { %v8761_v52 = vld [vmem:[%s11224_s0] sm:$0xff]  ;;  %v7416_v55 = vld [vmem:[%s11225_s1 + $0x168] ss:$16 sps:$4 sm:$0xff]   ;;  %v7419_v57 = vld [vmem:[%s11225_s1 + $0x18c] ss:$16 sps:$4 sm:$0xff]  }
  0x12   :  { %v843_v54 = vrot.slane %v8761_v52, %v8750_v49  ;;  %v7417_v56 = vld [vmem:[%s11225_s1 + $0x184] ss:$16 sps:$4 sm:$0xff]   ;;  %v7421_v59 = vld [vmem:[%s11225_s1 + $0x180] ss:$16 sps:$4 sm:$0xff]   ;;  %v7422_v61 = vld [vmem:[%s11225_s1 + $0x188] ss:$16 sps:$4 sm:$0xff]  }
  0x13   :  { %4954 = vmatpush1.bf16.msra.mxu0 %v7373_v18  ;;  %5487 = vmatpush1.bf16.msra.mxu1 %v7374_v19  ;;  %v7423_v62 = vld [vmem:[%s11225_s1 + $0x1a4] ss:$16 sps:$4 sm:$0xff]   ;;  %v7425_v63 = vld [vmem:[%s11225_s1 + $0x1ac] ss:$16 sps:$4 sm:$0xff]   ;;  %v7427_v0 = vld [vmem:[%s11225_s1 + $0x1a0] ss:$16 sps:$4 sm:$0xff]  }
  0x14   :  { %4955 = vmatprep.subr.bf16.mxu0 %v7375_v20  ;;  %5488 = vmatprep.subr.bf16.mxu1 %v7377_v21  ;;  %v851_v58 = vcombine.high %v843_v54, %v843_v54  ;;  %v7428_v1 = vld [vmem:[%s11225_s1 + $0x1a8] ss:$16 sps:$4 sm:$0xff]   ;;  %v7429_v2 = vld [vmem:[%s11225_s1 + $0x1c4] ss:$16 sps:$4 sm:$0xff]   ;;  %v7431_v3 = vld [vmem:[%s11225_s1 + $0x1cc] ss:$16 sps:$4 sm:$0xff]   ;;  %v8830_v13 = vrot.slane %v843_v54, %v8750_v49 }
  0x15   :  { %v7433_v4 = vld [vmem:[%s11225_s1 + $0x1c0] ss:$16 sps:$4 sm:$0xff]   ;;  %v7434_v5 = vld [vmem:[%s11225_s1 + $0x1c8] ss:$16 sps:$4 sm:$0xff]   ;;  %v7435_v6 = vld [vmem:[%s11225_s1 + $0x1e4] ss:$16 sps:$4 sm:$0xff]  }
  0x16   :  { %v873_v60 = vrot.slane %v851_v58, %v8750_v49  ;;  %v7437_v7 = vld [vmem:[%s11225_s1 + $0x1ec] ss:$16 sps:$4 sm:$0xff]   ;;  %v7439_v8 = vld [vmem:[%s11225_s1 + $0x1e0] ss:$16 sps:$4 sm:$0xff]   ;;  %v7440_v9 = vld [vmem:[%s11225_s1 + $0x1e8] ss:$16 sps:$4 sm:$0xff]  }
  0x17   :  { %4956 = vmatpush1.bf16.msra.mxu0 %v7379_v22  ;;  %5489 = vmatpush1.bf16.msra.mxu1 %v7380_v23  ;;  %v7443_v10 = vld [vmem:[%s11225_s1 + $0x204] ss:$16 sps:$4 sm:$0xff]   ;;  %v7446_v11 = vld [vmem:[%s11225_s1 + $0x20c] ss:$16 sps:$4 sm:$0xff]   ;;  %v7441_v12 = vld [vmem:[%s11225_s1 + $0x200] ss:$16 sps:$4 sm:$0xff]  }
  0x18   :  { %4957 = vmatprep.subr.bf16.mxu0 %v7381_v24  ;;  %5490 = vmatprep.subr.bf16.mxu1 %v7383_v25  ;;  %v7444_v14 = vld [vmem:[%s11225_s1 + $0x208] ss:$16 sps:$4 sm:$0xff]   ;;  %v7449_v15 = vld [vmem:[%s11225_s1 + $0x224] ss:$16 sps:$4 sm:$0xff]   ;;  %v7452_v16 = vld [vmem:[%s11225_s1 + $0x22c] ss:$16 sps:$4 sm:$0xff]   ;;  %v883_v17 = vcombine.high %v873_v60, %v873_v60 }
  0x19   :  { %4977 = vmatprep.mubr.bf16.mxu0 %v873_v60  ;;  %5510 = vmatprep.mubr.bf16.mxu1 %v873_v60  ;;  %v7447_v18 = vld [vmem:[%s11225_s1 + $0x220] ss:$16 sps:$4 sm:$0xff]   ;;  %v7450_v19 = vld [vmem:[%s11225_s1 + $0x228] ss:$16 sps:$4 sm:$0xff]   ;;  %v7455_v20 = vld [vmem:[%s11225_s1 + $0x244] ss:$16 sps:$4 sm:$0xff]  }
  0x1a   :  { %v7458_v21 = vld [vmem:[%s11225_s1 + $0x24c] ss:$16 sps:$4 sm:$0xff]   ;;  %v7453_v22 = vld [vmem:[%s11225_s1 + $0x240] ss:$16 sps:$4 sm:$0xff]   ;;  %v7456_v23 = vld [vmem:[%s11225_s1 + $0x248] ss:$16 sps:$4 sm:$0xff]  }
  0x1b   :  { %4958 = vmatpush1.bf16.msra.mxu0 %v7385_v26  ;;  %5491 = vmatpush1.bf16.msra.mxu1 %v7386_v27  ;;  %v7461_v24 = vld [vmem:[%s11225_s1 + $0x264] ss:$16 sps:$4 sm:$0xff]   ;;  %v7464_v25 = vld [vmem:[%s11225_s1 + $0x26c] ss:$16 sps:$4 sm:$0xff]   ;;  %v7459_v26 = vld [vmem:[%s11225_s1 + $0x260] ss:$16 sps:$4 sm:$0xff]  }
  0x1c   :  { %4959 = vmatprep.subr.bf16.mxu0 %v7387_v28  ;;  %5492 = vmatprep.subr.bf16.mxu1 %v7389_v29  ;;  %v7462_v27 = vld [vmem:[%s11225_s1 + $0x268] ss:$16 sps:$4 sm:$0xff]   ;;  %v7467_v28 = vld [vmem:[%s11225_s1 + $0x284] ss:$16 sps:$4 sm:$0xff]   ;;  %v7470_v29 = vld [vmem:[%s11225_s1 + $0x28c] ss:$16 sps:$4 sm:$0xff]  }
  0x1d   :  { %v7479_v36 = vld [vmem:[%s11225_s1 + $0x2c4] ss:$16 sps:$4 sm:$0xff]   ;;  %v7482_v37 = vld [vmem:[%s11225_s1 + $0x2cc] ss:$16 sps:$4 sm:$0xff]   ;;  %v7477_v38 = vld [vmem:[%s11225_s1 + $0x2c0] ss:$16 sps:$4 sm:$0xff]  }
  0x1e   :  { %v7483_v43 = vld [vmem:[%s11225_s1 + $0x2e0] ss:$16 sps:$4 sm:$0xff]   ;;  %v7498_v54 = vld [vmem:[%s11225_s1 + $0x328] ss:$16 sps:$4 sm:$0xff]   ;;  %v7512_v60 = vld [vmem:[%s11225_s1 + $0x36c] ss:$16 sps:$4 sm:$0xff]  }
  0x1f   :  { %4960 = vmatpush1.bf16.msra.mxu0 %v7391_v30  ;;  %5493 = vmatpush1.bf16.msra.mxu1 %v7392_v31  ;;  %v7465_v30 = vld [vmem:[%s11225_s1 + $0x280] ss:$16 sps:$4 sm:$0xff]   ;;  %v7468_v31 = vld [vmem:[%s11225_s1 + $0x288] ss:$16 sps:$4 sm:$0xff]  }
  0x20   :  { %4961 = vmatprep.subr.bf16.mxu0 %v7393_v32  ;;  %5494 = vmatprep.subr.bf16.mxu1 %v7395_v33  ;;  %v7473_v32 = vld [vmem:[%s11225_s1 + $0x2a4] ss:$16 sps:$4 sm:$0xff]   ;;  %v7476_v33 = vld [vmem:[%s11225_s1 + $0x2ac] ss:$16 sps:$4 sm:$0xff]   ;;  %v7504_v58 = vld [vmem:[%s11225_s1 + $0x348] ss:$16 sps:$4 sm:$0xff]  }
  0x23   :  { %4962 = vmatpush1.bf16.msra.mxu0 %v7397_v34  ;;  %5495 = vmatpush1.bf16.msra.mxu1 %v7398_v35  ;;  %v7471_v34 = vld [vmem:[%s11225_s1 + $0x2a0] ss:$16 sps:$4 sm:$0xff]   ;;  %v7474_v35 = vld [vmem:[%s11225_s1 + $0x2a8] ss:$16 sps:$4 sm:$0xff]  }
  0x24   :  { %4963 = vmatprep.subr.bf16.mxu0 %v7399_v39  ;;  %5496 = vmatprep.subr.bf16.mxu1 %v7401_v40  ;;  %v7480_v39 = vld [vmem:[%s11225_s1 + $0x2c8] ss:$16 sps:$4 sm:$0xff]   ;;  %v7485_v40 = vld [vmem:[%s11225_s1 + $0x2e4] ss:$16 sps:$4 sm:$0xff]  }
  0x27   :  { %4964 = vmatpush1.bf16.msra.mxu0 %v7403_v41  ;;  %5497 = vmatpush1.bf16.msra.mxu1 %v7404_v44  ;;  %v7488_v41 = vld [vmem:[%s11225_s1 + $0x2ec] ss:$16 sps:$4 sm:$0xff]   ;;  %v7486_v44 = vld [vmem:[%s11225_s1 + $0x2e8] ss:$16 sps:$4 sm:$0xff]  }
  0x28   :  { %4965 = vmatprep.subr.bf16.mxu0 %v7405_v45  ;;  %5498 = vmatprep.subr.bf16.mxu1 %v7407_v46  ;;  %v7491_v45 = vld [vmem:[%s11225_s1 + $0x304] ss:$16 sps:$4 sm:$0xff]   ;;  %v7494_v46 = vld [vmem:[%s11225_s1 + $0x30c] ss:$16 sps:$4 sm:$0xff]  }
  0x2b   :  { %4966 = vmatpush1.bf16.msra.mxu0 %v7409_v47  ;;  %5499 = vmatpush1.bf16.msra.mxu1 %v7410_v48  ;;  %v7489_v47 = vld [vmem:[%s11225_s1 + $0x300] ss:$16 sps:$4 sm:$0xff]   ;;  %v7492_v48 = vld [vmem:[%s11225_s1 + $0x308] ss:$16 sps:$4 sm:$0xff]  }
  0x2c   :  { %4967 = vmatprep.subr.bf16.mxu0 %v7411_v50  ;;  %5500 = vmatprep.subr.bf16.mxu1 %v7413_v51  ;;  %v7497_v50 = vld [vmem:[%s11225_s1 + $0x324] ss:$16 sps:$4 sm:$0xff]   ;;  %v7500_v51 = vld [vmem:[%s11225_s1 + $0x32c] ss:$16 sps:$4 sm:$0xff]  }
  0x2f   :  { %4968 = vmatpush1.bf16.msra.mxu0 %v7415_v53  ;;  %5501 = vmatpush1.bf16.msra.mxu1 %v7416_v55  ;;  %v7495_v53 = vld [vmem:[%s11225_s1 + $0x320] ss:$16 sps:$4 sm:$0xff]   ;;  %v7503_v55 = vld [vmem:[%s11225_s1 + $0x344] ss:$16 sps:$4 sm:$0xff]  }
  0x30   :  { %4969 = vmatprep.subr.bf16.mxu0 %v7417_v56  ;;  %5502 = vmatprep.subr.bf16.mxu1 %v7419_v57  ;;  %v7506_v56 = vld [vmem:[%s11225_s1 + $0x34c] ss:$16 sps:$4 sm:$0xff]   ;;  %v7501_v57 = vld [vmem:[%s11225_s1 + $0x340] ss:$16 sps:$4 sm:$0xff]  }
  0x33   :  { %4970 = vmatpush1.bf16.msra.mxu0 %v7421_v59  ;;  %5503 = vmatpush1.bf16.msra.mxu1 %v7422_v61  ;;  %v7509_v59 = vld [vmem:[%s11225_s1 + $0x364] ss:$16 sps:$4 sm:$0xff]   ;;  %v7507_v61 = vld [vmem:[%s11225_s1 + $0x360] ss:$16 sps:$4 sm:$0xff]  }
  0x34   :  { %4971 = vmatprep.subr.bf16.mxu0 %v7423_v62  ;;  %5504 = vmatprep.subr.bf16.mxu1 %v7425_v63  ;;  %v7510_v62 = vld [vmem:[%s11225_s1 + $0x368] ss:$16 sps:$4 sm:$0xff]   ;;  %v7515_v63 = vld [vmem:[%s11225_s1 + $0x384] ss:$16 sps:$4 sm:$0xff]  }
  0x37   :  { %4972 = vmatpush1.bf16.msra.mxu0 %v7427_v0  ;;  %5505 = vmatpush1.bf16.msra.mxu1 %v7428_v1  ;;  %v7518_v0 = vld [vmem:[%s11225_s1 + $0x38c] ss:$16 sps:$4 sm:$0xff]   ;;  %v7513_v1 = vld [vmem:[%s11225_s1 + $0x380] ss:$16 sps:$4 sm:$0xff]  }
  0x38   :  { %4973 = vmatprep.subr.bf16.mxu0 %v7429_v2  ;;  %5506 = vmatprep.subr.bf16.mxu1 %v7431_v3  ;;  %v7516_v2 = vld [vmem:[%s11225_s1 + $0x388] ss:$16 sps:$4 sm:$0xff]   ;;  %v7521_v3 = vld [vmem:[%s11225_s1 + $0x3a4] ss:$16 sps:$4 sm:$0xff]  }
  0x3b   :  { %4974 = vmatpush1.bf16.msra.mxu0 %v7433_v4  ;;  %5507 = vmatpush1.bf16.msra.mxu1 %v7434_v5  ;;  %v7524_v4 = vld [vmem:[%s11225_s1 + $0x3ac] ss:$16 sps:$4 sm:$0xff]   ;;  %v7519_v5 = vld [vmem:[%s11225_s1 + $0x3a0] ss:$16 sps:$4 sm:$0xff]  }
  0x3c   :  { %4975 = vmatprep.subr.bf16.mxu0 %v7435_v6  ;;  %5508 = vmatprep.subr.bf16.mxu1 %v7437_v7  ;;  %v7522_v6 = vld [vmem:[%s11225_s1 + $0x3a8] ss:$16 sps:$4 sm:$0xff]   ;;  %v7527_v7 = vld [vmem:[%s11225_s1 + $0x3c4] ss:$16 sps:$4 sm:$0xff]  }
  0x3f   :  { %4976 = vmatpush1.bf16.msra.mxu0 %v7439_v8  ;;  %5509 = vmatpush1.bf16.msra.mxu1 %v7440_v9  ;;  %v7530_v8 = vld [vmem:[%s11225_s1 + $0x3cc] ss:$16 sps:$4 sm:$0xff]   ;;  %v836_v9 = vcombine.high %v8761_v52, %v8761_v52 }
  0x40   :  { %4986 = vmatprep.subr.bf16.mxu0 %v7443_v10  ;;  %5519 = vmatprep.subr.bf16.mxu1 %v7446_v11  ;;  %v7525_v10 = vld [vmem:[%s11225_s1 + $0x3c0] ss:$16 sps:$4 sm:$0xff]   ;;  %v7528_v11 = vld [vmem:[%s11225_s1 + $0x3c8] ss:$16 sps:$4 sm:$0xff]   ;;  %v7536_v52 = vld [vmem:[%s11225_s1 + $0x3ec] ss:$16 sps:$4 sm:$0xff]  }
  0x42   :  { %4978 = vmatmul.mubr.bf16.vlgmr.msra.gmra.mrb[0].mxu0 %v8830_v13  ;;  %5511 = vmatmul.mubr.bf16.vlgmr.msra.gmra.mrb[0].mxu1 %v8830_v13 }
  0x43   :  { %4987 = vmatpush1.bf16.msra.mxu0 %v7441_v12  ;;  %5520 = vmatpush1.bf16.msra.mxu1 %v7444_v14  ;;  %v7533_v12 = vld [vmem:[%s11225_s1 + $0x3e4] ss:$16 sps:$4 sm:$0xff]   ;;  %v9014_v14 = vrot.slane %v836_v9, %v8750_v49  ;;  %v7612_v9 = vld [vmem:[%s11225_s1 + $0x588] ss:$16 sps:$4 sm:$0xff]  }
  0x44   :  { %4988 = vmatprep.subr.bf16.mxu0 %v7449_v15  ;;  %5521 = vmatprep.subr.bf16.mxu1 %v7452_v16  ;;  %v7531_v15 = vld [vmem:[%s11225_s1 + $0x3e0] ss:$16 sps:$4 sm:$0xff]   ;;  %v7534_v16 = vld [vmem:[%s11225_s1 + $0x3e8] ss:$16 sps:$4 sm:$0xff]  }
  0x45   :  { %5018 = vmatprep.mubr.bf16.mxu0 %v883_v17  ;;  %5551 = vmatprep.mubr.bf16.mxu1 %v883_v17  ;;  %v7539_v17 = vld [vmem:[%s11225_s1 + $0x404] ss:$16 sps:$4 sm:$0xff]  }
  0x47   :  { %4989 = vmatpush1.bf16.msra.mxu0 %v7447_v18  ;;  %5522 = vmatpush1.bf16.msra.mxu1 %v7450_v19  ;;  %v7542_v18 = vld [vmem:[%s11225_s1 + $0x40c] ss:$16 sps:$4 sm:$0xff]   ;;  %v852_v19 = vcombine.high %v9014_v14, %v9014_v14 }
  0x48   :  { %4990 = vmatprep.subr.bf16.mxu0 %v7455_v20  ;;  %5523 = vmatprep.subr.bf16.mxu1 %v7458_v21  ;;  %v7537_v20 = vld [vmem:[%s11225_s1 + $0x400] ss:$16 sps:$4 sm:$0xff]   ;;  %v881_v21 = vcombine.high %v8830_v13, %v8830_v13 }
  0x49   :  { %v7543_v13 = vld [vmem:[%s11225_s1 + $0x420] ss:$16 sps:$4 sm:$0xff]  }
  0x4b   :  { %4991 = vmatpush1.bf16.msra.mxu0 %v7453_v22  ;;  %5524 = vmatpush1.bf16.msra.mxu1 %v7456_v23  ;;  %v7540_v22 = vld [vmem:[%s11225_s1 + $0x408] ss:$16 sps:$4 sm:$0xff]   ;;  %v7545_v23 = vld [vmem:[%s11225_s1 + $0x424] ss:$16 sps:$4 sm:$0xff]  }
  0x4c   :  { %4992 = vmatprep.subr.bf16.mxu0 %v7461_v24  ;;  %5525 = vmatprep.subr.bf16.mxu1 %v7464_v25  ;;  %v7548_v24 = vld [vmem:[%s11225_s1 + $0x42c] ss:$16 sps:$4 sm:$0xff]   ;;  %v9045_v25 = vrot.slane %v852_v19, %v8750_v49  ;;  %v7629_v19 = vld [vmem:[%s11225_s1 + $0x5e4] ss:$16 sps:$4 sm:$0xff]  }
  0x4f   :  { %4993 = vmatpush1.bf16.msra.mxu0 %v7459_v26  ;;  %5526 = vmatpush1.bf16.msra.mxu1 %v7462_v27  ;;  %v7546_v26 = vld [vmem:[%s11225_s1 + $0x428] ss:$16 sps:$4 sm:$0xff]   ;;  %v7551_v27 = vld [vmem:[%s11225_s1 + $0x444] ss:$16 sps:$4 sm:$0xff]  }
  0x50   :  { %4994 = vmatprep.subr.bf16.mxu0 %v7467_v28  ;;  %5527 = vmatprep.subr.bf16.mxu1 %v7470_v29  ;;  %v7554_v28 = vld [vmem:[%s11225_s1 + $0x44c] ss:$16 sps:$4 sm:$0xff]   ;;  %v7549_v29 = vld [vmem:[%s11225_s1 + $0x440] ss:$16 sps:$4 sm:$0xff]  }
  0x53   :  { %4995 = vmatpush1.bf16.msra.mxu0 %v7465_v30  ;;  %5528 = vmatpush1.bf16.msra.mxu1 %v7468_v31  ;;  %v7552_v30 = vld [vmem:[%s11225_s1 + $0x448] ss:$16 sps:$4 sm:$0xff]   ;;  %v7557_v31 = vld [vmem:[%s11225_s1 + $0x464] ss:$16 sps:$4 sm:$0xff]  }
  0x54   :  { %4996 = vmatprep.subr.bf16.mxu0 %v7473_v32  ;;  %5529 = vmatprep.subr.bf16.mxu1 %v7476_v33  ;;  %v7560_v32 = vld [vmem:[%s11225_s1 + $0x46c] ss:$16 sps:$4 sm:$0xff]   ;;  %v7555_v33 = vld [vmem:[%s11225_s1 + $0x460] ss:$16 sps:$4 sm:$0xff]  }
  0x57   :  { %4997 = vmatpush1.bf16.msra.mxu0 %v7471_v34  ;;  %5530 = vmatpush1.bf16.msra.mxu1 %v7474_v35  ;;  %v7558_v34 = vld [vmem:[%s11225_s1 + $0x468] ss:$16 sps:$4 sm:$0xff]   ;;  %v7563_v35 = vld [vmem:[%s11225_s1 + $0x484] ss:$16 sps:$4 sm:$0xff]  }
  0x58   :  { %4998 = vmatprep.subr.bf16.mxu0 %v7479_v36  ;;  %5531 = vmatprep.subr.bf16.mxu1 %v7482_v37  ;;  %v7566_v36 = vld [vmem:[%s11225_s1 + $0x48c] ss:$16 sps:$4 sm:$0xff]   ;;  %v7561_v37 = vld [vmem:[%s11225_s1 + $0x480] ss:$16 sps:$4 sm:$0xff]  }
  0x5b   :  { %4999 = vmatpush1.bf16.msra.mxu0 %v7477_v38  ;;  %5532 = vmatpush1.bf16.msra.mxu1 %v7480_v39  ;;  %v7564_v38 = vld [vmem:[%s11225_s1 + $0x488] ss:$16 sps:$4 sm:$0xff]   ;;  %v7569_v39 = vld [vmem:[%s11225_s1 + $0x4a4] ss:$16 sps:$4 sm:$0xff]  }
  0x5c   :  { %5000 = vmatprep.subr.bf16.mxu0 %v7485_v40  ;;  %5533 = vmatprep.subr.bf16.mxu1 %v7488_v41  ;;  %v7572_v40 = vld [vmem:[%s11225_s1 + $0x4ac] ss:$16 sps:$4 sm:$0xff]   ;;  %v7567_v41 = vld [vmem:[%s11225_s1 + $0x4a0] ss:$16 sps:$4 sm:$0xff]  }
  0x5f   :  { %5001 = vmatpush1.bf16.msra.mxu0 %v7483_v43  ;;  %5534 = vmatpush1.bf16.msra.mxu1 %v7486_v44  ;;  %v7570_v43 = vld [vmem:[%s11225_s1 + $0x4a8] ss:$16 sps:$4 sm:$0xff]   ;;  %v7575_v44 = vld [vmem:[%s11225_s1 + $0x4c4] ss:$16 sps:$4 sm:$0xff]  }
  0x60   :  { %5002 = vmatprep.subr.bf16.mxu0 %v7491_v45  ;;  %5535 = vmatprep.subr.bf16.mxu1 %v7494_v46  ;;  %v7578_v45 = vld [vmem:[%s11225_s1 + $0x4cc] ss:$16 sps:$4 sm:$0xff]   ;;  %v7573_v46 = vld [vmem:[%s11225_s1 + $0x4c0] ss:$16 sps:$4 sm:$0xff]  }
  0x63   :  { %5003 = vmatpush1.bf16.msra.mxu0 %v7489_v47  ;;  %5536 = vmatpush1.bf16.msra.mxu1 %v7492_v48  ;;  %v7576_v47 = vld [vmem:[%s11225_s1 + $0x4c8] ss:$16 sps:$4 sm:$0xff]   ;;  %v7581_v48 = vld [vmem:[%s11225_s1 + $0x4e4] ss:$16 sps:$4 sm:$0xff]  }
  0x64   :  { %5004 = vmatprep.subr.bf16.mxu0 %v7497_v50  ;;  %5537 = vmatprep.subr.bf16.mxu1 %v7500_v51  ;;  %v7584_v50 = vld [vmem:[%s11225_s1 + $0x4ec] ss:$16 sps:$4 sm:$0xff]   ;;  %v7579_v51 = vld [vmem:[%s11225_s1 + $0x4e0] ss:$16 sps:$4 sm:$0xff]  }
  0x67   :  { %5005 = vmatpush1.bf16.msra.mxu0 %v7495_v53  ;;  %5538 = vmatpush1.bf16.msra.mxu1 %v7498_v54  ;;  %v7582_v53 = vld [vmem:[%s11225_s1 + $0x4e8] ss:$16 sps:$4 sm:$0xff]   ;;  %v7587_v54 = vld [vmem:[%s11225_s1 + $0x504] ss:$16 sps:$4 sm:$0xff]  }
  0x68   :  { %5006 = vmatprep.subr.bf16.mxu0 %v7503_v55  ;;  %5539 = vmatprep.subr.bf16.mxu1 %v7506_v56  ;;  %v7590_v55 = vld [vmem:[%s11225_s1 + $0x50c] ss:$16 sps:$4 sm:$0xff]   ;;  %v7585_v56 = vld [vmem:[%s11225_s1 + $0x500] ss:$16 sps:$4 sm:$0xff]  }
  0x6b   :  { %5007 = vmatpush1.bf16.msra.mxu0 %v7501_v57  ;;  %5540 = vmatpush1.bf16.msra.mxu1 %v7504_v58  ;;  %v7588_v57 = vld [vmem:[%s11225_s1 + $0x508] ss:$16 sps:$4 sm:$0xff]   ;;  %v7593_v58 = vld [vmem:[%s11225_s1 + $0x524] ss:$16 sps:$4 sm:$0xff]  }
  0x6c   :  { %5008 = vmatprep.subr.bf16.mxu0 %v7509_v59  ;;  %5541 = vmatprep.subr.bf16.mxu1 %v7512_v60  ;;  %v7596_v59 = vld [vmem:[%s11225_s1 + $0x52c] ss:$16 sps:$4 sm:$0xff]   ;;  %v7591_v60 = vld [vmem:[%s11225_s1 + $0x520] ss:$16 sps:$4 sm:$0xff]  }
  0x6f   :  { %5009 = vmatpush1.bf16.msra.mxu0 %v7507_v61  ;;  %5542 = vmatpush1.bf16.msra.mxu1 %v7510_v62  ;;  %v7594_v61 = vld [vmem:[%s11225_s1 + $0x528] ss:$16 sps:$4 sm:$0xff]   ;;  %v7599_v62 = vld [vmem:[%s11225_s1 + $0x544] ss:$16 sps:$4 sm:$0xff]  }
  0x70   :  { %5010 = vmatprep.subr.bf16.mxu0 %v7515_v63  ;;  %5543 = vmatprep.subr.bf16.mxu1 %v7518_v0  ;;  %v7602_v63 = vld [vmem:[%s11225_s1 + $0x54c] ss:$16 sps:$4 sm:$0xff]   ;;  %v7597_v0 = vld [vmem:[%s11225_s1 + $0x540] ss:$16 sps:$4 sm:$0xff]  }
  0x73   :  { %5011 = vmatpush1.bf16.msra.mxu0 %v7513_v1  ;;  %5544 = vmatpush1.bf16.msra.mxu1 %v7516_v2  ;;  %v7600_v1 = vld [vmem:[%s11225_s1 + $0x548] ss:$16 sps:$4 sm:$0xff]   ;;  %v7605_v2 = vld [vmem:[%s11225_s1 + $0x564] ss:$16 sps:$4 sm:$0xff]  }
  0x74   :  { %5012 = vmatprep.subr.bf16.mxu0 %v7521_v3  ;;  %5545 = vmatprep.subr.bf16.mxu1 %v7524_v4  ;;  %v7608_v3 = vld [vmem:[%s11225_s1 + $0x56c] ss:$16 sps:$4 sm:$0xff]   ;;  %v7603_v4 = vld [vmem:[%s11225_s1 + $0x560] ss:$16 sps:$4 sm:$0xff]  }
  0x77   :  { %5013 = vmatpush1.bf16.msra.mxu0 %v7519_v5  ;;  %5546 = vmatpush1.bf16.msra.mxu1 %v7522_v6  ;;  %v7606_v5 = vld [vmem:[%s11225_s1 + $0x568] ss:$16 sps:$4 sm:$0xff]   ;;  %v7611_v6 = vld [vmem:[%s11225_s1 + $0x584] ss:$16 sps:$4 sm:$0xff]  }
  0x78   :  { %5014 = vmatprep.subr.bf16.mxu0 %v7527_v7  ;;  %5547 = vmatprep.subr.bf16.mxu1 %v7530_v8  ;;  %v7614_v7 = vld [vmem:[%s11225_s1 + $0x58c] ss:$16 sps:$4 sm:$0xff]   ;;  %v7609_v8 = vld [vmem:[%s11225_s1 + $0x580] ss:$16 sps:$4 sm:$0xff]  }
  0x7b   :  { %5015 = vmatpush1.bf16.msra.mxu0 %v7525_v10  ;;  %5548 = vmatpush1.bf16.msra.mxu1 %v7528_v11  ;;  %v7617_v10 = vld [vmem:[%s11225_s1 + $0x5a4] ss:$16 sps:$4 sm:$0xff]   ;;  %v7620_v11 = vld [vmem:[%s11225_s1 + $0x5ac] ss:$16 sps:$4 sm:$0xff]  }
  0x7c   :  { %5016 = vmatprep.subr.bf16.mxu0 %v7533_v12  ;;  %5549 = vmatprep.subr.bf16.mxu1 %v7536_v52  ;;  %v7615_v12 = vld [vmem:[%s11225_s1 + $0x5a0] ss:$16 sps:$4 sm:$0xff]   ;;  %v7618_v52 = vld [vmem:[%s11225_s1 + $0x5a8] ss:$16 sps:$4 sm:$0xff]  }
  0x7f   :  { %5017 = vmatpush1.bf16.msra.mxu0 %v7531_v15  ;;  %5550 = vmatpush1.bf16.msra.mxu1 %v7534_v16  ;;  %v7623_v15 = vld [vmem:[%s11225_s1 + $0x5c4] ss:$16 sps:$4 sm:$0xff]   ;;  %v7626_v16 = vld [vmem:[%s11225_s1 + $0x5cc] ss:$16 sps:$4 sm:$0xff]  }
  0x80   :  { %5027 = vmatprep.subr.bf16.mxu0 %v7539_v17  ;;  %5560 = vmatprep.subr.bf16.mxu1 %v7542_v18  ;;  %v7621_v17 = vld [vmem:[%s11225_s1 + $0x5c0] ss:$16 sps:$4 sm:$0xff]   ;;  %v7624_v18 = vld [vmem:[%s11225_s1 + $0x5c8] ss:$16 sps:$4 sm:$0xff]  }
  0x82   :  { %5019 = vmatmul.mubr.bf16.vlgmr.msra.gmra.mrb[0].mxu0 %v881_v21  ;;  %5552 = vmatmul.mubr.bf16.vlgmr.msra.gmra.mrb[0].mxu1 %v881_v21  ;;  %v7627_v21 = vld [vmem:[%s11225_s1 + $0x5e0] ss:$16 sps:$4 sm:$0xff]  }
  0x83   :  { %5028 = vmatpush1.bf16.msra.mxu0 %v7537_v20  ;;  %5561 = vmatpush1.bf16.msra.mxu1 %v7540_v22  ;;  %v7632_v20 = vld [vmem:[%s11225_s1 + $0x5ec] ss:$16 sps:$4 sm:$0xff]   ;;  %v7630_v22 = vld [vmem:[%s11225_s1 + $0x5e8] ss:$16 sps:$4 sm:$0xff]  }
  0x84   :  { %5029 = vmatprep.subr.bf16.mxu0 %v7545_v23  ;;  %5562 = vmatprep.subr.bf16.mxu1 %v7548_v24  ;;  %v7636_v23 = vld [vmem:[%s11225_s1 + $0x604] ss:$16 sps:$4 sm:$0xff]   ;;  %v7639_v24 = vld [vmem:[%s11225_s1 + $0x60c] ss:$16 sps:$4 sm:$0xff]  }
  0x85   :  { %5059 = vmatprep.mubr.bf16.mxu0 %v9045_v25  ;;  %5592 = vmatprep.mubr.bf16.mxu1 %v9045_v25 }
  0x87   :  { %5030 = vmatpush1.bf16.msra.mxu0 %v7543_v13  ;;  %5563 = vmatpush1.bf16.msra.mxu1 %v7546_v26  ;;  %v7634_v13 = vld [vmem:[%s11225_s1 + $0x600] ss:$16 sps:$4 sm:$0xff]   ;;  %v9234_v26 = vrot.slane %v9014_v14, %v8750_v49  ;;  %v884_v14 = vcombine.high %v9045_v25, %v9045_v25  ;;  %v7648_v25 = vld [vmem:[%s11225_s1 + $0x644] ss:$16 sps:$4 sm:$0xff]  }
  0x88   :  { %5031 = vmatprep.subr.bf16.mxu0 %v7551_v27  ;;  %5564 = vmatprep.subr.bf16.mxu1 %v7554_v28  ;;  %v7637_v27 = vld [vmem:[%s11225_s1 + $0x608] ss:$16 sps:$4 sm:$0xff]   ;;  %v7642_v28 = vld [vmem:[%s11225_s1 + $0x624] ss:$16 sps:$4 sm:$0xff]  }
  0x8b   :  { %5032 = vmatpush1.bf16.msra.mxu0 %v7549_v29  ;;  %5565 = vmatpush1.bf16.msra.mxu1 %v7552_v30  ;;  %v7645_v29 = vld [vmem:[%s11225_s1 + $0x62c] ss:$16 sps:$4 sm:$0xff]   ;;  %v7640_v30 = vld [vmem:[%s11225_s1 + $0x620] ss:$16 sps:$4 sm:$0xff]  }
  0x8c   :  { %5033 = vmatprep.subr.bf16.mxu0 %v7557_v31  ;;  %5566 = vmatprep.subr.bf16.mxu1 %v7560_v32  ;;  %v7643_v31 = vld [vmem:[%s11225_s1 + $0x628] ss:$16 sps:$4 sm:$0xff]   ;;  %v7651_v32 = vld [vmem:[%s11225_s1 + $0x64c] ss:$16 sps:$4 sm:$0xff]  }
  0x8f   :  { %5034 = vmatpush1.bf16.msra.mxu0 %v7555_v33  ;;  %5567 = vmatpush1.bf16.msra.mxu1 %v7558_v34  ;;  %v7646_v33 = vld [vmem:[%s11225_s1 + $0x640] ss:$16 sps:$4 sm:$0xff]   ;;  %v7649_v34 = vld [vmem:[%s11225_s1 + $0x648] ss:$16 sps:$4 sm:$0xff]  }
  0x90   :  { %5035 = vmatprep.subr.bf16.mxu0 %v7563_v35  ;;  %5568 = vmatprep.subr.bf16.mxu1 %v7566_v36  ;;  %v7654_v35 = vld [vmem:[%s11225_s1 + $0x664] ss:$16 sps:$4 sm:$0xff]   ;;  %v7657_v36 = vld [vmem:[%s11225_s1 + $0x66c] ss:$16 sps:$4 sm:$0xff]  }
  0x93   :  { %5036 = vmatpush1.bf16.msra.mxu0 %v7561_v37  ;;  %5569 = vmatpush1.bf16.msra.mxu1 %v7564_v38  ;;  %v7652_v37 = vld [vmem:[%s11225_s1 + $0x660] ss:$16 sps:$4 sm:$0xff]   ;;  %v7655_v38 = vld [vmem:[%s11225_s1 + $0x668] ss:$16 sps:$4 sm:$0xff]  }
  0x94   :  { %5037 = vmatprep.subr.bf16.mxu0 %v7569_v39  ;;  %5570 = vmatprep.subr.bf16.mxu1 %v7572_v40  ;;  %v7660_v39 = vld [vmem:[%s11225_s1 + $0x684] ss:$16 sps:$4 sm:$0xff]   ;;  %v7663_v40 = vld [vmem:[%s11225_s1 + $0x68c] ss:$16 sps:$4 sm:$0xff]  }
  0x97   :  { %5038 = vmatpush1.bf16.msra.mxu0 %v7567_v41  ;;  %5571 = vmatpush1.bf16.msra.mxu1 %v7570_v43  ;;  %v7658_v41 = vld [vmem:[%s11225_s1 + $0x680] ss:$16 sps:$4 sm:$0xff]   ;;  %v7661_v43 = vld [vmem:[%s11225_s1 + $0x688] ss:$16 sps:$4 sm:$0xff]  }
  0x98   :  { %5039 = vmatprep.subr.bf16.mxu0 %v7575_v44  ;;  %5572 = vmatprep.subr.bf16.mxu1 %v7578_v45  ;;  %v7666_v44 = vld [vmem:[%s11225_s1 + $0x6a4] ss:$16 sps:$4 sm:$0xff]   ;;  %v7669_v45 = vld [vmem:[%s11225_s1 + $0x6ac] ss:$16 sps:$4 sm:$0xff]  }
  0x9b   :  { %5040 = vmatpush1.bf16.msra.mxu0 %v7573_v46  ;;  %5573 = vmatpush1.bf16.msra.mxu1 %v7576_v47  ;;  %v7664_v46 = vld [vmem:[%s11225_s1 + $0x6a0] ss:$16 sps:$4 sm:$0xff]   ;;  %v7667_v47 = vld [vmem:[%s11225_s1 + $0x6a8] ss:$16 sps:$4 sm:$0xff]  }
  0x9c   :  { %5041 = vmatprep.subr.bf16.mxu0 %v7581_v48  ;;  %5574 = vmatprep.subr.bf16.mxu1 %v7584_v50  ;;  %v7672_v48 = vld [vmem:[%s11225_s1 + $0x6c4] ss:$16 sps:$4 sm:$0xff]   ;;  %v7675_v50 = vld [vmem:[%s11225_s1 + $0x6cc] ss:$16 sps:$4 sm:$0xff]  }
  0x9f   :  { %5042 = vmatpush1.bf16.msra.mxu0 %v7579_v51  ;;  %5575 = vmatpush1.bf16.msra.mxu1 %v7582_v53  ;;  %v7670_v51 = vld [vmem:[%s11225_s1 + $0x6c0] ss:$16 sps:$4 sm:$0xff]   ;;  %v7673_v53 = vld [vmem:[%s11225_s1 + $0x6c8] ss:$16 sps:$4 sm:$0xff]  }
  0xa0   :  { %5043 = vmatprep.subr.bf16.mxu0 %v7587_v54  ;;  %5576 = vmatprep.subr.bf16.mxu1 %v7590_v55  ;;  %v7678_v54 = vld [vmem:[%s11225_s1 + $0x6e4] ss:$16 sps:$4 sm:$0xff]   ;;  %v7681_v55 = vld [vmem:[%s11225_s1 + $0x6ec] ss:$16 sps:$4 sm:$0xff]  }
  0xa3   :  { %5044 = vmatpush1.bf16.msra.mxu0 %v7585_v56  ;;  %5577 = vmatpush1.bf16.msra.mxu1 %v7588_v57  ;;  %v7676_v56 = vld [vmem:[%s11225_s1 + $0x6e0] ss:$16 sps:$4 sm:$0xff]   ;;  %v7679_v57 = vld [vmem:[%s11225_s1 + $0x6e8] ss:$16 sps:$4 sm:$0xff]  }
  0xa4   :  { %5045 = vmatprep.subr.bf16.mxu0 %v7593_v58  ;;  %5578 = vmatprep.subr.bf16.mxu1 %v7596_v59  ;;  %v7684_v58 = vld [vmem:[%s11225_s1 + $0x704] ss:$16 sps:$4 sm:$0xff]   ;;  %v7687_v59 = vld [vmem:[%s11225_s1 + $0x70c] ss:$16 sps:$4 sm:$0xff]  }
  0xa7   :  { %5046 = vmatpush1.bf16.msra.mxu0 %v7591_v60  ;;  %5579 = vmatpush1.bf16.msra.mxu1 %v7594_v61  ;;  %v7682_v60 = vld [vmem:[%s11225_s1 + $0x700] ss:$16 sps:$4 sm:$0xff]   ;;  %v7685_v61 = vld [vmem:[%s11225_s1 + $0x708] ss:$16 sps:$4 sm:$0xff]  }
  0xa8   :  { %5047 = vmatprep.subr.bf16.mxu0 %v7599_v62  ;;  %5580 = vmatprep.subr.bf16.mxu1 %v7602_v63  ;;  %v7690_v62 = vld [vmem:[%s11225_s1 + $0x724] ss:$16 sps:$4 sm:$0xff]   ;;  %v7693_v63 = vld [vmem:[%s11225_s1 + $0x72c] ss:$16 sps:$4 sm:$0xff]  }
  0xab   :  { %5048 = vmatpush1.bf16.msra.mxu0 %v7597_v0  ;;  %5581 = vmatpush1.bf16.msra.mxu1 %v7600_v1  ;;  %v7688_v0 = vld [vmem:[%s11225_s1 + $0x720] ss:$16 sps:$4 sm:$0xff]   ;;  %v7691_v1 = vld [vmem:[%s11225_s1 + $0x728] ss:$16 sps:$4 sm:$0xff]  }
  0xac   :  { %5049 = vmatprep.subr.bf16.mxu0 %v7605_v2  ;;  %5582 = vmatprep.subr.bf16.mxu1 %v7608_v3  ;;  %v7696_v2 = vld [vmem:[%s11225_s1 + $0x744] ss:$16 sps:$4 sm:$0xff]   ;;  %v7699_v3 = vld [vmem:[%s11225_s1 + $0x74c] ss:$16 sps:$4 sm:$0xff]  }
  0xaf   :  { %5050 = vmatpush1.bf16.msra.mxu0 %v7603_v4  ;;  %5583 = vmatpush1.bf16.msra.mxu1 %v7606_v5  ;;  %v7694_v4 = vld [vmem:[%s11225_s1 + $0x740] ss:$16 sps:$4 sm:$0xff]   ;;  %v7697_v5 = vld [vmem:[%s11225_s1 + $0x748] ss:$16 sps:$4 sm:$0xff]  }
  0xb0   :  { %5051 = vmatprep.subr.bf16.mxu0 %v7611_v6  ;;  %5584 = vmatprep.subr.bf16.mxu1 %v7614_v7  ;;  %v7702_v6 = vld [vmem:[%s11225_s1 + $0x764] ss:$16 sps:$4 sm:$0xff]   ;;  %v7705_v7 = vld [vmem:[%s11225_s1 + $0x76c] ss:$16 sps:$4 sm:$0xff]  }
  0xb3   :  { %5052 = vmatpush1.bf16.msra.mxu0 %v7609_v8  ;;  %5585 = vmatpush1.bf16.msra.mxu1 %v7612_v9  ;;  %v7700_v8 = vld [vmem:[%s11225_s1 + $0x760] ss:$16 sps:$4 sm:$0xff]   ;;  %v7703_v9 = vld [vmem:[%s11225_s1 + $0x768] ss:$16 sps:$4 sm:$0xff]  }
  0xb4   :  { %5053 = vmatprep.subr.bf16.mxu0 %v7617_v10  ;;  %5586 = vmatprep.subr.bf16.mxu1 %v7620_v11  ;;  %v7708_v10 = vld [vmem:[%s11225_s1 + $0x784] ss:$16 sps:$4 sm:$0xff]   ;;  %v7711_v11 = vld [vmem:[%s11225_s1 + $0x78c] ss:$16 sps:$4 sm:$0xff]  }
  0xb7   :  { %5054 = vmatpush1.bf16.msra.mxu0 %v7615_v12  ;;  %5587 = vmatpush1.bf16.msra.mxu1 %v7618_v52  ;;  %v7706_v12 = vld [vmem:[%s11225_s1 + $0x780] ss:$16 sps:$4 sm:$0xff]   ;;  %v7709_v52 = vld [vmem:[%s11225_s1 + $0x788] ss:$16 sps:$4 sm:$0xff]  }
  0xb8   :  { %5055 = vmatprep.subr.bf16.mxu0 %v7623_v15  ;;  %5588 = vmatprep.subr.bf16.mxu1 %v7626_v16  ;;  %v7714_v15 = vld [vmem:[%s11225_s1 + $0x7a4] ss:$16 sps:$4 sm:$0xff]   ;;  %v7717_v16 = vld [vmem:[%s11225_s1 + $0x7ac] ss:$16 sps:$4 sm:$0xff]  }
  0xbb   :  { %5056 = vmatpush1.bf16.msra.mxu0 %v7621_v17  ;;  %5589 = vmatpush1.bf16.msra.mxu1 %v7624_v18  ;;  %v7712_v17 = vld [vmem:[%s11225_s1 + $0x7a0] ss:$16 sps:$4 sm:$0xff]   ;;  %v7715_v18 = vld [vmem:[%s11225_s1 + $0x7a8] ss:$16 sps:$4 sm:$0xff]  }
  0xbc   :  { %5057 = vmatprep.subr.bf16.mxu0 %v7629_v19  ;;  %5590 = vmatprep.subr.bf16.mxu1 %v7632_v20  ;;  %v7720_v19 = vld [vmem:[%s11225_s1 + $0x7c4] ss:$16 sps:$4 sm:$0xff]   ;;  %v7723_v20 = vld [vmem:[%s11225_s1 + $0x7cc] ss:$16 sps:$4 sm:$0xff]  }
  0xbf   :  { %5058 = vmatpush1.bf16.msra.mxu0 %v7627_v21  ;;  %5591 = vmatpush1.bf16.msra.mxu1 %v7630_v22  ;;  %v9408_v21 = vld.sshfl [vmem:[%s11224_s0 + $0x8] sm:$0xff pattern:$0x75316420]  ;;  %v7718_v22 = vld [vmem:[%s11225_s1 + $0x7c0] ss:$16 sps:$4 sm:$0xff]  }
  0xc0   :  { %5068 = vmatprep.subr.bf16.mxu0 %v7636_v23  ;;  %5601 = vmatprep.subr.bf16.mxu1 %v7639_v24  ;;  %v7721_v23 = vld [vmem:[%s11225_s1 + $0x7c8] ss:$16 sps:$4 sm:$0xff]   ;;  %v7726_v24 = vld [vmem:[%s11225_s1 + $0x7e4] ss:$16 sps:$4 sm:$0xff]  }
  0xc2   :  { %5060 = vmatmul.mubr.bf16.vlgmr.msra.gmra.mrb[0].mxu0 %v9234_v26  ;;  %5593 = vmatmul.mubr.bf16.vlgmr.msra.gmra.mrb[0].mxu1 %v9234_v26 }
  0xc3   :  { %5069 = vmatpush1.bf16.msra.mxu0 %v7634_v13  ;;  %5602 = vmatpush1.bf16.msra.mxu1 %v7637_v27  ;;  %v7729_v13 = vld [vmem:[%s11225_s1 + $0x7ec] ss:$16 sps:$4 sm:$0xff]   ;;  %v7724_v27 = vld [vmem:[%s11225_s1 + $0x7e0] ss:$16 sps:$4 sm:$0xff]  }
  0xc4   :  { %5070 = vmatprep.subr.bf16.mxu0 %v7642_v28  ;;  %5603 = vmatprep.subr.bf16.mxu1 %v7645_v29  ;;  %v7727_v28 = vld [vmem:[%s11225_s1 + $0x7e8] ss:$16 sps:$4 sm:$0xff]   ;;  %v7732_v29 = vld [vmem:[%s11225_s1 + $0x804] ss:$16 sps:$4 sm:$0xff]  }
  0xc5   :  { %5100 = vmatprep.mubr.bf16.mxu0 %v884_v14  ;;  %5633 = vmatprep.mubr.bf16.mxu1 %v884_v14  ;;  %v7735_v14 = vld [vmem:[%s11225_s1 + $0x80c] ss:$16 sps:$4 sm:$0xff]  }
  0xc7   :  { %5071 = vmatpush1.bf16.msra.mxu0 %v7640_v30  ;;  %5604 = vmatpush1.bf16.msra.mxu1 %v7643_v31  ;;  %v900_v30 = vcombine.high %v9408_v21, %v9408_v21  ;;  %v882_v31 = vcombine.high %v9234_v26, %v9234_v26  ;;  %v7741_v26 = vld [vmem:[%s11225_s1 + $0x82c] ss:$16 sps:$4 sm:$0xff]  }
  0xc8   :  { %5072 = vmatprep.subr.bf16.mxu0 %v7648_v25  ;;  %5605 = vmatprep.subr.bf16.mxu1 %v7651_v32  ;;  %v7730_v25 = vld [vmem:[%s11225_s1 + $0x800] ss:$16 sps:$4 sm:$0xff]   ;;  %v7733_v32 = vld [vmem:[%s11225_s1 + $0x808] ss:$16 sps:$4 sm:$0xff]  }
  0xcb   :  { %5073 = vmatpush1.bf16.msra.mxu0 %v7646_v33  ;;  %5606 = vmatpush1.bf16.msra.mxu1 %v7649_v34  ;;  %v7738_v33 = vld [vmem:[%s11225_s1 + $0x824] ss:$16 sps:$4 sm:$0xff]   ;;  %v9451_v34 = vrot.slane %v900_v30, %v8750_v49 }
  0xcc   :  { %5074 = vmatprep.subr.bf16.mxu0 %v7654_v35  ;;  %5607 = vmatprep.subr.bf16.mxu1 %v7657_v36  ;;  %v7736_v35 = vld [vmem:[%s11225_s1 + $0x820] ss:$16 sps:$4 sm:$0xff]   ;;  %v7739_v36 = vld [vmem:[%s11225_s1 + $0x828] ss:$16 sps:$4 sm:$0xff]   ;;  %v7822_v30 = vld [vmem:[%s11225_s1 + $0x9e4] ss:$16 sps:$4 sm:$0xff]  }
  0xcf   :  { %5075 = vmatpush1.bf16.msra.mxu0 %v7652_v37  ;;  %5608 = vmatpush1.bf16.msra.mxu1 %v7655_v38  ;;  %v7744_v37 = vld [vmem:[%s11225_s1 + $0x844] ss:$16 sps:$4 sm:$0xff]   ;;  %v7747_v38 = vld [vmem:[%s11225_s1 + $0x84c] ss:$16 sps:$4 sm:$0xff]  }
  0xd0   :  { %5076 = vmatprep.subr.bf16.mxu0 %v7660_v39  ;;  %5609 = vmatprep.subr.bf16.mxu1 %v7663_v40  ;;  %v7742_v39 = vld [vmem:[%s11225_s1 + $0x840] ss:$16 sps:$4 sm:$0xff]   ;;  %v7745_v40 = vld [vmem:[%s11225_s1 + $0x848] ss:$16 sps:$4 sm:$0xff]  }
  0xd3   :  { %5077 = vmatpush1.bf16.msra.mxu0 %v7658_v41  ;;  %5610 = vmatpush1.bf16.msra.mxu1 %v7661_v43  ;;  %v7750_v41 = vld [vmem:[%s11225_s1 + $0x864] ss:$16 sps:$4 sm:$0xff]   ;;  %v7753_v43 = vld [vmem:[%s11225_s1 + $0x86c] ss:$16 sps:$4 sm:$0xff]  }
  0xd4   :  { %5078 = vmatprep.subr.bf16.mxu0 %v7666_v44  ;;  %5611 = vmatprep.subr.bf16.mxu1 %v7669_v45  ;;  %v7748_v44 = vld [vmem:[%s11225_s1 + $0x860] ss:$16 sps:$4 sm:$0xff]   ;;  %v7751_v45 = vld [vmem:[%s11225_s1 + $0x868] ss:$16 sps:$4 sm:$0xff]  }
  0xd7   :  { %5079 = vmatpush1.bf16.msra.mxu0 %v7664_v46  ;;  %5612 = vmatpush1.bf16.msra.mxu1 %v7667_v47  ;;  %v7756_v46 = vld [vmem:[%s11225_s1 + $0x884] ss:$16 sps:$4 sm:$0xff]   ;;  %v7759_v47 = vld [vmem:[%s11225_s1 + $0x88c] ss:$16 sps:$4 sm:$0xff]  }
  0xd8   :  { %5080 = vmatprep.subr.bf16.mxu0 %v7672_v48  ;;  %5613 = vmatprep.subr.bf16.mxu1 %v7675_v50  ;;  %v7754_v48 = vld [vmem:[%s11225_s1 + $0x880] ss:$16 sps:$4 sm:$0xff]   ;;  %v7757_v50 = vld [vmem:[%s11225_s1 + $0x888] ss:$16 sps:$4 sm:$0xff]  }
  0xdb   :  { %5081 = vmatpush1.bf16.msra.mxu0 %v7670_v51  ;;  %5614 = vmatpush1.bf16.msra.mxu1 %v7673_v53  ;;  %v7762_v51 = vld [vmem:[%s11225_s1 + $0x8a4] ss:$16 sps:$4 sm:$0xff]   ;;  %v7765_v53 = vld [vmem:[%s11225_s1 + $0x8ac] ss:$16 sps:$4 sm:$0xff]  }
  0xdc   :  { %5082 = vmatprep.subr.bf16.mxu0 %v7678_v54  ;;  %5615 = vmatprep.subr.bf16.mxu1 %v7681_v55  ;;  %v7760_v54 = vld [vmem:[%s11225_s1 + $0x8a0] ss:$16 sps:$4 sm:$0xff]   ;;  %v7763_v55 = vld [vmem:[%s11225_s1 + $0x8a8] ss:$16 sps:$4 sm:$0xff]  }
  0xdf   :  { %5083 = vmatpush1.bf16.msra.mxu0 %v7676_v56  ;;  %5616 = vmatpush1.bf16.msra.mxu1 %v7679_v57  ;;  %v7768_v56 = vld [vmem:[%s11225_s1 + $0x8c4] ss:$16 sps:$4 sm:$0xff]   ;;  %v7771_v57 = vld [vmem:[%s11225_s1 + $0x8cc] ss:$16 sps:$4 sm:$0xff]  }
  0xe0   :  { %5084 = vmatprep.subr.bf16.mxu0 %v7684_v58  ;;  %5617 = vmatprep.subr.bf16.mxu1 %v7687_v59  ;;  %v7766_v58 = vld [vmem:[%s11225_s1 + $0x8c0] ss:$16 sps:$4 sm:$0xff]   ;;  %v7769_v59 = vld [vmem:[%s11225_s1 + $0x8c8] ss:$16 sps:$4 sm:$0xff]  }
  0xe3   :  { %5085 = vmatpush1.bf16.msra.mxu0 %v7682_v60  ;;  %5618 = vmatpush1.bf16.msra.mxu1 %v7685_v61  ;;  %v7774_v60 = vld [vmem:[%s11225_s1 + $0x8e4] ss:$16 sps:$4 sm:$0xff]   ;;  %v7777_v61 = vld [vmem:[%s11225_s1 + $0x8ec] ss:$16 sps:$4 sm:$0xff]  }
  0xe4   :  { %5086 = vmatprep.subr.bf16.mxu0 %v7690_v62  ;;  %5619 = vmatprep.subr.bf16.mxu1 %v7693_v63  ;;  %v7772_v62 = vld [vmem:[%s11225_s1 + $0x8e0] ss:$16 sps:$4 sm:$0xff]   ;;  %v7775_v63 = vld [vmem:[%s11225_s1 + $0x8e8] ss:$16 sps:$4 sm:$0xff]  }
  0xe7   :  { %5087 = vmatpush1.bf16.msra.mxu0 %v7688_v0  ;;  %5620 = vmatpush1.bf16.msra.mxu1 %v7691_v1  ;;  %v7780_v0 = vld [vmem:[%s11225_s1 + $0x904] ss:$16 sps:$4 sm:$0xff]   ;;  %v7783_v1 = vld [vmem:[%s11225_s1 + $0x90c] ss:$16 sps:$4 sm:$0xff]  }
  0xe8   :  { %5088 = vmatprep.subr.bf16.mxu0 %v7696_v2  ;;  %5621 = vmatprep.subr.bf16.mxu1 %v7699_v3  ;;  %v7778_v2 = vld [vmem:[%s11225_s1 + $0x900] ss:$16 sps:$4 sm:$0xff]   ;;  %v7781_v3 = vld [vmem:[%s11225_s1 + $0x908] ss:$16 sps:$4 sm:$0xff]  }
  0xeb   :  { %5089 = vmatpush1.bf16.msra.mxu0 %v7694_v4  ;;  %5622 = vmatpush1.bf16.msra.mxu1 %v7697_v5  ;;  %v7786_v4 = vld [vmem:[%s11225_s1 + $0x924] ss:$16 sps:$4 sm:$0xff]   ;;  %v7789_v5 = vld [vmem:[%s11225_s1 + $0x92c] ss:$16 sps:$4 sm:$0xff]  }
  0xec   :  { %5090 = vmatprep.subr.bf16.mxu0 %v7702_v6  ;;  %5623 = vmatprep.subr.bf16.mxu1 %v7705_v7  ;;  %v7784_v6 = vld [vmem:[%s11225_s1 + $0x920] ss:$16 sps:$4 sm:$0xff]   ;;  %v7787_v7 = vld [vmem:[%s11225_s1 + $0x928] ss:$16 sps:$4 sm:$0xff]  }
  0xef   :  { %5091 = vmatpush1.bf16.msra.mxu0 %v7700_v8  ;;  %5624 = vmatpush1.bf16.msra.mxu1 %v7703_v9  ;;  %v7792_v8 = vld [vmem:[%s11225_s1 + $0x944] ss:$16 sps:$4 sm:$0xff]   ;;  %v7795_v9 = vld [vmem:[%s11225_s1 + $0x94c] ss:$16 sps:$4 sm:$0xff]  }
  0xf0   :  { %5092 = vmatprep.subr.bf16.mxu0 %v7708_v10  ;;  %5625 = vmatprep.subr.bf16.mxu1 %v7711_v11  ;;  %v7790_v10 = vld [vmem:[%s11225_s1 + $0x940] ss:$16 sps:$4 sm:$0xff]   ;;  %v7793_v11 = vld [vmem:[%s11225_s1 + $0x948] ss:$16 sps:$4 sm:$0xff]  }
  0xf3   :  { %5093 = vmatpush1.bf16.msra.mxu0 %v7706_v12  ;;  %5626 = vmatpush1.bf16.msra.mxu1 %v7709_v52  ;;  %v7798_v12 = vld [vmem:[%s11225_s1 + $0x964] ss:$16 sps:$4 sm:$0xff]   ;;  %v7801_v52 = vld [vmem:[%s11225_s1 + $0x96c] ss:$16 sps:$4 sm:$0xff]  }
  0xf4   :  { %5094 = vmatprep.subr.bf16.mxu0 %v7714_v15  ;;  %5627 = vmatprep.subr.bf16.mxu1 %v7717_v16  ;;  %v7796_v15 = vld [vmem:[%s11225_s1 + $0x960] ss:$16 sps:$4 sm:$0xff]   ;;  %v7799_v16 = vld [vmem:[%s11225_s1 + $0x968] ss:$16 sps:$4 sm:$0xff]  }
  0xf7   :  { %5095 = vmatpush1.bf16.msra.mxu0 %v7712_v17  ;;  %5628 = vmatpush1.bf16.msra.mxu1 %v7715_v18  ;;  %v7804_v17 = vld [vmem:[%s11225_s1 + $0x984] ss:$16 sps:$4 sm:$0xff]   ;;  %v7807_v18 = vld [vmem:[%s11225_s1 + $0x98c] ss:$16 sps:$4 sm:$0xff]  }
  0xf8   :  { %5096 = vmatprep.subr.bf16.mxu0 %v7720_v19  ;;  %5629 = vmatprep.subr.bf16.mxu1 %v7723_v20  ;;  %v7802_v19 = vld [vmem:[%s11225_s1 + $0x980] ss:$16 sps:$4 sm:$0xff]   ;;  %v7805_v20 = vld [vmem:[%s11225_s1 + $0x988] ss:$16 sps:$4 sm:$0xff]  }
  0xfb   :  { %5097 = vmatpush1.bf16.msra.mxu0 %v7718_v22  ;;  %5630 = vmatpush1.bf16.msra.mxu1 %v7721_v23  ;;  %v7810_v22 = vld [vmem:[%s11225_s1 + $0x9a4] ss:$16 sps:$4 sm:$0xff]   ;;  %v7813_v23 = vld [vmem:[%s11225_s1 + $0x9ac] ss:$16 sps:$4 sm:$0xff]  }
  0xfc   :  { %5098 = vmatprep.subr.bf16.mxu0 %v7726_v24  ;;  %5631 = vmatprep.subr.bf16.mxu1 %v7729_v13  ;;  %v7808_v24 = vld [vmem:[%s11225_s1 + $0x9a0] ss:$16 sps:$4 sm:$0xff]   ;;  %v7811_v13 = vld [vmem:[%s11225_s1 + $0x9a8] ss:$16 sps:$4 sm:$0xff]  }
  0xff   :  { %5099 = vmatpush1.bf16.msra.mxu0 %v7724_v27  ;;  %5632 = vmatpush1.bf16.msra.mxu1 %v7727_v28  ;;  %v7816_v27 = vld [vmem:[%s11225_s1 + $0x9c4] ss:$16 sps:$4 sm:$0xff]   ;;  %v7819_v28 = vld [vmem:[%s11225_s1 + $0x9cc] ss:$16 sps:$4 sm:$0xff]  }
 0x100   :  { %5109 = vmatprep.subr.bf16.mxu0 %v7732_v29  ;;  %5642 = vmatprep.subr.bf16.mxu1 %v7735_v14  ;;  %v7814_v29 = vld [vmem:[%s11225_s1 + $0x9c0] ss:$16 sps:$4 sm:$0xff]   ;;  %v7817_v14 = vld [vmem:[%s11225_s1 + $0x9c8] ss:$16 sps:$4 sm:$0xff]  }
 0x102   :  { %5101 = vmatmul.mubr.bf16.vlgmr.msra.gmra.mrb[0].mxu0 %v882_v31  ;;  %5634 = vmatmul.mubr.bf16.vlgmr.msra.gmra.mrb[0].mxu1 %v882_v31  ;;  %v7825_v31 = vld [vmem:[%s11225_s1 + $0x9ec] ss:$16 sps:$4 sm:$0xff]  }
 0x103   :  { %5110 = vmatpush1.bf16.msra.mxu0 %v7730_v25  ;;  %5643 = vmatpush1.bf16.msra.mxu1 %v7733_v32  ;;  %v7820_v25 = vld [vmem:[%s11225_s1 + $0x9e0] ss:$16 sps:$4 sm:$0xff]   ;;  %v7823_v32 = vld [vmem:[%s11225_s1 + $0x9e8] ss:$16 sps:$4 sm:$0xff]  }
 0x104   :  { %5111 = vmatprep.subr.bf16.mxu0 %v7738_v33  ;;  %5644 = vmatprep.subr.bf16.mxu1 %v7741_v26  ;;  %v7828_v33 = vld [vmem:[%s11225_s1 + $0xa04] ss:$16 sps:$4 sm:$0xff]   ;;  %v7831_v26 = vld [vmem:[%s11225_s1 + $0xa0c] ss:$16 sps:$4 sm:$0xff]  }
 0x105   :  { %5141 = vmatprep.mubr.bf16.mxu0 %v9451_v34  ;;  %5674 = vmatprep.mubr.bf16.mxu1 %v9451_v34 }
 0x107   :  { %5112 = vmatpush1.bf16.msra.mxu0 %v7736_v35  ;;  %5645 = vmatpush1.bf16.msra.mxu1 %v7739_v36  ;;  %v9637_v35 = vrot.slane %v9408_v21, %v8750_v49  ;;  %v7826_v36 = vld [vmem:[%s11225_s1 + $0xa00] ss:$16 sps:$4 sm:$0xff]   ;;  %v7837_v21 = vld [vmem:[%s11225_s1 + $0xa2c] ss:$16 sps:$4 sm:$0xff]  }
 0x108   :  { %5113 = vmatprep.subr.bf16.mxu0 %v7744_v37  ;;  %5646 = vmatprep.subr.bf16.mxu1 %v7747_v38  ;;  %v7829_v37 = vld [vmem:[%s11225_s1 + $0xa08] ss:$16 sps:$4 sm:$0xff]   ;;  %v7834_v38 = vld [vmem:[%s11225_s1 + $0xa24] ss:$16 sps:$4 sm:$0xff]  }
 0x10b   :  { %5114 = vmatpush1.bf16.msra.mxu0 %v7742_v39  ;;  %5647 = vmatpush1.bf16.msra.mxu1 %v7745_v40  ;;  %v932_v39 = vcombine.high %v9451_v34, %v9451_v34  ;;  %v7832_v40 = vld [vmem:[%s11225_s1 + $0xa20] ss:$16 sps:$4 sm:$0xff]   ;;  %v7840_v34 = vld [vmem:[%s11225_s1 + $0xa44] ss:$16 sps:$4 sm:$0xff]  }
 0x10c   :  { %5115 = vmatprep.subr.bf16.mxu0 %v7750_v41  ;;  %5648 = vmatprep.subr.bf16.mxu1 %v7753_v43  ;;  %v7835_v41 = vld [vmem:[%s11225_s1 + $0xa28] ss:$16 sps:$4 sm:$0xff]   ;;  %v7843_v43 = vld [vmem:[%s11225_s1 + $0xa4c] ss:$16 sps:$4 sm:$0xff]  }
 0x10f   :  { %5116 = vmatpush1.bf16.msra.mxu0 %v7748_v44  ;;  %5649 = vmatpush1.bf16.msra.mxu1 %v7751_v45  ;;  %v7838_v44 = vld [vmem:[%s11225_s1 + $0xa40] ss:$16 sps:$4 sm:$0xff]   ;;  %v7841_v45 = vld [vmem:[%s11225_s1 + $0xa48] ss:$16 sps:$4 sm:$0xff]  }
 0x110   :  { %5117 = vmatprep.subr.bf16.mxu0 %v7756_v46  ;;  %5650 = vmatprep.subr.bf16.mxu1 %v7759_v47  ;;  %v7846_v46 = vld [vmem:[%s11225_s1 + $0xa64] ss:$16 sps:$4 sm:$0xff]   ;;  %v7849_v47 = vld [vmem:[%s11225_s1 + $0xa6c] ss:$16 sps:$4 sm:$0xff]  }
 0x113   :  { %5118 = vmatpush1.bf16.msra.mxu0 %v7754_v48  ;;  %5651 = vmatpush1.bf16.msra.mxu1 %v7757_v50  ;;  %v7844_v48 = vld [vmem:[%s11225_s1 + $0xa60] ss:$16 sps:$4 sm:$0xff]   ;;  %v7847_v50 = vld [vmem:[%s11225_s1 + $0xa68] ss:$16 sps:$4 sm:$0xff]  }
 0x114   :  { %5119 = vmatprep.subr.bf16.mxu0 %v7762_v51  ;;  %5652 = vmatprep.subr.bf16.mxu1 %v7765_v53  ;;  %v7852_v51 = vld [vmem:[%s11225_s1 + $0xa84] ss:$16 sps:$4 sm:$0xff]   ;;  %v7855_v53 = vld [vmem:[%s11225_s1 + $0xa8c] ss:$16 sps:$4 sm:$0xff]  }
 0x117   :  { %5120 = vmatpush1.bf16.msra.mxu0 %v7760_v54  ;;  %5653 = vmatpush1.bf16.msra.mxu1 %v7763_v55  ;;  %v7850_v54 = vld [vmem:[%s11225_s1 + $0xa80] ss:$16 sps:$4 sm:$0xff]   ;;  %v7853_v55 = vld [vmem:[%s11225_s1 + $0xa88] ss:$16 sps:$4 sm:$0xff]  }
 0x118   :  { %5121 = vmatprep.subr.bf16.mxu0 %v7768_v56  ;;  %5654 = vmatprep.subr.bf16.mxu1 %v7771_v57  ;;  %v7858_v56 = vld [vmem:[%s11225_s1 + $0xaa4] ss:$16 sps:$4 sm:$0xff]   ;;  %v7861_v57 = vld [vmem:[%s11225_s1 + $0xaac] ss:$16 sps:$4 sm:$0xff]  }
 0x11b   :  { %5122 = vmatpush1.bf16.msra.mxu0 %v7766_v58  ;;  %5655 = vmatpush1.bf16.msra.mxu1 %v7769_v59  ;;  %v7856_v58 = vld [vmem:[%s11225_s1 + $0xaa0] ss:$16 sps:$4 sm:$0xff]   ;;  %v7859_v59 = vld [vmem:[%s11225_s1 + $0xaa8] ss:$16 sps:$4 sm:$0xff]  }
 0x11c   :  { %5123 = vmatprep.subr.bf16.mxu0 %v7774_v60  ;;  %5656 = vmatprep.subr.bf16.mxu1 %v7777_v61  ;;  %v7864_v60 = vld [vmem:[%s11225_s1 + $0xac4] ss:$16 sps:$4 sm:$0xff]   ;;  %v7867_v61 = vld [vmem:[%s11225_s1 + $0xacc] ss:$16 sps:$4 sm:$0xff]  }
 0x11f   :  { %5124 = vmatpush1.bf16.msra.mxu0 %v7772_v62  ;;  %5657 = vmatpush1.bf16.msra.mxu1 %v7775_v63  ;;  %v7862_v62 = vld [vmem:[%s11225_s1 + $0xac0] ss:$16 sps:$4 sm:$0xff]   ;;  %v7865_v63 = vld [vmem:[%s11225_s1 + $0xac8] ss:$16 sps:$4 sm:$0xff]  }
 0x120   :  { %5125 = vmatprep.subr.bf16.mxu0 %v7780_v0  ;;  %5658 = vmatprep.subr.bf16.mxu1 %v7783_v1  ;;  %v7870_v0 = vld [vmem:[%s11225_s1 + $0xae4] ss:$16 sps:$4 sm:$0xff]   ;;  %v7873_v1 = vld [vmem:[%s11225_s1 + $0xaec] ss:$16 sps:$4 sm:$0xff]  }
 0x123   :  { %5126 = vmatpush1.bf16.msra.mxu0 %v7778_v2  ;;  %5659 = vmatpush1.bf16.msra.mxu1 %v7781_v3  ;;  %v7868_v2 = vld [vmem:[%s11225_s1 + $0xae0] ss:$16 sps:$4 sm:$0xff]   ;;  %v7871_v3 = vld [vmem:[%s11225_s1 + $0xae8] ss:$16 sps:$4 sm:$0xff]  }
 0x124   :  { %5127 = vmatprep.subr.bf16.mxu0 %v7786_v4  ;;  %5660 = vmatprep.subr.bf16.mxu1 %v7789_v5  ;;  %v7876_v4 = vld [vmem:[%s11225_s1 + $0xb04] ss:$16 sps:$4 sm:$0xff]   ;;  %v7879_v5 = vld [vmem:[%s11225_s1 + $0xb0c] ss:$16 sps:$4 sm:$0xff]  }
 0x127   :  { %5128 = vmatpush1.bf16.msra.mxu0 %v7784_v6  ;;  %5661 = vmatpush1.bf16.msra.mxu1 %v7787_v7  ;;  %v7874_v6 = vld [vmem:[%s11225_s1 + $0xb00] ss:$16 sps:$4 sm:$0xff]   ;;  %v7877_v7 = vld [vmem:[%s11225_s1 + $0xb08] ss:$16 sps:$4 sm:$0xff]  }
 0x128   :  { %5129 = vmatprep.subr.bf16.mxu0 %v7792_v8  ;;  %5662 = vmatprep.subr.bf16.mxu1 %v7795_v9  ;;  %v7882_v8 = vld [vmem:[%s11225_s1 + $0xb24] ss:$16 sps:$4 sm:$0xff]   ;;  %v7885_v9 = vld [vmem:[%s11225_s1 + $0xb2c] ss:$16 sps:$4 sm:$0xff]  }
 0x12b   :  { %5130 = vmatpush1.bf16.msra.mxu0 %v7790_v10  ;;  %5663 = vmatpush1.bf16.msra.mxu1 %v7793_v11  ;;  %v7880_v10 = vld [vmem:[%s11225_s1 + $0xb20] ss:$16 sps:$4 sm:$0xff]   ;;  %v7883_v11 = vld [vmem:[%s11225_s1 + $0xb28] ss:$16 sps:$4 sm:$0xff]  }
 0x12c   :  { %5131 = vmatprep.subr.bf16.mxu0 %v7798_v12  ;;  %5664 = vmatprep.subr.bf16.mxu1 %v7801_v52  ;;  %v7888_v12 = vld [vmem:[%s11225_s1 + $0xb44] ss:$16 sps:$4 sm:$0xff]   ;;  %v7891_v52 = vld [vmem:[%s11225_s1 + $0xb4c] ss:$16 sps:$4 sm:$0xff]  }
 0x12f   :  { %5132 = vmatpush1.bf16.msra.mxu0 %v7796_v15  ;;  %5665 = vmatpush1.bf16.msra.mxu1 %v7799_v16  ;;  %v7886_v15 = vld [vmem:[%s11225_s1 + $0xb40] ss:$16 sps:$4 sm:$0xff]   ;;  %v7889_v16 = vld [vmem:[%s11225_s1 + $0xb48] ss:$16 sps:$4 sm:$0xff]  }
 0x130   :  { %5133 = vmatprep.subr.bf16.mxu0 %v7804_v17  ;;  %5666 = vmatprep.subr.bf16.mxu1 %v7807_v18  ;;  %v7894_v17 = vld [vmem:[%s11225_s1 + $0xb64] ss:$16 sps:$4 sm:$0xff]   ;;  %v7897_v18 = vld [vmem:[%s11225_s1 + $0xb6c] ss:$16 sps:$4 sm:$0xff]  }
 0x133   :  { %5134 = vmatpush1.bf16.msra.mxu0 %v7802_v19  ;;  %5667 = vmatpush1.bf16.msra.mxu1 %v7805_v20  ;;  %v7892_v19 = vld [vmem:[%s11225_s1 + $0xb60] ss:$16 sps:$4 sm:$0xff]   ;;  %v7895_v20 = vld [vmem:[%s11225_s1 + $0xb68] ss:$16 sps:$4 sm:$0xff]  }
 0x134   :  { %5135 = vmatprep.subr.bf16.mxu0 %v7810_v22  ;;  %5668 = vmatprep.subr.bf16.mxu1 %v7813_v23  ;;  %v7900_v22 = vld [vmem:[%s11225_s1 + $0xb84] ss:$16 sps:$4 sm:$0xff]   ;;  %v7903_v23 = vld [vmem:[%s11225_s1 + $0xb8c] ss:$16 sps:$4 sm:$0xff]  }
 0x137   :  { %5136 = vmatpush1.bf16.msra.mxu0 %v7808_v24  ;;  %5669 = vmatpush1.bf16.msra.mxu1 %v7811_v13  ;;  %v7898_v24 = vld [vmem:[%s11225_s1 + $0xb80] ss:$16 sps:$4 sm:$0xff]   ;;  %v7901_v13 = vld [vmem:[%s11225_s1 + $0xb88] ss:$16 sps:$4 sm:$0xff]  }
 0x138   :  { %5137 = vmatprep.subr.bf16.mxu0 %v7816_v27  ;;  %5670 = vmatprep.subr.bf16.mxu1 %v7819_v28  ;;  %v7906_v27 = vld [vmem:[%s11225_s1 + $0xba4] ss:$16 sps:$4 sm:$0xff]   ;;  %v7909_v28 = vld [vmem:[%s11225_s1 + $0xbac] ss:$16 sps:$4 sm:$0xff]  }
 0x13b   :  { %5138 = vmatpush1.bf16.msra.mxu0 %v7814_v29  ;;  %5671 = vmatpush1.bf16.msra.mxu1 %v7817_v14  ;;  %v7904_v29 = vld [vmem:[%s11225_s1 + $0xba0] ss:$16 sps:$4 sm:$0xff]   ;;  %v7907_v14 = vld [vmem:[%s11225_s1 + $0xba8] ss:$16 sps:$4 sm:$0xff]  }
 0x13c   :  { %5139 = vmatprep.subr.bf16.mxu0 %v7822_v30  ;;  %5672 = vmatprep.subr.bf16.mxu1 %v7825_v31  ;;  %v7912_v30 = vld [vmem:[%s11225_s1 + $0xbc4] ss:$16 sps:$4 sm:$0xff]   ;;  %v7915_v31 = vld [vmem:[%s11225_s1 + $0xbcc] ss:$16 sps:$4 sm:$0xff]  }
 0x13f   :  { %5140 = vmatpush1.bf16.msra.mxu0 %v7820_v25  ;;  %5673 = vmatpush1.bf16.msra.mxu1 %v7823_v32  ;;  %v8556_v25 = vld [vmem:[%s11224_s0 + $0x8] sm:$0xff] }
 0x140   :  { %5150 = vmatprep.subr.bf16.mxu0 %v7828_v33  ;;  %5683 = vmatprep.subr.bf16.mxu1 %v7831_v26  ;;  %v885_v32 = vcombine.high %v8556_v25, %v8556_v25  ;;  %v7910_v33 = vld [vmem:[%s11225_s1 + $0xbc0] ss:$16 sps:$4 sm:$0xff]   ;;  %v7913_v26 = vld [vmem:[%s11225_s1 + $0xbc8] ss:$16 sps:$4 sm:$0xff]  }
 0x141   :  { %v7994_v25 = vld [vmem:[%s11225_s1 + $0xd80] ss:$16 sps:$4 sm:$0xff]  }
 0x142   :  { %5142 = vmatmul.mubr.bf16.vlgmr.msra.gmra.mrb[0].mxu0 %v9637_v35  ;;  %5675 = vmatmul.mubr.bf16.vlgmr.msra.gmra.mrb[0].mxu1 %v9637_v35 }
 0x143   :  { %5151 = vmatpush1.bf16.msra.mxu0 %v7826_v36  ;;  %5684 = vmatpush1.bf16.msra.mxu1 %v7829_v37  ;;  %v7918_v36 = vld [vmem:[%s11225_s1 + $0xbe4] ss:$16 sps:$4 sm:$0xff]   ;;  %v7921_v37 = vld [vmem:[%s11225_s1 + $0xbec] ss:$16 sps:$4 sm:$0xff]  }
 0x144   :  { %5152 = vmatprep.subr.bf16.mxu0 %v7834_v38  ;;  %5685 = vmatprep.subr.bf16.mxu1 %v7837_v21  ;;  %v9827_v38 = vrot.slane %v885_v32, %v8750_v49  ;;  %v7916_v21 = vld [vmem:[%s11225_s1 + $0xbe0] ss:$16 sps:$4 sm:$0xff]   ;;  %v7997_v32 = vld [vmem:[%s11225_s1 + $0xd88] ss:$16 sps:$4 sm:$0xff]  }
 0x145   :  { %5182 = vmatprep.mubr.bf16.mxu0 %v932_v39  ;;  %5715 = vmatprep.mubr.bf16.mxu1 %v932_v39  ;;  %v7919_v39 = vld [vmem:[%s11225_s1 + $0xbe8] ss:$16 sps:$4 sm:$0xff]  }
 0x147   :  { %5153 = vmatpush1.bf16.msra.mxu0 %v7832_v40  ;;  %5686 = vmatpush1.bf16.msra.mxu1 %v7835_v41  ;;  %v7924_v40 = vld [vmem:[%s11225_s1 + $0xc04] ss:$16 sps:$4 sm:$0xff]   ;;  %v7927_v41 = vld [vmem:[%s11225_s1 + $0xc0c] ss:$16 sps:$4 sm:$0xff]  }
 0x148   :  { %5154 = vmatprep.subr.bf16.mxu0 %v7840_v34  ;;  %5687 = vmatprep.subr.bf16.mxu1 %v7843_v43  ;;  %v901_v34 = vcombine.high %v9827_v38, %v9827_v38  ;;  %v930_v43 = vcombine.high %v9637_v35, %v9637_v35  ;;  %v7933_v35 = vld [vmem:[%s11225_s1 + $0xc2c] ss:$16 sps:$4 sm:$0xff]  }
 0x14b   :  { %5155 = vmatpush1.bf16.msra.mxu0 %v7838_v44  ;;  %5688 = vmatpush1.bf16.msra.mxu1 %v7841_v45  ;;  %v7922_v44 = vld [vmem:[%s11225_s1 + $0xc00] ss:$16 sps:$4 sm:$0xff]   ;;  %v7925_v45 = vld [vmem:[%s11225_s1 + $0xc08] ss:$16 sps:$4 sm:$0xff]  }
 0x14c   :  { %5156 = vmatprep.subr.bf16.mxu0 %v7846_v46  ;;  %5689 = vmatprep.subr.bf16.mxu1 %v7849_v47  ;;  %v7930_v46 = vld [vmem:[%s11225_s1 + $0xc24] ss:$16 sps:$4 sm:$0xff]   ;;  %v9858_v47 = vrot.slane %v901_v34, %v8750_v49 }
 0x14d   :  { %v8014_v34 = vld [vmem:[%s11225_s1 + $0xde4] ss:$16 sps:$4 sm:$0xff]  }
 0x14f   :  { %5157 = vmatpush1.bf16.msra.mxu0 %v7844_v48  ;;  %5690 = vmatpush1.bf16.msra.mxu1 %v7847_v50  ;;  %v7928_v48 = vld [vmem:[%s11225_s1 + $0xc20] ss:$16 sps:$4 sm:$0xff]   ;;  %v7931_v50 = vld [vmem:[%s11225_s1 + $0xc28] ss:$16 sps:$4 sm:$0xff]  }
 0x150   :  { %5158 = vmatprep.subr.bf16.mxu0 %v7852_v51  ;;  %5691 = vmatprep.subr.bf16.mxu1 %v7855_v53  ;;  %v7936_v51 = vld [vmem:[%s11225_s1 + $0xc44] ss:$16 sps:$4 sm:$0xff]   ;;  %v7939_v53 = vld [vmem:[%s11225_s1 + $0xc4c] ss:$16 sps:$4 sm:$0xff]  }
 0x153   :  { %5159 = vmatpush1.bf16.msra.mxu0 %v7850_v54  ;;  %5692 = vmatpush1.bf16.msra.mxu1 %v7853_v55  ;;  %v7934_v54 = vld [vmem:[%s11225_s1 + $0xc40] ss:$16 sps:$4 sm:$0xff]   ;;  %v7937_v55 = vld [vmem:[%s11225_s1 + $0xc48] ss:$16 sps:$4 sm:$0xff]  }
 0x154   :  { %5160 = vmatprep.subr.bf16.mxu0 %v7858_v56  ;;  %5693 = vmatprep.subr.bf16.mxu1 %v7861_v57  ;;  %v7942_v56 = vld [vmem:[%s11225_s1 + $0xc64] ss:$16 sps:$4 sm:$0xff]   ;;  %v7945_v57 = vld [vmem:[%s11225_s1 + $0xc6c] ss:$16 sps:$4 sm:$0xff]  }
 0x157   :  { %5161 = vmatpush1.bf16.msra.mxu0 %v7856_v58  ;;  %5694 = vmatpush1.bf16.msra.mxu1 %v7859_v59  ;;  %v7940_v58 = vld [vmem:[%s11225_s1 + $0xc60] ss:$16 sps:$4 sm:$0xff]   ;;  %v7943_v59 = vld [vmem:[%s11225_s1 + $0xc68] ss:$16 sps:$4 sm:$0xff]  }
 0x158   :  { %5162 = vmatprep.subr.bf16.mxu0 %v7864_v60  ;;  %5695 = vmatprep.subr.bf16.mxu1 %v7867_v61  ;;  %v7948_v60 = vld [vmem:[%s11225_s1 + $0xc84] ss:$16 sps:$4 sm:$0xff]   ;;  %v7951_v61 = vld [vmem:[%s11225_s1 + $0xc8c] ss:$16 sps:$4 sm:$0xff]  }
 0x15b   :  { %5163 = vmatpush1.bf16.msra.mxu0 %v7862_v62  ;;  %5696 = vmatpush1.bf16.msra.mxu1 %v7865_v63  ;;  %v7946_v62 = vld [vmem:[%s11225_s1 + $0xc80] ss:$16 sps:$4 sm:$0xff]   ;;  %v7949_v63 = vld [vmem:[%s11225_s1 + $0xc88] ss:$16 sps:$4 sm:$0xff]  }
 0x15c   :  { %5164 = vmatprep.subr.bf16.mxu0 %v7870_v0  ;;  %5697 = vmatprep.subr.bf16.mxu1 %v7873_v1  ;;  %v7954_v0 = vld [vmem:[%s11225_s1 + $0xca4] ss:$16 sps:$4 sm:$0xff]   ;;  %v7957_v1 = vld [vmem:[%s11225_s1 + $0xcac] ss:$16 sps:$4 sm:$0xff]  }
 0x15f   :  { %5165 = vmatpush1.bf16.msra.mxu0 %v7868_v2  ;;  %5698 = vmatpush1.bf16.msra.mxu1 %v7871_v3  ;;  %v7952_v2 = vld [vmem:[%s11225_s1 + $0xca0] ss:$16 sps:$4 sm:$0xff]   ;;  %v7955_v3 = vld [vmem:[%s11225_s1 + $0xca8] ss:$16 sps:$4 sm:$0xff]  }
 0x160   :  { %5166 = vmatprep.subr.bf16.mxu0 %v7876_v4  ;;  %5699 = vmatprep.subr.bf16.mxu1 %v7879_v5  ;;  %v7960_v4 = vld [vmem:[%s11225_s1 + $0xcc4] ss:$16 sps:$4 sm:$0xff]   ;;  %v7963_v5 = vld [vmem:[%s11225_s1 + $0xccc] ss:$16 sps:$4 sm:$0xff]  }
 0x163   :  { %5167 = vmatpush1.bf16.msra.mxu0 %v7874_v6  ;;  %5700 = vmatpush1.bf16.msra.mxu1 %v7877_v7  ;;  %v7958_v6 = vld [vmem:[%s11225_s1 + $0xcc0] ss:$16 sps:$4 sm:$0xff]   ;;  %v7961_v7 = vld [vmem:[%s11225_s1 + $0xcc8] ss:$16 sps:$4 sm:$0xff]  }
 0x164   :  { %5168 = vmatprep.subr.bf16.mxu0 %v7882_v8  ;;  %5701 = vmatprep.subr.bf16.mxu1 %v7885_v9  ;;  %v7966_v8 = vld [vmem:[%s11225_s1 + $0xce4] ss:$16 sps:$4 sm:$0xff]   ;;  %v7969_v9 = vld [vmem:[%s11225_s1 + $0xcec] ss:$16 sps:$4 sm:$0xff]  }
 0x167   :  { %5169 = vmatpush1.bf16.msra.mxu0 %v7880_v10  ;;  %5702 = vmatpush1.bf16.msra.mxu1 %v7883_v11  ;;  %v7964_v10 = vld [vmem:[%s11225_s1 + $0xce0] ss:$16 sps:$4 sm:$0xff]   ;;  %v7967_v11 = vld [vmem:[%s11225_s1 + $0xce8] ss:$16 sps:$4 sm:$0xff]  }
 0x168   :  { %5170 = vmatprep.subr.bf16.mxu0 %v7888_v12  ;;  %5703 = vmatprep.subr.bf16.mxu1 %v7891_v52  ;;  %v7972_v12 = vld [vmem:[%s11225_s1 + $0xd04] ss:$16 sps:$4 sm:$0xff]   ;;  %v7975_v52 = vld [vmem:[%s11225_s1 + $0xd0c] ss:$16 sps:$4 sm:$0xff]  }
 0x16b   :  { %5171 = vmatpush1.bf16.msra.mxu0 %v7886_v15  ;;  %5704 = vmatpush1.bf16.msra.mxu1 %v7889_v16  ;;  %v7970_v15 = vld [vmem:[%s11225_s1 + $0xd00] ss:$16 sps:$4 sm:$0xff]   ;;  %v7973_v16 = vld [vmem:[%s11225_s1 + $0xd08] ss:$16 sps:$4 sm:$0xff]  }
 0x16c   :  { %5172 = vmatprep.subr.bf16.mxu0 %v7894_v17  ;;  %5705 = vmatprep.subr.bf16.mxu1 %v7897_v18  ;;  %v7978_v17 = vld [vmem:[%s11225_s1 + $0xd24] ss:$16 sps:$4 sm:$0xff]   ;;  %v7981_v18 = vld [vmem:[%s11225_s1 + $0xd2c] ss:$16 sps:$4 sm:$0xff]  }
 0x16f   :  { %5173 = vmatpush1.bf16.msra.mxu0 %v7892_v19  ;;  %5706 = vmatpush1.bf16.msra.mxu1 %v7895_v20  ;;  %v7976_v19 = vld [vmem:[%s11225_s1 + $0xd20] ss:$16 sps:$4 sm:$0xff]   ;;  %v7979_v20 = vld [vmem:[%s11225_s1 + $0xd28] ss:$16 sps:$4 sm:$0xff]  }
 0x170   :  { %5174 = vmatprep.subr.bf16.mxu0 %v7900_v22  ;;  %5707 = vmatprep.subr.bf16.mxu1 %v7903_v23  ;;  %v7984_v22 = vld [vmem:[%s11225_s1 + $0xd44] ss:$16 sps:$4 sm:$0xff]   ;;  %v7987_v23 = vld [vmem:[%s11225_s1 + $0xd4c] ss:$16 sps:$4 sm:$0xff]  }
 0x173   :  { %5175 = vmatpush1.bf16.msra.mxu0 %v7898_v24  ;;  %5708 = vmatpush1.bf16.msra.mxu1 %v7901_v13  ;;  %v7982_v24 = vld [vmem:[%s11225_s1 + $0xd40] ss:$16 sps:$4 sm:$0xff]   ;;  %v7985_v13 = vld [vmem:[%s11225_s1 + $0xd48] ss:$16 sps:$4 sm:$0xff]  }
 0x174   :  { %5176 = vmatprep.subr.bf16.mxu0 %v7906_v27  ;;  %5709 = vmatprep.subr.bf16.mxu1 %v7909_v28  ;;  %v7990_v27 = vld [vmem:[%s11225_s1 + $0xd64] ss:$16 sps:$4 sm:$0xff]   ;;  %v7993_v28 = vld [vmem:[%s11225_s1 + $0xd6c] ss:$16 sps:$4 sm:$0xff]  }
 0x177   :  { %5177 = vmatpush1.bf16.msra.mxu0 %v7904_v29  ;;  %5710 = vmatpush1.bf16.msra.mxu1 %v7907_v14  ;;  %v7988_v29 = vld [vmem:[%s11225_s1 + $0xd60] ss:$16 sps:$4 sm:$0xff]   ;;  %v7991_v14 = vld [vmem:[%s11225_s1 + $0xd68] ss:$16 sps:$4 sm:$0xff]  }
 0x178   :  { %5178 = vmatprep.subr.bf16.mxu0 %v7912_v30  ;;  %5711 = vmatprep.subr.bf16.mxu1 %v7915_v31  ;;  %v7996_v30 = vld [vmem:[%s11225_s1 + $0xd84] ss:$16 sps:$4 sm:$0xff]   ;;  %v7999_v31 = vld [vmem:[%s11225_s1 + $0xd8c] ss:$16 sps:$4 sm:$0xff]  }
 0x17b   :  { %5179 = vmatpush1.bf16.msra.mxu0 %v7910_v33  ;;  %5712 = vmatpush1.bf16.msra.mxu1 %v7913_v26  ;;  %v8002_v33 = vld [vmem:[%s11225_s1 + $0xda4] ss:$16 sps:$4 sm:$0xff]   ;;  %v8005_v26 = vld [vmem:[%s11225_s1 + $0xdac] ss:$16 sps:$4 sm:$0xff]  }
 0x17c   :  { %5180 = vmatprep.subr.bf16.mxu0 %v7918_v36  ;;  %5713 = vmatprep.subr.bf16.mxu1 %v7921_v37  ;;  %v8000_v36 = vld [vmem:[%s11225_s1 + $0xda0] ss:$16 sps:$4 sm:$0xff]   ;;  %v8003_v37 = vld [vmem:[%s11225_s1 + $0xda8] ss:$16 sps:$4 sm:$0xff]  }
 0x17f   :  { %5181 = vmatpush1.bf16.msra.mxu0 %v7916_v21  ;;  %5714 = vmatpush1.bf16.msra.mxu1 %v7919_v39  ;;  %v8008_v21 = vld [vmem:[%s11225_s1 + $0xdc4] ss:$16 sps:$4 sm:$0xff]   ;;  %v8011_v39 = vld [vmem:[%s11225_s1 + $0xdcc] ss:$16 sps:$4 sm:$0xff]  }
 0x180   :  { %5191 = vmatprep.subr.bf16.mxu0 %v7924_v40  ;;  %5724 = vmatprep.subr.bf16.mxu1 %v7927_v41  ;;  %v8006_v40 = vld [vmem:[%s11225_s1 + $0xdc0] ss:$16 sps:$4 sm:$0xff]   ;;  %v8009_v41 = vld [vmem:[%s11225_s1 + $0xdc8] ss:$16 sps:$4 sm:$0xff]  }
 0x182   :  { %5183 = vmatmul.mubr.bf16.vlgmr.msra.gmra.mrb[0].mxu0 %v930_v43  ;;  %5716 = vmatmul.mubr.bf16.vlgmr.msra.gmra.mrb[0].mxu1 %v930_v43  ;;  %v8017_v43 = vld [vmem:[%s11225_s1 + $0xdec] ss:$16 sps:$4 sm:$0xff]  }
 0x183   :  { %5192 = vmatpush1.bf16.msra.mxu0 %v7922_v44  ;;  %5725 = vmatpush1.bf16.msra.mxu1 %v7925_v45  ;;  %v8012_v44 = vld [vmem:[%s11225_s1 + $0xde0] ss:$16 sps:$4 sm:$0xff]   ;;  %v8015_v45 = vld [vmem:[%s11225_s1 + $0xde8] ss:$16 sps:$4 sm:$0xff]  }
 0x184   :  { %5193 = vmatprep.subr.bf16.mxu0 %v7930_v46  ;;  %5726 = vmatprep.subr.bf16.mxu1 %v7933_v35  ;;  %v8021_v46 = vld [vmem:[%s11225_s1 + $0xe04] ss:$16 sps:$4 sm:$0xff]   ;;  %v8024_v35 = vld [vmem:[%s11225_s1 + $0xe0c] ss:$16 sps:$4 sm:$0xff]  }
 0x185   :  { %5223 = vmatprep.mubr.bf16.mxu0 %v9858_v47  ;;  %5756 = vmatprep.mubr.bf16.mxu1 %v9858_v47 }
 0x187   :  { %5194 = vmatpush1.bf16.msra.mxu0 %v7928_v48  ;;  %5727 = vmatpush1.bf16.msra.mxu1 %v7931_v50  ;;  %v10044_v48 = vrot.slane %v9827_v38, %v8750_v49  ;;  %v8019_v50 = vld [vmem:[%s11225_s1 + $0xe00] ss:$16 sps:$4 sm:$0xff]   ;;  %v8030_v38 = vld [vmem:[%s11225_s1 + $0xe2c] ss:$16 sps:$4 sm:$0xff]  }
 0x188   :  { %5195 = vmatprep.subr.bf16.mxu0 %v7936_v51  ;;  %5728 = vmatprep.subr.bf16.mxu1 %v7939_v53  ;;  %v8022_v51 = vld [vmem:[%s11225_s1 + $0xe08] ss:$16 sps:$4 sm:$0xff]   ;;  %v8027_v53 = vld [vmem:[%s11225_s1 + $0xe24] ss:$16 sps:$4 sm:$0xff]  }
 0x18b   :  { %5196 = vmatpush1.bf16.msra.mxu0 %v7934_v54  ;;  %5729 = vmatpush1.bf16.msra.mxu1 %v7937_v55  ;;  %v933_v54 = vcombine.high %v9858_v47, %v9858_v47  ;;  %v8025_v55 = vld [vmem:[%s11225_s1 + $0xe20] ss:$16 sps:$4 sm:$0xff]   ;;  %v8033_v47 = vld [vmem:[%s11225_s1 + $0xe44] ss:$16 sps:$4 sm:$0xff]  }
 0x18c   :  { %5197 = vmatprep.subr.bf16.mxu0 %v7942_v56  ;;  %5730 = vmatprep.subr.bf16.mxu1 %v7945_v57  ;;  %v8028_v56 = vld [vmem:[%s11225_s1 + $0xe28] ss:$16 sps:$4 sm:$0xff]   ;;  %v8036_v57 = vld [vmem:[%s11225_s1 + $0xe4c] ss:$16 sps:$4 sm:$0xff]  }
 0x18f   :  { %5198 = vmatpush1.bf16.msra.mxu0 %v7940_v58  ;;  %5731 = vmatpush1.bf16.msra.mxu1 %v7943_v59  ;;  %v8031_v58 = vld [vmem:[%s11225_s1 + $0xe40] ss:$16 sps:$4 sm:$0xff]   ;;  %v8034_v59 = vld [vmem:[%s11225_s1 + $0xe48] ss:$16 sps:$4 sm:$0xff]  }
 0x190   :  { %5199 = vmatprep.subr.bf16.mxu0 %v7948_v60  ;;  %5732 = vmatprep.subr.bf16.mxu1 %v7951_v61  ;;  %v8039_v60 = vld [vmem:[%s11225_s1 + $0xe64] ss:$16 sps:$4 sm:$0xff]   ;;  %v8042_v61 = vld [vmem:[%s11225_s1 + $0xe6c] ss:$16 sps:$4 sm:$0xff]  }
 0x193   :  { %5200 = vmatpush1.bf16.msra.mxu0 %v7946_v62  ;;  %5733 = vmatpush1.bf16.msra.mxu1 %v7949_v63  ;;  %v8037_v62 = vld [vmem:[%s11225_s1 + $0xe60] ss:$16 sps:$4 sm:$0xff]   ;;  %v8040_v63 = vld [vmem:[%s11225_s1 + $0xe68] ss:$16 sps:$4 sm:$0xff]  }
 0x194   :  { %5201 = vmatprep.subr.bf16.mxu0 %v7954_v0  ;;  %5734 = vmatprep.subr.bf16.mxu1 %v7957_v1  ;;  %v8045_v0 = vld [vmem:[%s11225_s1 + $0xe84] ss:$16 sps:$4 sm:$0xff]   ;;  %v8048_v1 = vld [vmem:[%s11225_s1 + $0xe8c] ss:$16 sps:$4 sm:$0xff]  }
 0x197   :  { %5202 = vmatpush1.bf16.msra.mxu0 %v7952_v2  ;;  %5735 = vmatpush1.bf16.msra.mxu1 %v7955_v3  ;;  %v8043_v2 = vld [vmem:[%s11225_s1 + $0xe80] ss:$16 sps:$4 sm:$0xff]   ;;  %v8046_v3 = vld [vmem:[%s11225_s1 + $0xe88] ss:$16 sps:$4 sm:$0xff]  }
 0x198   :  { %5203 = vmatprep.subr.bf16.mxu0 %v7960_v4  ;;  %5736 = vmatprep.subr.bf16.mxu1 %v7963_v5  ;;  %v8051_v4 = vld [vmem:[%s11225_s1 + $0xea4] ss:$16 sps:$4 sm:$0xff]   ;;  %v8054_v5 = vld [vmem:[%s11225_s1 + $0xeac] ss:$16 sps:$4 sm:$0xff]  }
 0x19b   :  { %5204 = vmatpush1.bf16.msra.mxu0 %v7958_v6  ;;  %5737 = vmatpush1.bf16.msra.mxu1 %v7961_v7  ;;  %v8049_v6 = vld [vmem:[%s11225_s1 + $0xea0] ss:$16 sps:$4 sm:$0xff]   ;;  %v8052_v7 = vld [vmem:[%s11225_s1 + $0xea8] ss:$16 sps:$4 sm:$0xff]  }
 0x19c   :  { %5205 = vmatprep.subr.bf16.mxu0 %v7966_v8  ;;  %5738 = vmatprep.subr.bf16.mxu1 %v7969_v9  ;;  %v8057_v8 = vld [vmem:[%s11225_s1 + $0xec4] ss:$16 sps:$4 sm:$0xff]   ;;  %v8060_v9 = vld [vmem:[%s11225_s1 + $0xecc] ss:$16 sps:$4 sm:$0xff]  }
 0x19f   :  { %5206 = vmatpush1.bf16.msra.mxu0 %v7964_v10  ;;  %5739 = vmatpush1.bf16.msra.mxu1 %v7967_v11  ;;  %v8055_v10 = vld [vmem:[%s11225_s1 + $0xec0] ss:$16 sps:$4 sm:$0xff]   ;;  %v8058_v11 = vld [vmem:[%s11225_s1 + $0xec8] ss:$16 sps:$4 sm:$0xff]  }
 0x1a0   :  { %5207 = vmatprep.subr.bf16.mxu0 %v7972_v12  ;;  %5740 = vmatprep.subr.bf16.mxu1 %v7975_v52  ;;  %v8063_v12 = vld [vmem:[%s11225_s1 + $0xee4] ss:$16 sps:$4 sm:$0xff]   ;;  %v8066_v52 = vld [vmem:[%s11225_s1 + $0xeec] ss:$16 sps:$4 sm:$0xff]  }
 0x1a3   :  { %5208 = vmatpush1.bf16.msra.mxu0 %v7970_v15  ;;  %5741 = vmatpush1.bf16.msra.mxu1 %v7973_v16  ;;  %v8061_v15 = vld [vmem:[%s11225_s1 + $0xee0] ss:$16 sps:$4 sm:$0xff]   ;;  %v8064_v16 = vld [vmem:[%s11225_s1 + $0xee8] ss:$16 sps:$4 sm:$0xff]  }
 0x1a4   :  { %5209 = vmatprep.subr.bf16.mxu0 %v7978_v17  ;;  %5742 = vmatprep.subr.bf16.mxu1 %v7981_v18  ;;  %v8069_v17 = vld [vmem:[%s11225_s1 + $0xf04] ss:$16 sps:$4 sm:$0xff]   ;;  %v8072_v18 = vld [vmem:[%s11225_s1 + $0xf0c] ss:$16 sps:$4 sm:$0xff]  }
 0x1a7   :  { %5210 = vmatpush1.bf16.msra.mxu0 %v7976_v19  ;;  %5743 = vmatpush1.bf16.msra.mxu1 %v7979_v20  ;;  %v8067_v19 = vld [vmem:[%s11225_s1 + $0xf00] ss:$16 sps:$4 sm:$0xff]   ;;  %v8070_v20 = vld [vmem:[%s11225_s1 + $0xf08] ss:$16 sps:$4 sm:$0xff]  }
 0x1a8   :  { %5211 = vmatprep.subr.bf16.mxu0 %v7984_v22  ;;  %5744 = vmatprep.subr.bf16.mxu1 %v7987_v23  ;;  %v8075_v22 = vld [vmem:[%s11225_s1 + $0xf24] ss:$16 sps:$4 sm:$0xff]   ;;  %v8078_v23 = vld [vmem:[%s11225_s1 + $0xf2c] ss:$16 sps:$4 sm:$0xff]  }
 0x1ab   :  { %5212 = vmatpush1.bf16.msra.mxu0 %v7982_v24  ;;  %5745 = vmatpush1.bf16.msra.mxu1 %v7985_v13  ;;  %v8073_v24 = vld [vmem:[%s11225_s1 + $0xf20] ss:$16 sps:$4 sm:$0xff]   ;;  %v8076_v13 = vld [vmem:[%s11225_s1 + $0xf28] ss:$16 sps:$4 sm:$0xff]  }
 0x1ac   :  { %5213 = vmatprep.subr.bf16.mxu0 %v7990_v27  ;;  %5746 = vmatprep.subr.bf16.mxu1 %v7993_v28  ;;  %v8081_v27 = vld [vmem:[%s11225_s1 + $0xf44] ss:$16 sps:$4 sm:$0xff]   ;;  %v8084_v28 = vld [vmem:[%s11225_s1 + $0xf4c] ss:$16 sps:$4 sm:$0xff]  }
 0x1af   :  { %5214 = vmatpush1.bf16.msra.mxu0 %v7988_v29  ;;  %5747 = vmatpush1.bf16.msra.mxu1 %v7991_v14  ;;  %v8079_v29 = vld [vmem:[%s11225_s1 + $0xf40] ss:$16 sps:$4 sm:$0xff]   ;;  %v8082_v14 = vld [vmem:[%s11225_s1 + $0xf48] ss:$16 sps:$4 sm:$0xff]  }
 0x1b0   :  { %5215 = vmatprep.subr.bf16.mxu0 %v7996_v30  ;;  %5748 = vmatprep.subr.bf16.mxu1 %v7999_v31  ;;  %v8087_v30 = vld [vmem:[%s11225_s1 + $0xf64] ss:$16 sps:$4 sm:$0xff]   ;;  %v8090_v31 = vld [vmem:[%s11225_s1 + $0xf6c] ss:$16 sps:$4 sm:$0xff]  }
 0x1b3   :  { %5216 = vmatpush1.bf16.msra.mxu0 %v7994_v25  ;;  %5749 = vmatpush1.bf16.msra.mxu1 %v7997_v32 }
 0x1b4   :  { %5217 = vmatprep.subr.bf16.mxu0 %v8002_v33  ;;  %5750 = vmatprep.subr.bf16.mxu1 %v8005_v26 }
 0x1b7   :  { %5218 = vmatpush1.bf16.msra.mxu0 %v8000_v36  ;;  %5751 = vmatpush1.bf16.msra.mxu1 %v8003_v37 }
 0x1b8   :  { %5219 = vmatprep.subr.bf16.mxu0 %v8008_v21  ;;  %5752 = vmatprep.subr.bf16.mxu1 %v8011_v39 }
 0x1bb   :  { %5220 = vmatpush1.bf16.msra.mxu0 %v8006_v40  ;;  %5753 = vmatpush1.bf16.msra.mxu1 %v8009_v41 }
 0x1bc   :  { %5221 = vmatprep.subr.bf16.mxu0 %v8014_v34  ;;  %5754 = vmatprep.subr.bf16.mxu1 %v8017_v43 }
 0x1bf   :  { %5222 = vmatpush1.bf16.msra.mxu0 %v8012_v44  ;;  %5755 = vmatpush1.bf16.msra.mxu1 %v8015_v45 }
 0x1c0   :  { %5232 = vmatprep.subr.bf16.mxu0 %v8021_v46  ;;  %5765 = vmatprep.subr.bf16.mxu1 %v8024_v35 }
 0x1c2   :  { %5224 = vmatmul.mubr.bf16.vlgmr.msra.gmra.mrb[0].mxu0 %v10044_v48  ;;  %5757 = vmatmul.mubr.bf16.vlgmr.msra.gmra.mrb[0].mxu1 %v10044_v48 }
 0x1c3   :  { %5233 = vmatpush1.bf16.msra.mxu0 %v8019_v50  ;;  %5766 = vmatpush1.bf16.msra.mxu1 %v8022_v51 }
 0x1c4   :  { %5234 = vmatprep.subr.bf16.mxu0 %v8027_v53  ;;  %5767 = vmatprep.subr.bf16.mxu1 %v8030_v38 }
 0x1c5   :  { %5264 = vmatprep.mubr.bf16.mxu0 %v933_v54  ;;  %5797 = vmatprep.mubr.bf16.mxu1 %v933_v54 }
 0x1c7   :  { %5235 = vmatpush1.bf16.msra.mxu0 %v8025_v55  ;;  %5768 = vmatpush1.bf16.msra.mxu1 %v8028_v56 }
 0x1c8   :  { %5236 = vmatprep.subr.bf16.mxu0 %v8033_v47  ;;  %5769 = vmatprep.subr.bf16.mxu1 %v8036_v57 }
 0x1cb   :  { %5237 = vmatpush1.bf16.msra.mxu0 %v8031_v58  ;;  %5770 = vmatpush1.bf16.msra.mxu1 %v8034_v59 }
 0x1cc   :  { %5238 = vmatprep.subr.bf16.mxu0 %v8039_v60  ;;  %5771 = vmatprep.subr.bf16.mxu1 %v8042_v61 }
 0x1cf   :  { %5239 = vmatpush1.bf16.msra.mxu0 %v8037_v62  ;;  %5772 = vmatpush1.bf16.msra.mxu1 %v8040_v63 }
 0x1d0   :  { %5240 = vmatprep.subr.bf16.mxu0 %v8045_v0  ;;  %5773 = vmatprep.subr.bf16.mxu1 %v8048_v1 }
 0x1d3   :  { %5241 = vmatpush1.bf16.msra.mxu0 %v8043_v2  ;;  %5774 = vmatpush1.bf16.msra.mxu1 %v8046_v3 }
 0x1d4   :  { %5242 = vmatprep.subr.bf16.mxu0 %v8051_v4  ;;  %5775 = vmatprep.subr.bf16.mxu1 %v8054_v5 }
 0x1d7   :  { %5243 = vmatpush1.bf16.msra.mxu0 %v8049_v6  ;;  %5776 = vmatpush1.bf16.msra.mxu1 %v8052_v7 }
 0x1d8   :  { %5244 = vmatprep.subr.bf16.mxu0 %v8057_v8  ;;  %5777 = vmatprep.subr.bf16.mxu1 %v8060_v9 }
 0x1db   :  { %5245 = vmatpush1.bf16.msra.mxu0 %v8055_v10  ;;  %5778 = vmatpush1.bf16.msra.mxu1 %v8058_v11 }
 0x1dc   :  { %5246 = vmatprep.subr.bf16.mxu0 %v8063_v12  ;;  %5779 = vmatprep.subr.bf16.mxu1 %v8066_v52 }
 0x1df   :  { %5247 = vmatpush1.bf16.msra.mxu0 %v8061_v15  ;;  %5780 = vmatpush1.bf16.msra.mxu1 %v8064_v16 }
 0x1e0   :  { %5248 = vmatprep.subr.bf16.mxu0 %v8069_v17  ;;  %5781 = vmatprep.subr.bf16.mxu1 %v8072_v18 }
 0x1e3   :  { %5249 = vmatpush1.bf16.msra.mxu0 %v8067_v19  ;;  %5782 = vmatpush1.bf16.msra.mxu1 %v8070_v20 }
 0x1e4   :  { %5250 = vmatprep.subr.bf16.mxu0 %v8075_v22  ;;  %5783 = vmatprep.subr.bf16.mxu1 %v8078_v23 }
 0x1e7   :  { %5251 = vmatpush1.bf16.msra.mxu0 %v8073_v24  ;;  %5784 = vmatpush1.bf16.msra.mxu1 %v8076_v13 }
 0x1e8   :  { %5252 = vmatprep.subr.bf16.mxu0 %v8081_v27  ;;  %5785 = vmatprep.subr.bf16.mxu1 %v8084_v28 }
 0x1e9   :  { %10 = vsyncpa [#allocation3], 0  ;;  %v8085_v25 = vld [vmem:[%s11225_s1 + $0xf60] ss:$16 sps:$4 sm:$0xff]   ;;  %v8088_v32 = vld [vmem:[%s11225_s1 + $0xf68] ss:$16 sps:$4 sm:$0xff]   ;;  %v931_v47 = vcombine.high %v10044_v48, %v10044_v48 }
 0x1ea   :  { %v8093_v33 = vld [vmem:[%s11225_s1 + $0xf84] ss:$16 sps:$4 sm:$0xff]   ;;  %v8096_v26 = vld [vmem:[%s11225_s1 + $0xf8c] ss:$16 sps:$4 sm:$0xff]   ;;  %v8091_v36 = vld [vmem:[%s11225_s1 + $0xf80] ss:$16 sps:$4 sm:$0xff]  }
 0x1eb   :  { %5253 = vmatpush1.bf16.msra.mxu0 %v8079_v29  ;;  %5786 = vmatpush1.bf16.msra.mxu1 %v8082_v14  ;;  %v8094_v37 = vld [vmem:[%s11225_s1 + $0xf88] ss:$16 sps:$4 sm:$0xff]   ;;  %v8099_v21 = vld [vmem:[%s11225_s1 + $0xfa4] ss:$16 sps:$4 sm:$0xff]   ;;  %v8102_v39 = vld [vmem:[%s11225_s1 + $0xfac] ss:$16 sps:$4 sm:$0xff]  }
 0x1ec   :  { %5254 = vmatprep.subr.bf16.mxu0 %v8087_v30  ;;  %5787 = vmatprep.subr.bf16.mxu1 %v8090_v31  ;;  %v8097_v40 = vld [vmem:[%s11225_s1 + $0xfa0] ss:$16 sps:$4 sm:$0xff]   ;;  %v8100_v41 = vld [vmem:[%s11225_s1 + $0xfa8] ss:$16 sps:$4 sm:$0xff]   ;;  %v8105_v34 = vld [vmem:[%s11225_s1 + $0xfc4] ss:$16 sps:$4 sm:$0xff]  }
 0x1ed   :  { %v8108_v43 = vld [vmem:[%s11225_s1 + $0xfcc] ss:$16 sps:$4 sm:$0xff]   ;;  %v10221_v44 = vld [vmem:[%s11224_s0 + $0x10] sm:$0xff]  ;;  %v8106_v46 = vld [vmem:[%s11225_s1 + $0xfc8] ss:$16 sps:$4 sm:$0xff]   ;;  %vm4941_vm0 = vcmask 523264  }
 0x1ee   :  { %v8103_v45 = vld [vmem:[%s11225_s1 + $0xfc0] ss:$16 sps:$4 sm:$0xff]   ;;  %v8111_v35 = vld [vmem:[%s11225_s1 + $0xfe4] ss:$16 sps:$4 sm:$0xff]   ;;  %v8114_v50 = vld [vmem:[%s11225_s1 + $0xfec] ss:$16 sps:$4 sm:$0xff]   ;;  %v10237_v51 = vrot.slane %v10221_v44, %v8750_v49 }
 0x1ef   :  { %5255 = vmatpush1.bf16.msra.mxu0 %v8085_v25  ;;  %5788 = vmatpush1.bf16.msra.mxu1 %v8088_v32  ;;  %v8109_v53 = vld [vmem:[%s11225_s1 + $0xfe0] ss:$16 sps:$4 sm:$0xff]   ;;  %v8112_v38 = vld [vmem:[%s11225_s1 + $0xfe8] ss:$16 sps:$4 sm:$0xff]   ;;  %v8117_v54 = vld [vmem:[%s11225_s1 + $0x1004] ss:$16 sps:$4 sm:$0xff]  }
 0x1f0   :  { %5256 = vmatprep.subr.bf16.mxu0 %v8093_v33  ;;  %5789 = vmatprep.subr.bf16.mxu1 %v8096_v26  ;;  %v8120_v55 = vld [vmem:[%s11225_s1 + $0x100c] ss:$16 sps:$4 sm:$0xff]   ;;  %v949_v56 = vcombine.high %v10237_v51, %v10237_v51  ;;  %v8115_v57 = vld [vmem:[%s11225_s1 + $0x1000] ss:$16 sps:$4 sm:$0xff]   ;;  %v8118_v58 = vld [vmem:[%s11225_s1 + $0x1008] ss:$16 sps:$4 sm:$0xff]  }
 0x1f1   :  { %v8123_v59 = vld [vmem:[%s11225_s1 + $0x1024] ss:$16 sps:$4 sm:$0xff]   ;;  %v8126_v48 = vld [vmem:[%s11225_s1 + $0x102c] ss:$16 sps:$4 sm:$0xff]   ;;  %v8121_v61 = vld [vmem:[%s11225_s1 + $0x1020] ss:$16 sps:$4 sm:$0xff]  }
 0x1f2   :  { %v10268_v60 = vrot.slane %v949_v56, %v8750_v49  ;;  %v8124_v62 = vld [vmem:[%s11225_s1 + $0x1028] ss:$16 sps:$4 sm:$0xff]   ;;  %v8129_v63 = vld [vmem:[%s11225_s1 + $0x1044] ss:$16 sps:$4 sm:$0xff]   ;;  %v8132_v0 = vld [vmem:[%s11225_s1 + $0x104c] ss:$16 sps:$4 sm:$0xff]  }
 0x1f3   :  { %5257 = vmatpush1.bf16.msra.mxu0 %v8091_v36  ;;  %5790 = vmatpush1.bf16.msra.mxu1 %v8094_v37  ;;  %v8127_v1 = vld [vmem:[%s11225_s1 + $0x1040] ss:$16 sps:$4 sm:$0xff]   ;;  %v8130_v2 = vld [vmem:[%s11225_s1 + $0x1048] ss:$16 sps:$4 sm:$0xff]   ;;  %v8135_v3 = vld [vmem:[%s11225_s1 + $0x1064] ss:$16 sps:$4 sm:$0xff]  }
 0x1f4   :  { %5258 = vmatprep.subr.bf16.mxu0 %v8099_v21  ;;  %5791 = vmatprep.subr.bf16.mxu1 %v8102_v39  ;;  %v8138_v4 = vld [vmem:[%s11225_s1 + $0x106c] ss:$16 sps:$4 sm:$0xff]   ;;  %v8133_v5 = vld [vmem:[%s11225_s1 + $0x1060] ss:$16 sps:$4 sm:$0xff]   ;;  %v8136_v6 = vld [vmem:[%s11225_s1 + $0x1068] ss:$16 sps:$4 sm:$0xff]  }
 0x1f5   :  { %v8141_v7 = vld [vmem:[%s11225_s1 + $0x1084] ss:$16 sps:$4 sm:$0xff]   ;;  %v8144_v8 = vld [vmem:[%s11225_s1 + $0x108c] ss:$16 sps:$4 sm:$0xff]   ;;  %v8139_v9 = vld [vmem:[%s11225_s1 + $0x1080] ss:$16 sps:$4 sm:$0xff]  }
 0x1f6   :  { %v8142_v10 = vld [vmem:[%s11225_s1 + $0x1088] ss:$16 sps:$4 sm:$0xff]   ;;  %v8147_v11 = vld [vmem:[%s11225_s1 + $0x10a4] ss:$16 sps:$4 sm:$0xff]   ;;  %v8150_v12 = vld [vmem:[%s11225_s1 + $0x10ac] ss:$16 sps:$4 sm:$0xff]  }
 0x1f7   :  { %5259 = vmatpush1.bf16.msra.mxu0 %v8097_v40  ;;  %5792 = vmatpush1.bf16.msra.mxu1 %v8100_v41  ;;  %v8145_v52 = vld [vmem:[%s11225_s1 + $0x10a0] ss:$16 sps:$4 sm:$0xff]   ;;  %v8148_v15 = vld [vmem:[%s11225_s1 + $0x10a8] ss:$16 sps:$4 sm:$0xff]   ;;  %v8153_v16 = vld [vmem:[%s11225_s1 + $0x10c4] ss:$16 sps:$4 sm:$0xff]  }
 0x1f8   :  { %5260 = vmatprep.subr.bf16.mxu0 %v8105_v34  ;;  %5793 = vmatprep.subr.bf16.mxu1 %v8108_v43  ;;  %v8156_v17 = vld [vmem:[%s11225_s1 + $0x10cc] ss:$16 sps:$4 sm:$0xff]   ;;  %v8151_v18 = vld [vmem:[%s11225_s1 + $0x10c0] ss:$16 sps:$4 sm:$0xff]   ;;  %v8154_v19 = vld [vmem:[%s11225_s1 + $0x10c8] ss:$16 sps:$4 sm:$0xff]  }
 0x1f9   :  { %v8159_v20 = vld [vmem:[%s11225_s1 + $0x10e4] ss:$16 sps:$4 sm:$0xff]   ;;  %v8162_v22 = vld [vmem:[%s11225_s1 + $0x10ec] ss:$16 sps:$4 sm:$0xff]   ;;  %v8157_v23 = vld [vmem:[%s11225_s1 + $0x10e0] ss:$16 sps:$4 sm:$0xff]  }
 0x1fa   :  { %v8160_v24 = vld [vmem:[%s11225_s1 + $0x10e8] ss:$16 sps:$4 sm:$0xff]   ;;  %v8165_v13 = vld [vmem:[%s11225_s1 + $0x1104] ss:$16 sps:$4 sm:$0xff]   ;;  %v8168_v27 = vld [vmem:[%s11225_s1 + $0x110c] ss:$16 sps:$4 sm:$0xff]  }
 0x1fb   :  { %5261 = vmatpush1.bf16.msra.mxu0 %v8103_v45  ;;  %5794 = vmatpush1.bf16.msra.mxu1 %v8106_v46  ;;  %v8163_v28 = vld [vmem:[%s11225_s1 + $0x1100] ss:$16 sps:$4 sm:$0xff]   ;;  %v8166_v29 = vld [vmem:[%s11225_s1 + $0x1108] ss:$16 sps:$4 sm:$0xff]   ;;  %v8171_v14 = vld [vmem:[%s11225_s1 + $0x1124] ss:$16 sps:$4 sm:$0xff]  }
 0x1fc   :  { %5262 = vmatprep.subr.bf16.mxu0 %v8111_v35  ;;  %5795 = vmatprep.subr.bf16.mxu1 %v8114_v50  ;;  %v8174_v30 = vld [vmem:[%s11225_s1 + $0x112c] ss:$16 sps:$4 sm:$0xff]   ;;  %v8169_v31 = vld [vmem:[%s11225_s1 + $0x1120] ss:$16 sps:$4 sm:$0xff]   ;;  %v8172_v25 = vld [vmem:[%s11225_s1 + $0x1128] ss:$16 sps:$4 sm:$0xff]  }
 0x1fd   :  { %v8177_v32 = vld [vmem:[%s11225_s1 + $0x1144] ss:$16 sps:$4 sm:$0xff]   ;;  %v8180_v33 = vld [vmem:[%s11225_s1 + $0x114c] ss:$16 sps:$4 sm:$0xff]   ;;  %v8175_v26 = vld [vmem:[%s11225_s1 + $0x1140] ss:$16 sps:$4 sm:$0xff]  }
 0x1fe   :  { %v8178_v36 = vld [vmem:[%s11225_s1 + $0x1148] ss:$16 sps:$4 sm:$0xff]   ;;  %v8183_v37 = vld [vmem:[%s11225_s1 + $0x1164] ss:$16 sps:$4 sm:$0xff]   ;;  %v8186_v21 = vld [vmem:[%s11225_s1 + $0x116c] ss:$16 sps:$4 sm:$0xff]  }
 0x1ff   :  { %5263 = vmatpush1.bf16.msra.mxu0 %v8109_v53  ;;  %5796 = vmatpush1.bf16.msra.mxu1 %v8112_v38  ;;  %v8181_v39 = vld [vmem:[%s11225_s1 + $0x1160] ss:$16 sps:$4 sm:$0xff]   ;;  %v8184_v40 = vld [vmem:[%s11225_s1 + $0x1168] ss:$16 sps:$4 sm:$0xff]   ;;  %v8189_v41 = vld [vmem:[%s11225_s1 + $0x1184] ss:$16 sps:$4 sm:$0xff]  }
 0x200   :  { %5273 = vmatprep.subr.bf16.mxu0 %v8117_v54  ;;  %5806 = vmatprep.subr.bf16.mxu1 %v8120_v55  ;;  %v8192_v34 = vld [vmem:[%s11225_s1 + $0x118c] ss:$16 sps:$4 sm:$0xff]   ;;  %v8187_v43 = vld [vmem:[%s11225_s1 + $0x1180] ss:$16 sps:$4 sm:$0xff]   ;;  %v8190_v45 = vld [vmem:[%s11225_s1 + $0x1188] ss:$16 sps:$4 sm:$0xff]  }
 0x201   :  { %v8195_v46 = vld [vmem:[%s11225_s1 + $0x11a4] ss:$16 sps:$4 sm:$0xff]   ;;  %v8198_v35 = vld [vmem:[%s11225_s1 + $0x11ac] ss:$16 sps:$4 sm:$0xff]   ;;  %v8193_v50 = vld [vmem:[%s11225_s1 + $0x11a0] ss:$16 sps:$4 sm:$0xff]  }
 0x202   :  { %5265 = vmatmul.mubr.bf16.vlgmr.msra.gmra.mrb[0].mxu0 %v931_v47  ;;  %5798 = vmatmul.mubr.bf16.vlgmr.msra.gmra.mrb[0].mxu1 %v931_v47  ;;  %v8196_v53 = vld [vmem:[%s11225_s1 + $0x11a8] ss:$16 sps:$4 sm:$0xff]   ;;  %v8201_v38 = vld [vmem:[%s11225_s1 + $0x11c4] ss:$16 sps:$4 sm:$0xff]   ;;  %v8204_v54 = vld [vmem:[%s11225_s1 + $0x11cc] ss:$16 sps:$4 sm:$0xff]  }
 0x203   :  { %5274 = vmatpush1.bf16.msra.mxu0 %v8115_v57  ;;  %5807 = vmatpush1.bf16.msra.mxu1 %v8118_v58  ;;  %v8199_v55 = vld [vmem:[%s11225_s1 + $0x11c0] ss:$16 sps:$4 sm:$0xff]   ;;  %v8202_v56 = vld [vmem:[%s11225_s1 + $0x11c8] ss:$16 sps:$4 sm:$0xff]   ;;  %v8207_v47 = vld [vmem:[%s11225_s1 + $0x11e4] ss:$16 sps:$4 sm:$0xff]  }
 0x204   :  { %5275 = vmatprep.subr.bf16.mxu0 %v8123_v59  ;;  %5808 = vmatprep.subr.bf16.mxu1 %v8126_v48  ;;  %v8210_v57 = vld [vmem:[%s11225_s1 + $0x11ec] ss:$16 sps:$4 sm:$0xff]   ;;  %v8205_v58 = vld [vmem:[%s11225_s1 + $0x11e0] ss:$16 sps:$4 sm:$0xff]   ;;  %v8208_v59 = vld [vmem:[%s11225_s1 + $0x11e8] ss:$16 sps:$4 sm:$0xff]  }
 0x205   :  { %5305 = vmatprep.mubr.bf16.mxu0 %v10268_v60  ;;  %5838 = vmatprep.mubr.bf16.mxu1 %v10268_v60  ;;  %v8213_v48 = vld [vmem:[%s11225_s1 + $0x1204] ss:$16 sps:$4 sm:$0xff]   ;;  %s8584_s6 = smov [#allocation2]   ;;  %vm6362_vm1 = vcmask 25600  }
 0x206   :  { %s6370_s7 = sshll.u32 %s8584_s6, 4  ;;  %s6371_s7 = int_to_ptr.vmem [resolvable:$true] %s6370_s7 }
 0x207   :  { %5276 = vmatpush1.bf16.msra.mxu0 %v8121_v61  ;;  %5809 = vmatpush1.bf16.msra.mxu1 %v8124_v62  ;;  %v8216_v61 = vld [vmem:[%s11225_s1 + $0x120c] ss:$16 sps:$4 sm:$0xff]   ;;  %v10454_v62 = vrot.slane %v10237_v51, %v8750_v49  ;;  %s8558_s8 = scalar_lea.vmem %s6371_s7, 32  ;;  %p8563_p1 = scmp.lt.s32.totalorder %s6371_s7, %s6371_s7 }
 0x208   :  { %5277 = vmatprep.subr.bf16.mxu0 %v8129_v63  ;;  %5810 = vmatprep.subr.bf16.mxu1 %v8132_v0  ;;  %v8211_v63 = vld [vmem:[%s11225_s1 + $0x1200] ss:$16 sps:$4 sm:$0xff]   ;;  %v8214_v0 = vld [vmem:[%s11225_s1 + $0x1208] ss:$16 sps:$4 sm:$0xff]   ;;  %v8222_v51 = vld [vmem:[%s11225_s1 + $0x122c] ss:$16 sps:$4 sm:$0xff]   ;;  %p8559_p0 = scmp.ne.s32.totalorder %s6371_s7, %s8558_s8  ;;  %p8564_p2 = scmp.lt.s32.totalorder %s8558_s8, %s8558_s8 }
 0x20a   :  { %p8565_p3 = por %p8564_p2, %p8563_p1 }
 0x20b   :  { %5278 = vmatpush1.bf16.msra.mxu0 %v8127_v1  ;;  %5811 = vmatpush1.bf16.msra.mxu1 %v8130_v2  ;;  %v8219_v1 = vld [vmem:[%s11225_s1 + $0x1224] ss:$16 sps:$4 sm:$0xff]   ;;  %v981_v2 = vcombine.high %v10268_v60, %v10268_v60 }
 0x20c   :  { %5279 = vmatprep.subr.bf16.mxu0 %v8135_v3  ;;  %5812 = vmatprep.subr.bf16.mxu1 %v8138_v4  ;;  %v8217_v3 = vld [vmem:[%s11225_s1 + $0x1220] ss:$16 sps:$4 sm:$0xff]   ;;  %v8220_v4 = vld [vmem:[%s11225_s1 + $0x1228] ss:$16 sps:$4 sm:$0xff]   ;;  %v8225_v60 = vld [vmem:[%s11225_s1 + $0x1244] ss:$16 sps:$4 sm:$0xff]   ;;  %p8566_p4 = pnand %p8565_p3, %p8559_p0 }
 0x20f   :  { %5280 = vmatpush1.bf16.msra.mxu0 %v8133_v5  ;;  %5813 = vmatpush1.bf16.msra.mxu1 %v8136_v6  ;;  %v8228_v5 = vld [vmem:[%s11225_s1 + $0x124c] ss:$16 sps:$4 sm:$0xff]   ;;  %v8223_v6 = vld [vmem:[%s11225_s1 + $0x1240] ss:$16 sps:$4 sm:$0xff]  }
 0x210   :  { %5281 = vmatprep.subr.bf16.mxu0 %v8141_v7  ;;  %5814 = vmatprep.subr.bf16.mxu1 %v8144_v8  ;;  %v8226_v7 = vld [vmem:[%s11225_s1 + $0x1248] ss:$16 sps:$4 sm:$0xff]   ;;  %v8231_v8 = vld [vmem:[%s11225_s1 + $0x1264] ss:$16 sps:$4 sm:$0xff]  }
 0x213   :  { %5282 = vmatpush1.bf16.msra.mxu0 %v8139_v9  ;;  %5815 = vmatpush1.bf16.msra.mxu1 %v8142_v10  ;;  %v8234_v9 = vld [vmem:[%s11225_s1 + $0x126c] ss:$16 sps:$4 sm:$0xff]   ;;  %v8229_v10 = vld [vmem:[%s11225_s1 + $0x1260] ss:$16 sps:$4 sm:$0xff]  }
 0x214   :  { %5283 = vmatprep.subr.bf16.mxu0 %v8147_v11  ;;  %5816 = vmatprep.subr.bf16.mxu1 %v8150_v12  ;;  %v8232_v11 = vld [vmem:[%s11225_s1 + $0x1268] ss:$16 sps:$4 sm:$0xff]   ;;  %v8237_v12 = vld [vmem:[%s11225_s1 + $0x1284] ss:$16 sps:$4 sm:$0xff]  }
 0x217   :  { %5284 = vmatpush1.bf16.msra.mxu0 %v8145_v52  ;;  %5817 = vmatpush1.bf16.msra.mxu1 %v8148_v15  ;;  %v8240_v52 = vld [vmem:[%s11225_s1 + $0x128c] ss:$16 sps:$4 sm:$0xff]   ;;  %v8235_v15 = vld [vmem:[%s11225_s1 + $0x1280] ss:$16 sps:$4 sm:$0xff]  }
 0x218   :  { %5285 = vmatprep.subr.bf16.mxu0 %v8153_v16  ;;  %5818 = vmatprep.subr.bf16.mxu1 %v8156_v17  ;;  %v8238_v16 = vld [vmem:[%s11225_s1 + $0x1288] ss:$16 sps:$4 sm:$0xff]   ;;  %v8243_v17 = vld [vmem:[%s11225_s1 + $0x12a4] ss:$16 sps:$4 sm:$0xff]  }
 0x21b   :  { %5286 = vmatpush1.bf16.msra.mxu0 %v8151_v18  ;;  %5819 = vmatpush1.bf16.msra.mxu1 %v8154_v19  ;;  %v8246_v18 = vld [vmem:[%s11225_s1 + $0x12ac] ss:$16 sps:$4 sm:$0xff]   ;;  %v8241_v19 = vld [vmem:[%s11225_s1 + $0x12a0] ss:$16 sps:$4 sm:$0xff]  }
 0x21c   :  { %5287 = vmatprep.subr.bf16.mxu0 %v8159_v20  ;;  %5820 = vmatprep.subr.bf16.mxu1 %v8162_v22  ;;  %v8244_v20 = vld [vmem:[%s11225_s1 + $0x12a8] ss:$16 sps:$4 sm:$0xff]   ;;  %v8249_v22 = vld [vmem:[%s11225_s1 + $0x12c4] ss:$16 sps:$4 sm:$0xff]  }
 0x21f   :  { %5288 = vmatpush1.bf16.msra.mxu0 %v8157_v23  ;;  %5821 = vmatpush1.bf16.msra.mxu1 %v8160_v24  ;;  %v8252_v23 = vld [vmem:[%s11225_s1 + $0x12cc] ss:$16 sps:$4 sm:$0xff]   ;;  %v8247_v24 = vld [vmem:[%s11225_s1 + $0x12c0] ss:$16 sps:$4 sm:$0xff]  }
 0x220   :  { %5289 = vmatprep.subr.bf16.mxu0 %v8165_v13  ;;  %5822 = vmatprep.subr.bf16.mxu1 %v8168_v27  ;;  %v8250_v13 = vld [vmem:[%s11225_s1 + $0x12c8] ss:$16 sps:$4 sm:$0xff]   ;;  %v8255_v27 = vld [vmem:[%s11225_s1 + $0x12e4] ss:$16 sps:$4 sm:$0xff]  }
 0x223   :  { %5290 = vmatpush1.bf16.msra.mxu0 %v8163_v28  ;;  %5823 = vmatpush1.bf16.msra.mxu1 %v8166_v29  ;;  %v8258_v28 = vld [vmem:[%s11225_s1 + $0x12ec] ss:$16 sps:$4 sm:$0xff]   ;;  %v8253_v29 = vld [vmem:[%s11225_s1 + $0x12e0] ss:$16 sps:$4 sm:$0xff]  }
 0x224   :  { %5291 = vmatprep.subr.bf16.mxu0 %v8171_v14  ;;  %5824 = vmatprep.subr.bf16.mxu1 %v8174_v30  ;;  %v8256_v14 = vld [vmem:[%s11225_s1 + $0x12e8] ss:$16 sps:$4 sm:$0xff]   ;;  %v8261_v30 = vld [vmem:[%s11225_s1 + $0x1304] ss:$16 sps:$4 sm:$0xff]  }
 0x227   :  { %5292 = vmatpush1.bf16.msra.mxu0 %v8169_v31  ;;  %5825 = vmatpush1.bf16.msra.mxu1 %v8172_v25  ;;  %v8264_v31 = vld [vmem:[%s11225_s1 + $0x130c] ss:$16 sps:$4 sm:$0xff]   ;;  %v8259_v25 = vld [vmem:[%s11225_s1 + $0x1300] ss:$16 sps:$4 sm:$0xff]  }
 0x228   :  { %5293 = vmatprep.subr.bf16.mxu0 %v8177_v32  ;;  %5826 = vmatprep.subr.bf16.mxu1 %v8180_v33  ;;  %v8262_v32 = vld [vmem:[%s11225_s1 + $0x1308] ss:$16 sps:$4 sm:$0xff]   ;;  %v8267_v33 = vld [vmem:[%s11225_s1 + $0x1324] ss:$16 sps:$4 sm:$0xff]  }
 0x22b   :  { %5294 = vmatpush1.bf16.msra.mxu0 %v8175_v26  ;;  %5827 = vmatpush1.bf16.msra.mxu1 %v8178_v36  ;;  %v8270_v26 = vld [vmem:[%s11225_s1 + $0x132c] ss:$16 sps:$4 sm:$0xff]   ;;  %v8265_v36 = vld [vmem:[%s11225_s1 + $0x1320] ss:$16 sps:$4 sm:$0xff]  }
 0x22c   :  { %5295 = vmatprep.subr.bf16.mxu0 %v8183_v37  ;;  %5828 = vmatprep.subr.bf16.mxu1 %v8186_v21  ;;  %v8268_v37 = vld [vmem:[%s11225_s1 + $0x1328] ss:$16 sps:$4 sm:$0xff]   ;;  %v8273_v21 = vld [vmem:[%s11225_s1 + $0x1344] ss:$16 sps:$4 sm:$0xff]  }
 0x22f   :  { %5296 = vmatpush1.bf16.msra.mxu0 %v8181_v39  ;;  %5829 = vmatpush1.bf16.msra.mxu1 %v8184_v40  ;;  %v8276_v39 = vld [vmem:[%s11225_s1 + $0x134c] ss:$16 sps:$4 sm:$0xff]   ;;  %v8271_v40 = vld [vmem:[%s11225_s1 + $0x1340] ss:$16 sps:$4 sm:$0xff]  }
 0x230   :  { %5297 = vmatprep.subr.bf16.mxu0 %v8189_v41  ;;  %5830 = vmatprep.subr.bf16.mxu1 %v8192_v34  ;;  %v8274_v41 = vld [vmem:[%s11225_s1 + $0x1348] ss:$16 sps:$4 sm:$0xff]   ;;  %v8279_v34 = vld [vmem:[%s11225_s1 + $0x1364] ss:$16 sps:$4 sm:$0xff]  }
 0x233   :  { %5298 = vmatpush1.bf16.msra.mxu0 %v8187_v43  ;;  %5831 = vmatpush1.bf16.msra.mxu1 %v8190_v45  ;;  %v8282_v43 = vld [vmem:[%s11225_s1 + $0x136c] ss:$16 sps:$4 sm:$0xff]   ;;  %v8277_v45 = vld [vmem:[%s11225_s1 + $0x1360] ss:$16 sps:$4 sm:$0xff]  }
 0x234   :  { %5299 = vmatprep.subr.bf16.mxu0 %v8195_v46  ;;  %5832 = vmatprep.subr.bf16.mxu1 %v8198_v35  ;;  %v8280_v46 = vld [vmem:[%s11225_s1 + $0x1368] ss:$16 sps:$4 sm:$0xff]   ;;  %v8285_v35 = vld [vmem:[%s11225_s1 + $0x1384] ss:$16 sps:$4 sm:$0xff]  }
 0x237   :  { %5300 = vmatpush1.bf16.msra.mxu0 %v8193_v50  ;;  %5833 = vmatpush1.bf16.msra.mxu1 %v8196_v53  ;;  %v8288_v50 = vld [vmem:[%s11225_s1 + $0x138c] ss:$16 sps:$4 sm:$0xff]   ;;  %v8283_v53 = vld [vmem:[%s11225_s1 + $0x1380] ss:$16 sps:$4 sm:$0xff]  }
 0x238   :  { %5301 = vmatprep.subr.bf16.mxu0 %v8201_v38  ;;  %5834 = vmatprep.subr.bf16.mxu1 %v8204_v54  ;;  %v8286_v38 = vld [vmem:[%s11225_s1 + $0x1388] ss:$16 sps:$4 sm:$0xff]   ;;  %v8291_v54 = vld [vmem:[%s11225_s1 + $0x13a4] ss:$16 sps:$4 sm:$0xff]  }
 0x23b   :  { %5302 = vmatpush1.bf16.msra.mxu0 %v8199_v55  ;;  %5835 = vmatpush1.bf16.msra.mxu1 %v8202_v56  ;;  %v8294_v55 = vld [vmem:[%s11225_s1 + $0x13ac] ss:$16 sps:$4 sm:$0xff]   ;;  %v8289_v56 = vld [vmem:[%s11225_s1 + $0x13a0] ss:$16 sps:$4 sm:$0xff]  }
 0x23c   :  { %5303 = vmatprep.subr.bf16.mxu0 %v8207_v47  ;;  %5836 = vmatprep.subr.bf16.mxu1 %v8210_v57  ;;  %v8292_v47 = vld [vmem:[%s11225_s1 + $0x13a8] ss:$16 sps:$4 sm:$0xff]   ;;  %v8297_v57 = vld [vmem:[%s11225_s1 + $0x13c4] ss:$16 sps:$4 sm:$0xff]  }
 0x23f   :  { %5304 = vmatpush1.bf16.msra.mxu0 %v8205_v58  ;;  %5837 = vmatpush1.bf16.msra.mxu1 %v8208_v59  ;;  %v8300_v58 = vld [vmem:[%s11225_s1 + $0x13cc] ss:$16 sps:$4 sm:$0xff]   ;;  %v934_v59 = vcombine.high %v10221_v44, %v10221_v44 }
 0x240   :  { %5314 = vmatprep.subr.bf16.mxu0 %v8213_v48  ;;  %5847 = vmatprep.subr.bf16.mxu1 %v8216_v61  ;;  %v8295_v48 = vld [vmem:[%s11225_s1 + $0x13c0] ss:$16 sps:$4 sm:$0xff]   ;;  %v8298_v61 = vld [vmem:[%s11225_s1 + $0x13c8] ss:$16 sps:$4 sm:$0xff]   ;;  %v8306_v44 = vld [vmem:[%s11225_s1 + $0x13ec] ss:$16 sps:$4 sm:$0xff]  }
 0x242   :  { %5306 = vmatmul.mubr.bf16.vlgmr.msra.gmra.mrb[0].mxu0 %v10454_v62  ;;  %5839 = vmatmul.mubr.bf16.vlgmr.msra.gmra.mrb[0].mxu1 %v10454_v62 }
 0x243   :  { %5315 = vmatpush1.bf16.msra.mxu0 %v8211_v63  ;;  %5848 = vmatpush1.bf16.msra.mxu1 %v8214_v0  ;;  %v8303_v63 = vld [vmem:[%s11225_s1 + $0x13e4] ss:$16 sps:$4 sm:$0xff]   ;;  %v10643_v0 = vrot.slane %v934_v59, %v8750_v49  ;;  %v8382_v59 = vld [vmem:[%s11225_s1 + $0x1588] ss:$16 sps:$4 sm:$0xff]  }
 0x244   :  { %5316 = vmatprep.subr.bf16.mxu0 %v8219_v1  ;;  %5849 = vmatprep.subr.bf16.mxu1 %v8222_v51  ;;  %v8301_v1 = vld [vmem:[%s11225_s1 + $0x13e0] ss:$16 sps:$4 sm:$0xff]   ;;  %v8304_v51 = vld [vmem:[%s11225_s1 + $0x13e8] ss:$16 sps:$4 sm:$0xff]  }
 0x245   :  { %5346 = vmatprep.mubr.bf16.mxu0 %v981_v2  ;;  %5879 = vmatprep.mubr.bf16.mxu1 %v981_v2  ;;  %v8309_v2 = vld [vmem:[%s11225_s1 + $0x1404] ss:$16 sps:$4 sm:$0xff]  }
 0x247   :  { %5317 = vmatpush1.bf16.msra.mxu0 %v8217_v3  ;;  %5850 = vmatpush1.bf16.msra.mxu1 %v8220_v4  ;;  %v8312_v3 = vld [vmem:[%s11225_s1 + $0x140c] ss:$16 sps:$4 sm:$0xff]   ;;  %v950_v4 = vcombine.high %v10643_v0, %v10643_v0 }
 0x248   :  { %5318 = vmatprep.subr.bf16.mxu0 %v8225_v60  ;;  %5851 = vmatprep.subr.bf16.mxu1 %v8228_v5  ;;  %v979_v60 = vcombine.high %v10454_v62, %v10454_v62  ;;  %v8307_v5 = vld [vmem:[%s11225_s1 + $0x1400] ss:$16 sps:$4 sm:$0xff]   ;;  %v8318_v62 = vld [vmem:[%s11225_s1 + $0x142c] ss:$16 sps:$4 sm:$0xff]  }
 0x24b   :  { %5319 = vmatpush1.bf16.msra.mxu0 %v8223_v6  ;;  %5852 = vmatpush1.bf16.msra.mxu1 %v8226_v7  ;;  %v8310_v6 = vld [vmem:[%s11225_s1 + $0x1408] ss:$16 sps:$4 sm:$0xff]   ;;  %v8315_v7 = vld [vmem:[%s11225_s1 + $0x1424] ss:$16 sps:$4 sm:$0xff]  }
 0x24c   :  { %5320 = vmatprep.subr.bf16.mxu0 %v8231_v8  ;;  %5853 = vmatprep.subr.bf16.mxu1 %v8234_v9  ;;  %v10674_v8 = vrot.slane %v950_v4, %v8750_v49  ;;  %v8313_v9 = vld [vmem:[%s11225_s1 + $0x1420] ss:$16 sps:$4 sm:$0xff]   ;;  %v8399_v4 = vld [vmem:[%s11225_s1 + $0x15e4] ss:$16 sps:$4 sm:$0xff]  }
 0x24f   :  { %5321 = vmatpush1.bf16.msra.mxu0 %v8229_v10  ;;  %5854 = vmatpush1.bf16.msra.mxu1 %v8232_v11  ;;  %v8316_v10 = vld [vmem:[%s11225_s1 + $0x1428] ss:$16 sps:$4 sm:$0xff]   ;;  %v8321_v11 = vld [vmem:[%s11225_s1 + $0x1444] ss:$16 sps:$4 sm:$0xff]  }
 0x250   :  { %5322 = vmatprep.subr.bf16.mxu0 %v8237_v12  ;;  %5855 = vmatprep.subr.bf16.mxu1 %v8240_v52  ;;  %v8324_v12 = vld [vmem:[%s11225_s1 + $0x144c] ss:$16 sps:$4 sm:$0xff]   ;;  %v8319_v52 = vld [vmem:[%s11225_s1 + $0x1440] ss:$16 sps:$4 sm:$0xff]  }
 0x253   :  { %5323 = vmatpush1.bf16.msra.mxu0 %v8235_v15  ;;  %5856 = vmatpush1.bf16.msra.mxu1 %v8238_v16  ;;  %v8322_v15 = vld [vmem:[%s11225_s1 + $0x1448] ss:$16 sps:$4 sm:$0xff]   ;;  %v8327_v16 = vld [vmem:[%s11225_s1 + $0x1464] ss:$16 sps:$4 sm:$0xff]  }
 0x254   :  { %5324 = vmatprep.subr.bf16.mxu0 %v8243_v17  ;;  %5857 = vmatprep.subr.bf16.mxu1 %v8246_v18  ;;  %v8330_v17 = vld [vmem:[%s11225_s1 + $0x146c] ss:$16 sps:$4 sm:$0xff]   ;;  %v8325_v18 = vld [vmem:[%s11225_s1 + $0x1460] ss:$16 sps:$4 sm:$0xff]  }
 0x257   :  { %5325 = vmatpush1.bf16.msra.mxu0 %v8241_v19  ;;  %5858 = vmatpush1.bf16.msra.mxu1 %v8244_v20  ;;  %v8328_v19 = vld [vmem:[%s11225_s1 + $0x1468] ss:$16 sps:$4 sm:$0xff]   ;;  %v8333_v20 = vld [vmem:[%s11225_s1 + $0x1484] ss:$16 sps:$4 sm:$0xff]  }
 0x258   :  { %5326 = vmatprep.subr.bf16.mxu0 %v8249_v22  ;;  %5859 = vmatprep.subr.bf16.mxu1 %v8252_v23  ;;  %v8336_v22 = vld [vmem:[%s11225_s1 + $0x148c] ss:$16 sps:$4 sm:$0xff]   ;;  %v8331_v23 = vld [vmem:[%s11225_s1 + $0x1480] ss:$16 sps:$4 sm:$0xff]  }
 0x25b   :  { %5327 = vmatpush1.bf16.msra.mxu0 %v8247_v24  ;;  %5860 = vmatpush1.bf16.msra.mxu1 %v8250_v13  ;;  %v8334_v24 = vld [vmem:[%s11225_s1 + $0x1488] ss:$16 sps:$4 sm:$0xff]   ;;  %v8339_v13 = vld [vmem:[%s11225_s1 + $0x14a4] ss:$16 sps:$4 sm:$0xff]  }
 0x25c   :  { %5328 = vmatprep.subr.bf16.mxu0 %v8255_v27  ;;  %5861 = vmatprep.subr.bf16.mxu1 %v8258_v28  ;;  %v8342_v27 = vld [vmem:[%s11225_s1 + $0x14ac] ss:$16 sps:$4 sm:$0xff]   ;;  %v8337_v28 = vld [vmem:[%s11225_s1 + $0x14a0] ss:$16 sps:$4 sm:$0xff]  }
 0x25f   :  { %5329 = vmatpush1.bf16.msra.mxu0 %v8253_v29  ;;  %5862 = vmatpush1.bf16.msra.mxu1 %v8256_v14  ;;  %v8340_v29 = vld [vmem:[%s11225_s1 + $0x14a8] ss:$16 sps:$4 sm:$0xff]   ;;  %v8345_v14 = vld [vmem:[%s11225_s1 + $0x14c4] ss:$16 sps:$4 sm:$0xff]  }
 0x260   :  { %5330 = vmatprep.subr.bf16.mxu0 %v8261_v30  ;;  %5863 = vmatprep.subr.bf16.mxu1 %v8264_v31  ;;  %v8348_v30 = vld [vmem:[%s11225_s1 + $0x14cc] ss:$16 sps:$4 sm:$0xff]   ;;  %v8343_v31 = vld [vmem:[%s11225_s1 + $0x14c0] ss:$16 sps:$4 sm:$0xff]  }
 0x263   :  { %5331 = vmatpush1.bf16.msra.mxu0 %v8259_v25  ;;  %5864 = vmatpush1.bf16.msra.mxu1 %v8262_v32  ;;  %v8346_v25 = vld [vmem:[%s11225_s1 + $0x14c8] ss:$16 sps:$4 sm:$0xff]   ;;  %v8351_v32 = vld [vmem:[%s11225_s1 + $0x14e4] ss:$16 sps:$4 sm:$0xff]  }
 0x264   :  { %5332 = vmatprep.subr.bf16.mxu0 %v8267_v33  ;;  %5865 = vmatprep.subr.bf16.mxu1 %v8270_v26  ;;  %v8354_v33 = vld [vmem:[%s11225_s1 + $0x14ec] ss:$16 sps:$4 sm:$0xff]   ;;  %v8349_v26 = vld [vmem:[%s11225_s1 + $0x14e0] ss:$16 sps:$4 sm:$0xff]  }
 0x267   :  { %5333 = vmatpush1.bf16.msra.mxu0 %v8265_v36  ;;  %5866 = vmatpush1.bf16.msra.mxu1 %v8268_v37  ;;  %v8352_v36 = vld [vmem:[%s11225_s1 + $0x14e8] ss:$16 sps:$4 sm:$0xff]   ;;  %v8357_v37 = vld [vmem:[%s11225_s1 + $0x1504] ss:$16 sps:$4 sm:$0xff]  }
 0x268   :  { %5334 = vmatprep.subr.bf16.mxu0 %v8273_v21  ;;  %5867 = vmatprep.subr.bf16.mxu1 %v8276_v39  ;;  %v8360_v21 = vld [vmem:[%s11225_s1 + $0x150c] ss:$16 sps:$4 sm:$0xff]   ;;  %v8355_v39 = vld [vmem:[%s11225_s1 + $0x1500] ss:$16 sps:$4 sm:$0xff]  }
 0x26b   :  { %5335 = vmatpush1.bf16.msra.mxu0 %v8271_v40  ;;  %5868 = vmatpush1.bf16.msra.mxu1 %v8274_v41  ;;  %v8358_v40 = vld [vmem:[%s11225_s1 + $0x1508] ss:$16 sps:$4 sm:$0xff]   ;;  %v8363_v41 = vld [vmem:[%s11225_s1 + $0x1524] ss:$16 sps:$4 sm:$0xff]  }
 0x26c   :  { %5336 = vmatprep.subr.bf16.mxu0 %v8279_v34  ;;  %5869 = vmatprep.subr.bf16.mxu1 %v8282_v43  ;;  %v8366_v34 = vld [vmem:[%s11225_s1 + $0x152c] ss:$16 sps:$4 sm:$0xff]   ;;  %v8361_v43 = vld [vmem:[%s11225_s1 + $0x1520] ss:$16 sps:$4 sm:$0xff]  }
 0x26f   :  { %5337 = vmatpush1.bf16.msra.mxu0 %v8277_v45  ;;  %5870 = vmatpush1.bf16.msra.mxu1 %v8280_v46  ;;  %v8364_v45 = vld [vmem:[%s11225_s1 + $0x1528] ss:$16 sps:$4 sm:$0xff]   ;;  %v8369_v46 = vld [vmem:[%s11225_s1 + $0x1544] ss:$16 sps:$4 sm:$0xff]  }
 0x270   :  { %5338 = vmatprep.subr.bf16.mxu0 %v8285_v35  ;;  %5871 = vmatprep.subr.bf16.mxu1 %v8288_v50  ;;  %v8372_v35 = vld [vmem:[%s11225_s1 + $0x154c] ss:$16 sps:$4 sm:$0xff]   ;;  %v8367_v50 = vld [vmem:[%s11225_s1 + $0x1540] ss:$16 sps:$4 sm:$0xff]  }
 0x273   :  { %5339 = vmatpush1.bf16.msra.mxu0 %v8283_v53  ;;  %5872 = vmatpush1.bf16.msra.mxu1 %v8286_v38  ;;  %v8370_v53 = vld [vmem:[%s11225_s1 + $0x1548] ss:$16 sps:$4 sm:$0xff]   ;;  %v8375_v38 = vld [vmem:[%s11225_s1 + $0x1564] ss:$16 sps:$4 sm:$0xff]  }
 0x274   :  { %5340 = vmatprep.subr.bf16.mxu0 %v8291_v54  ;;  %5873 = vmatprep.subr.bf16.mxu1 %v8294_v55  ;;  %v8378_v54 = vld [vmem:[%s11225_s1 + $0x156c] ss:$16 sps:$4 sm:$0xff]   ;;  %v8373_v55 = vld [vmem:[%s11225_s1 + $0x1560] ss:$16 sps:$4 sm:$0xff]  }
 0x277   :  { %5341 = vmatpush1.bf16.msra.mxu0 %v8289_v56  ;;  %5874 = vmatpush1.bf16.msra.mxu1 %v8292_v47  ;;  %v8376_v56 = vld [vmem:[%s11225_s1 + $0x1568] ss:$16 sps:$4 sm:$0xff]   ;;  %v8381_v47 = vld [vmem:[%s11225_s1 + $0x1584] ss:$16 sps:$4 sm:$0xff]  }
 0x278   :  { %5342 = vmatprep.subr.bf16.mxu0 %v8297_v57  ;;  %5875 = vmatprep.subr.bf16.mxu1 %v8300_v58  ;;  %v8384_v57 = vld [vmem:[%s11225_s1 + $0x158c] ss:$16 sps:$4 sm:$0xff]   ;;  %v8379_v58 = vld [vmem:[%s11225_s1 + $0x1580] ss:$16 sps:$4 sm:$0xff]  }
 0x27b   :  { %5343 = vmatpush1.bf16.msra.mxu0 %v8295_v48  ;;  %5876 = vmatpush1.bf16.msra.mxu1 %v8298_v61  ;;  %v8387_v48 = vld [vmem:[%s11225_s1 + $0x15a4] ss:$16 sps:$4 sm:$0xff]   ;;  %v8390_v61 = vld [vmem:[%s11225_s1 + $0x15ac] ss:$16 sps:$4 sm:$0xff]  }
 0x27c   :  { %5344 = vmatprep.subr.bf16.mxu0 %v8303_v63  ;;  %5877 = vmatprep.subr.bf16.mxu1 %v8306_v44  ;;  %v8385_v63 = vld [vmem:[%s11225_s1 + $0x15a0] ss:$16 sps:$4 sm:$0xff]   ;;  %v8388_v44 = vld [vmem:[%s11225_s1 + $0x15a8] ss:$16 sps:$4 sm:$0xff]  }
 0x27f   :  { %5345 = vmatpush1.bf16.msra.mxu0 %v8301_v1  ;;  %5878 = vmatpush1.bf16.msra.mxu1 %v8304_v51  ;;  %v8393_v1 = vld [vmem:[%s11225_s1 + $0x15c4] ss:$16 sps:$4 sm:$0xff]   ;;  %v8396_v51 = vld [vmem:[%s11225_s1 + $0x15cc] ss:$16 sps:$4 sm:$0xff]  }
 0x280   :  { %5355 = vmatprep.subr.bf16.mxu0 %v8309_v2  ;;  %5888 = vmatprep.subr.bf16.mxu1 %v8312_v3  ;;  %v8391_v2 = vld [vmem:[%s11225_s1 + $0x15c0] ss:$16 sps:$4 sm:$0xff]   ;;  %v8394_v3 = vld [vmem:[%s11225_s1 + $0x15c8] ss:$16 sps:$4 sm:$0xff]  }
 0x282   :  { %5347 = vmatmul.mubr.bf16.vlgmr.msra.gmra.mrb[0].mxu0 %v979_v60  ;;  %5880 = vmatmul.mubr.bf16.vlgmr.msra.gmra.mrb[0].mxu1 %v979_v60  ;;  %v8402_v60 = vld [vmem:[%s11225_s1 + $0x15ec] ss:$16 sps:$4 sm:$0xff]  }
 0x283   :  { %5356 = vmatpush1.bf16.msra.mxu0 %v8307_v5  ;;  %5889 = vmatpush1.bf16.msra.mxu1 %v8310_v6  ;;  %v8397_v5 = vld [vmem:[%s11225_s1 + $0x15e0] ss:$16 sps:$4 sm:$0xff]   ;;  %v8400_v6 = vld [vmem:[%s11225_s1 + $0x15e8] ss:$16 sps:$4 sm:$0xff]  }
 0x284   :  { %5357 = vmatprep.subr.bf16.mxu0 %v8315_v7  ;;  %5890 = vmatprep.subr.bf16.mxu1 %v8318_v62  ;;  %v8406_v7 = vld [vmem:[%s11225_s1 + $0x1604] ss:$16 sps:$4 sm:$0xff]   ;;  %v8409_v62 = vld [vmem:[%s11225_s1 + $0x160c] ss:$16 sps:$4 sm:$0xff]  }
 0x285   :  { %5387 = vmatprep.mubr.bf16.mxu0 %v10674_v8  ;;  %5920 = vmatprep.mubr.bf16.mxu1 %v10674_v8 }
 0x287   :  { %5358 = vmatpush1.bf16.msra.mxu0 %v8313_v9  ;;  %5891 = vmatpush1.bf16.msra.mxu1 %v8316_v10  ;;  %v10860_v9 = vrot.slane %v10643_v0, %v8750_v49  ;;  %v8404_v10 = vld [vmem:[%s11225_s1 + $0x1600] ss:$16 sps:$4 sm:$0xff]   ;;  %v8415_v0 = vld [vmem:[%s11225_s1 + $0x162c] ss:$16 sps:$4 sm:$0xff]  }
 0x288   :  { %5359 = vmatprep.subr.bf16.mxu0 %v8321_v11  ;;  %5892 = vmatprep.subr.bf16.mxu1 %v8324_v12  ;;  %v8407_v11 = vld [vmem:[%s11225_s1 + $0x1608] ss:$16 sps:$4 sm:$0xff]   ;;  %v8412_v12 = vld [vmem:[%s11225_s1 + $0x1624] ss:$16 sps:$4 sm:$0xff]  }
 0x28b   :  { %5360 = vmatpush1.bf16.msra.mxu0 %v8319_v52  ;;  %5893 = vmatpush1.bf16.msra.mxu1 %v8322_v15  ;;  %v982_v52 = vcombine.high %v10674_v8, %v10674_v8  ;;  %v8410_v15 = vld [vmem:[%s11225_s1 + $0x1620] ss:$16 sps:$4 sm:$0xff]   ;;  %v8418_v8 = vld [vmem:[%s11225_s1 + $0x1644] ss:$16 sps:$4 sm:$0xff]  }
 0x28c   :  { %5361 = vmatprep.subr.bf16.mxu0 %v8327_v16  ;;  %5894 = vmatprep.subr.bf16.mxu1 %v8330_v17  ;;  %v8413_v16 = vld [vmem:[%s11225_s1 + $0x1628] ss:$16 sps:$4 sm:$0xff]   ;;  %v8421_v17 = vld [vmem:[%s11225_s1 + $0x164c] ss:$16 sps:$4 sm:$0xff]  }
 0x28f   :  { %5362 = vmatpush1.bf16.msra.mxu0 %v8325_v18  ;;  %5895 = vmatpush1.bf16.msra.mxu1 %v8328_v19  ;;  %v8416_v18 = vld [vmem:[%s11225_s1 + $0x1640] ss:$16 sps:$4 sm:$0xff]   ;;  %v8419_v19 = vld [vmem:[%s11225_s1 + $0x1648] ss:$16 sps:$4 sm:$0xff]  }
 0x290   :  { %5363 = vmatprep.subr.bf16.mxu0 %v8333_v20  ;;  %5896 = vmatprep.subr.bf16.mxu1 %v8336_v22  ;;  %v8424_v20 = vld [vmem:[%s11225_s1 + $0x1664] ss:$16 sps:$4 sm:$0xff]   ;;  %v8427_v22 = vld [vmem:[%s11225_s1 + $0x166c] ss:$16 sps:$4 sm:$0xff]  }
 0x293   :  { %5364 = vmatpush1.bf16.msra.mxu0 %v8331_v23  ;;  %5897 = vmatpush1.bf16.msra.mxu1 %v8334_v24  ;;  %v8422_v23 = vld [vmem:[%s11225_s1 + $0x1660] ss:$16 sps:$4 sm:$0xff]   ;;  %v8425_v24 = vld [vmem:[%s11225_s1 + $0x1668] ss:$16 sps:$4 sm:$0xff]  }
 0x294   :  { %5365 = vmatprep.subr.bf16.mxu0 %v8339_v13  ;;  %5898 = vmatprep.subr.bf16.mxu1 %v8342_v27  ;;  %v8430_v13 = vld [vmem:[%s11225_s1 + $0x1684] ss:$16 sps:$4 sm:$0xff]   ;;  %v8433_v27 = vld [vmem:[%s11225_s1 + $0x168c] ss:$16 sps:$4 sm:$0xff]  }
 0x297   :  { %5366 = vmatpush1.bf16.msra.mxu0 %v8337_v28  ;;  %5899 = vmatpush1.bf16.msra.mxu1 %v8340_v29  ;;  %v8428_v28 = vld [vmem:[%s11225_s1 + $0x1680] ss:$16 sps:$4 sm:$0xff]   ;;  %v8431_v29 = vld [vmem:[%s11225_s1 + $0x1688] ss:$16 sps:$4 sm:$0xff]  }
 0x298   :  { %5367 = vmatprep.subr.bf16.mxu0 %v8345_v14  ;;  %5900 = vmatprep.subr.bf16.mxu1 %v8348_v30  ;;  %v8436_v14 = vld [vmem:[%s11225_s1 + $0x16a4] ss:$16 sps:$4 sm:$0xff]   ;;  %v8439_v30 = vld [vmem:[%s11225_s1 + $0x16ac] ss:$16 sps:$4 sm:$0xff]  }
 0x29b   :  { %5368 = vmatpush1.bf16.msra.mxu0 %v8343_v31  ;;  %5901 = vmatpush1.bf16.msra.mxu1 %v8346_v25  ;;  %v8434_v31 = vld [vmem:[%s11225_s1 + $0x16a0] ss:$16 sps:$4 sm:$0xff]   ;;  %v8437_v25 = vld [vmem:[%s11225_s1 + $0x16a8] ss:$16 sps:$4 sm:$0xff]  }
 0x29c   :  { %5369 = vmatprep.subr.bf16.mxu0 %v8351_v32  ;;  %5902 = vmatprep.subr.bf16.mxu1 %v8354_v33  ;;  %v8442_v32 = vld [vmem:[%s11225_s1 + $0x16c4] ss:$16 sps:$4 sm:$0xff]   ;;  %v8445_v33 = vld [vmem:[%s11225_s1 + $0x16cc] ss:$16 sps:$4 sm:$0xff]  }
 0x29f   :  { %5370 = vmatpush1.bf16.msra.mxu0 %v8349_v26  ;;  %5903 = vmatpush1.bf16.msra.mxu1 %v8352_v36  ;;  %v8440_v26 = vld [vmem:[%s11225_s1 + $0x16c0] ss:$16 sps:$4 sm:$0xff]   ;;  %v8443_v36 = vld [vmem:[%s11225_s1 + $0x16c8] ss:$16 sps:$4 sm:$0xff]  }
 0x2a0   :  { %5371 = vmatprep.subr.bf16.mxu0 %v8357_v37  ;;  %5904 = vmatprep.subr.bf16.mxu1 %v8360_v21  ;;  %v8448_v37 = vld [vmem:[%s11225_s1 + $0x16e4] ss:$16 sps:$4 sm:$0xff]   ;;  %v8451_v21 = vld [vmem:[%s11225_s1 + $0x16ec] ss:$16 sps:$4 sm:$0xff]  }
 0x2a3   :  { %5372 = vmatpush1.bf16.msra.mxu0 %v8355_v39  ;;  %5905 = vmatpush1.bf16.msra.mxu1 %v8358_v40  ;;  %v8446_v39 = vld [vmem:[%s11225_s1 + $0x16e0] ss:$16 sps:$4 sm:$0xff]   ;;  %v8449_v40 = vld [vmem:[%s11225_s1 + $0x16e8] ss:$16 sps:$4 sm:$0xff]  }
 0x2a4   :  { %5373 = vmatprep.subr.bf16.mxu0 %v8363_v41  ;;  %5906 = vmatprep.subr.bf16.mxu1 %v8366_v34  ;;  %v8454_v41 = vld [vmem:[%s11225_s1 + $0x1704] ss:$16 sps:$4 sm:$0xff]   ;;  %v8457_v34 = vld [vmem:[%s11225_s1 + $0x170c] ss:$16 sps:$4 sm:$0xff]  }
 0x2a7   :  { %5374 = vmatpush1.bf16.msra.mxu0 %v8361_v43  ;;  %5907 = vmatpush1.bf16.msra.mxu1 %v8364_v45  ;;  %v8452_v43 = vld [vmem:[%s11225_s1 + $0x1700] ss:$16 sps:$4 sm:$0xff]   ;;  %v8455_v45 = vld [vmem:[%s11225_s1 + $0x1708] ss:$16 sps:$4 sm:$0xff]  }
 0x2a8   :  { %5375 = vmatprep.subr.bf16.mxu0 %v8369_v46  ;;  %5908 = vmatprep.subr.bf16.mxu1 %v8372_v35  ;;  %v8460_v46 = vld [vmem:[%s11225_s1 + $0x1724] ss:$16 sps:$4 sm:$0xff]   ;;  %v8463_v35 = vld [vmem:[%s11225_s1 + $0x172c] ss:$16 sps:$4 sm:$0xff]  }
 0x2ab   :  { %5376 = vmatpush1.bf16.msra.mxu0 %v8367_v50  ;;  %5909 = vmatpush1.bf16.msra.mxu1 %v8370_v53  ;;  %v8458_v50 = vld [vmem:[%s11225_s1 + $0x1720] ss:$16 sps:$4 sm:$0xff]   ;;  %v8461_v53 = vld [vmem:[%s11225_s1 + $0x1728] ss:$16 sps:$4 sm:$0xff]  }
 0x2ac   :  { %5377 = vmatprep.subr.bf16.mxu0 %v8375_v38  ;;  %5910 = vmatprep.subr.bf16.mxu1 %v8378_v54  ;;  %v8466_v38 = vld [vmem:[%s11225_s1 + $0x1744] ss:$16 sps:$4 sm:$0xff]   ;;  %v8469_v54 = vld [vmem:[%s11225_s1 + $0x174c] ss:$16 sps:$4 sm:$0xff]  }
 0x2af   :  { %5378 = vmatpush1.bf16.msra.mxu0 %v8373_v55  ;;  %5911 = vmatpush1.bf16.msra.mxu1 %v8376_v56  ;;  %v8464_v55 = vld [vmem:[%s11225_s1 + $0x1740] ss:$16 sps:$4 sm:$0xff]   ;;  %v8467_v56 = vld [vmem:[%s11225_s1 + $0x1748] ss:$16 sps:$4 sm:$0xff]  }
 0x2b0   :  { %5379 = vmatprep.subr.bf16.mxu0 %v8381_v47  ;;  %5912 = vmatprep.subr.bf16.mxu1 %v8384_v57  ;;  %v8472_v47 = vld [vmem:[%s11225_s1 + $0x1764] ss:$16 sps:$4 sm:$0xff]   ;;  %v8475_v57 = vld [vmem:[%s11225_s1 + $0x176c] ss:$16 sps:$4 sm:$0xff]  }
 0x2b3   :  { %5380 = vmatpush1.bf16.msra.mxu0 %v8379_v58  ;;  %5913 = vmatpush1.bf16.msra.mxu1 %v8382_v59  ;;  %v8470_v58 = vld [vmem:[%s11225_s1 + $0x1760] ss:$16 sps:$4 sm:$0xff]   ;;  %v8473_v59 = vld [vmem:[%s11225_s1 + $0x1768] ss:$16 sps:$4 sm:$0xff]  }
 0x2b4   :  { %5381 = vmatprep.subr.bf16.mxu0 %v8387_v48  ;;  %5914 = vmatprep.subr.bf16.mxu1 %v8390_v61  ;;  %v8478_v48 = vld [vmem:[%s11225_s1 + $0x1784] ss:$16 sps:$4 sm:$0xff]   ;;  %v8481_v61 = vld [vmem:[%s11225_s1 + $0x178c] ss:$16 sps:$4 sm:$0xff]  }
 0x2b7   :  { %5382 = vmatpush1.bf16.msra.mxu0 %v8385_v63  ;;  %5915 = vmatpush1.bf16.msra.mxu1 %v8388_v44  ;;  %v8476_v63 = vld [vmem:[%s11225_s1 + $0x1780] ss:$16 sps:$4 sm:$0xff]   ;;  %v8479_v44 = vld [vmem:[%s11225_s1 + $0x1788] ss:$16 sps:$4 sm:$0xff]  }
 0x2b8   :  { %5383 = vmatprep.subr.bf16.mxu0 %v8393_v1  ;;  %5916 = vmatprep.subr.bf16.mxu1 %v8396_v51  ;;  %v8484_v1 = vld [vmem:[%s11225_s1 + $0x17a4] ss:$16 sps:$4 sm:$0xff]   ;;  %v8487_v51 = vld [vmem:[%s11225_s1 + $0x17ac] ss:$16 sps:$4 sm:$0xff]  }
 0x2bb   :  { %5384 = vmatpush1.bf16.msra.mxu0 %v8391_v2  ;;  %5917 = vmatpush1.bf16.msra.mxu1 %v8394_v3  ;;  %v8482_v2 = vld [vmem:[%s11225_s1 + $0x17a0] ss:$16 sps:$4 sm:$0xff]   ;;  %v8485_v3 = vld [vmem:[%s11225_s1 + $0x17a8] ss:$16 sps:$4 sm:$0xff]  }
 0x2bc   :  { %5385 = vmatprep.subr.bf16.mxu0 %v8399_v4  ;;  %5918 = vmatprep.subr.bf16.mxu1 %v8402_v60  ;;  %v8490_v4 = vld [vmem:[%s11225_s1 + $0x17c4] ss:$16 sps:$4 sm:$0xff]   ;;  %v8493_v60 = vld [vmem:[%s11225_s1 + $0x17cc] ss:$16 sps:$4 sm:$0xff]  }
 0x2bf   :  { %5386 = vmatpush1.bf16.msra.mxu0 %v8397_v5  ;;  %5919 = vmatpush1.bf16.msra.mxu1 %v8400_v6  ;;  %v8488_v5 = vld [vmem:[%s11225_s1 + $0x17c0] ss:$16 sps:$4 sm:$0xff]   ;;  %v8491_v6 = vld [vmem:[%s11225_s1 + $0x17c8] ss:$16 sps:$4 sm:$0xff]  }
 0x2c0   :  { %5396 = vmatprep.subr.bf16.mxu0 %v8406_v7  ;;  %5929 = vmatprep.subr.bf16.mxu1 %v8409_v62  ;;  %v8496_v7 = vld [vmem:[%s11225_s1 + $0x17e4] ss:$16 sps:$4 sm:$0xff]   ;;  %v8499_v62 = vld [vmem:[%s11225_s1 + $0x17ec] ss:$16 sps:$4 sm:$0xff]  }
 0x2c2   :  { %5388 = vmatmul.mubr.bf16.vlgmr.msra.gmra.mrb[0].mxu0 %v10860_v9  ;;  %5921 = vmatmul.mubr.bf16.vlgmr.msra.gmra.mrb[0].mxu1 %v10860_v9 }
 0x2c3   :  { %5397 = vmatpush1.bf16.msra.mxu0 %v8404_v10  ;;  %5930 = vmatpush1.bf16.msra.mxu1 %v8407_v11  ;;  %v8494_v10 = vld [vmem:[%s11225_s1 + $0x17e0] ss:$16 sps:$4 sm:$0xff]   ;;  %v8497_v11 = vld [vmem:[%s11225_s1 + $0x17e8] ss:$16 sps:$4 sm:$0xff]  }
 0x2c4   :  { %5398 = vmatprep.subr.bf16.mxu0 %v8412_v12  ;;  %5931 = vmatprep.subr.bf16.mxu1 %v8415_v0  ;;  %v8502_v12 = vld [vmem:[%s11225_s1 + $0x1804] ss:$16 sps:$4 sm:$0xff]   ;;  %v8505_v0 = vld [vmem:[%s11225_s1 + $0x180c] ss:$16 sps:$4 sm:$0xff]  }
 0x2c5   :  { %5428 = vmatprep.mubr.bf16.mxu0 %v982_v52  ;;  %5961 = vmatprep.mubr.bf16.mxu1 %v982_v52  ;;  %v980_v52 = vcombine.high %v10860_v9, %v10860_v9  ;;  %v8511_v9 = vld [vmem:[%s11225_s1 + $0x182c] ss:$16 sps:$4 sm:$0xff]  }
 0x2c7   :  { %5399 = vmatpush1.bf16.msra.mxu0 %v8410_v15  ;;  %5932 = vmatpush1.bf16.msra.mxu1 %v8413_v16  ;;  %v8500_v15 = vld [vmem:[%s11225_s1 + $0x1800] ss:$16 sps:$4 sm:$0xff]   ;;  %v8503_v16 = vld [vmem:[%s11225_s1 + $0x1808] ss:$16 sps:$4 sm:$0xff]  }
 0x2c8   :  { %5400 = vmatprep.subr.bf16.mxu0 %v8418_v8  ;;  %5933 = vmatprep.subr.bf16.mxu1 %v8421_v17  ;;  %v8508_v8 = vld [vmem:[%s11225_s1 + $0x1824] ss:$16 sps:$4 sm:$0xff]   ;;  %v8506_v17 = vld [vmem:[%s11225_s1 + $0x1820] ss:$16 sps:$4 sm:$0xff]  }
 0x2cb   :  { %5401 = vmatpush1.bf16.msra.mxu0 %v8416_v18  ;;  %5934 = vmatpush1.bf16.msra.mxu1 %v8419_v19  ;;  %v8509_v18 = vld [vmem:[%s11225_s1 + $0x1828] ss:$16 sps:$4 sm:$0xff]   ;;  %v8514_v19 = vld [vmem:[%s11225_s1 + $0x1844] ss:$16 sps:$4 sm:$0xff]  }
 0x2cc   :  { %5402 = vmatprep.subr.bf16.mxu0 %v8424_v20  ;;  %5935 = vmatprep.subr.bf16.mxu1 %v8427_v22  ;;  %v8517_v20 = vld [vmem:[%s11225_s1 + $0x184c] ss:$16 sps:$4 sm:$0xff]   ;;  %v8583_v22 = vmov 0  }
 0x2cf   :  { %5403 = vmatpush1.bf16.msra.mxu0 %v8422_v23  ;;  %5936 = vmatpush1.bf16.msra.mxu1 %v8425_v24  ;;  %v8512_v23 = vld [vmem:[%s11225_s1 + $0x1840] ss:$16 sps:$4 sm:$0xff]   ;;  %v8515_v24 = vld [vmem:[%s11225_s1 + $0x1848] ss:$16 sps:$4 sm:$0xff]  }
 0x2d0   :  { %5404 = vmatprep.subr.bf16.mxu0 %v8430_v13  ;;  %5937 = vmatprep.subr.bf16.mxu1 %v8433_v27  ;;  %v8520_v13 = vld [vmem:[%s11225_s1 + $0x1864] ss:$16 sps:$4 sm:$0xff]   ;;  %v8523_v27 = vld [vmem:[%s11225_s1 + $0x186c] ss:$16 sps:$4 sm:$0xff]  }
 0x2d3   :  { %5405 = vmatpush1.bf16.msra.mxu0 %v8428_v28  ;;  %5938 = vmatpush1.bf16.msra.mxu1 %v8431_v29  ;;  %v8518_v28 = vld [vmem:[%s11225_s1 + $0x1860] ss:$16 sps:$4 sm:$0xff]   ;;  %v8521_v29 = vld [vmem:[%s11225_s1 + $0x1868] ss:$16 sps:$4 sm:$0xff]  }
 0x2d4   :  { %5406 = vmatprep.subr.bf16.mxu0 %v8436_v14  ;;  %5939 = vmatprep.subr.bf16.mxu1 %v8439_v30  ;;  %v6378_v14 = vld.sshfl [vmem:[%s11224_s0 + $0x18] sm:$0x1 pattern:$0x75316420]  ;;  %v8524_v30 = vld [vmem:[%s11227_s3 + $0x40] sm:$0xff]  }
 0x2d7   :  { %5407 = vmatpush1.bf16.msra.mxu0 %v8434_v31  ;;  %5940 = vmatpush1.bf16.msra.mxu1 %v8437_v25  ;;  %v8525_v31 = vld [vmem:[%s11227_s3 + $0xc0] sm:$0xff]   ;;  %v996_v25 = vrot.slane %v6378_v14, %v8750_v49  ;;  %v8529_v49 = vld [vmem:[%s11227_s3 + $0xc8] sm:$0xff]  }
 0x2d8   :  { %5408 = vmatprep.subr.bf16.mxu0 %v8442_v32  ;;  %5941 = vmatprep.subr.bf16.mxu1 %v8445_v33  ;;  %v8526_v32 = vld [vmem:[%s11227_s3] sm:$0xff]  }
 0x2d9   :  { %v8527_v33 = vld [vmem:[%s11227_s3 + $0x80] sm:$0xff]  }
 0x2db   :  { %5409 = vmatpush1.bf16.msra.mxu0 %v8440_v26  ;;  %5942 = vmatpush1.bf16.msra.mxu1 %v8443_v36  ;;  %v8528_v26 = vld [vmem:[%s11227_s3 + $0x48] sm:$0xff]  }
 0x2dc   :  { %5410 = vmatprep.subr.bf16.mxu0 %v8448_v37  ;;  %5943 = vmatprep.subr.bf16.mxu1 %v8451_v21  ;;  %v8530_v36 = vld [vmem:[%s11227_s3 + $0x8] sm:$0xff]   ;;  %v8532_v21 = vld [vmem:[%s11227_s3 + $0x50] sm:$0xff]  }
 0x2dd   :  { %v8531_v37 = vld [vmem:[%s11227_s3 + $0x88] sm:$0xff]  }
 0x2df   :  { %5411 = vmatpush1.bf16.msra.mxu0 %v8446_v39  ;;  %5944 = vmatpush1.bf16.msra.mxu1 %v8449_v40  ;;  %v8533_v39 = vld [vmem:[%s11227_s3 + $0xd0] sm:$0xff]  }
 0x2e0   :  { %5412 = vmatprep.subr.bf16.mxu0 %v8454_v41  ;;  %5945 = vmatprep.subr.bf16.mxu1 %v8457_v34  ;;  %v8534_v40 = vld [vmem:[%s11227_s3 + $0x10] sm:$0xff]   ;;  %v8536_v34 = vld [vmem:[%s11227_s3 + $0x58] sm:$0xff]  }
 0x2e1   :  { %v8535_v41 = vld [vmem:[%s11227_s3 + $0x90] sm:$0xff]  }
 0x2e3   :  { %5413 = vmatpush1.bf16.msra.mxu0 %v8452_v43  ;;  %5946 = vmatpush1.bf16.msra.mxu1 %v8455_v45  ;;  %v8537_v43 = vld [vmem:[%s11227_s3 + $0xd8] sm:$0xff]  }
 0x2e4   :  { %5414 = vmatprep.subr.bf16.mxu0 %v8460_v46  ;;  %5947 = vmatprep.subr.bf16.mxu1 %v8463_v35  ;;  %v8538_v45 = vld [vmem:[%s11227_s3 + $0x18] sm:$0xff]   ;;  %v8540_v35 = vld [vmem:[%s11227_s3 + $0x60] sm:$0xff]  }
 0x2e5   :  { %v8539_v46 = vld [vmem:[%s11227_s3 + $0x98] sm:$0xff]  }
 0x2e7   :  { %5415 = vmatpush1.bf16.msra.mxu0 %v8458_v50  ;;  %5948 = vmatpush1.bf16.msra.mxu1 %v8461_v53  ;;  %v8541_v50 = vld [vmem:[%s11227_s3 + $0xe0] sm:$0xff]  }
 0x2e8   :  { %5416 = vmatprep.subr.bf16.mxu0 %v8466_v38  ;;  %5949 = vmatprep.subr.bf16.mxu1 %v8469_v54  ;;  %v8542_v53 = vld [vmem:[%s11227_s3 + $0x20] sm:$0xff]   ;;  %v8544_v54 = vld [vmem:[%s11227_s3 + $0x68] sm:$0xff]  }
 0x2e9   :  { %v8543_v38 = vld [vmem:[%s11227_s3 + $0xa0] sm:$0xff]  }
 0x2eb   :  { %5417 = vmatpush1.bf16.msra.mxu0 %v8464_v55  ;;  %5950 = vmatpush1.bf16.msra.mxu1 %v8467_v56  ;;  %v8545_v55 = vld [vmem:[%s11227_s3 + $0xe8] sm:$0xff]  }
 0x2ec   :  { %5418 = vmatprep.subr.bf16.mxu0 %v8472_v47  ;;  %5951 = vmatprep.subr.bf16.mxu1 %v8475_v57  ;;  %v8546_v56 = vld [vmem:[%s11227_s3 + $0x28] sm:$0xff]   ;;  %v8548_v57 = vld [vmem:[%s11227_s3 + $0x70] sm:$0xff]  }
 0x2ed   :  { %v8547_v47 = vld [vmem:[%s11227_s3 + $0xa8] sm:$0xff]  }
 0x2ef   :  { %5419 = vmatpush1.bf16.msra.mxu0 %v8470_v58  ;;  %5952 = vmatpush1.bf16.msra.mxu1 %v8473_v59  ;;  %v8549_v58 = vld [vmem:[%s11227_s3 + $0xf0] sm:$0xff]  }
 0x2f0   :  { %5420 = vmatprep.subr.bf16.mxu0 %v8478_v48  ;;  %5953 = vmatprep.subr.bf16.mxu1 %v8481_v61  ;;  %v8550_v59 = vld [vmem:[%s11227_s3 + $0x30] sm:$0xff]   ;;  %v8552_v61 = vld [vmem:[%s11227_s3 + $0x78] sm:$0xff]  }
 0x2f1   :  { %v8551_v48 = vld [vmem:[%s11227_s3 + $0xb0] sm:$0xff]  }
 0x2f3   :  { %5421 = vmatpush1.bf16.msra.mxu0 %v8476_v63  ;;  %5954 = vmatpush1.bf16.msra.mxu1 %v8479_v44  ;;  %v8553_v63 = vld [vmem:[%s11227_s3 + $0xf8] sm:$0xff]  }
 0x2f4   :  { %5422 = vmatprep.subr.bf16.mxu0 %v8484_v1  ;;  %5955 = vmatprep.subr.bf16.mxu1 %v8487_v51  ;;  %v8554_v44 = vld [vmem:[%s11227_s3 + $0x38] sm:$0xff]   ;;  %v814_v51 = vsub.s32 0, %v8732_v42 }
 0x2f5   :  { %v8555_v1 = vld [vmem:[%s11227_s3 + $0xb8] sm:$0xff]  }
 0x2f7   :  { %5423 = vmatpush1.bf16.msra.mxu0 %v8482_v2  ;;  %5956 = vmatpush1.bf16.msra.mxu1 %v8485_v3  ;;  %v822_v2 = vsub.s32 2, %v8732_v42  ;;  %v810_v3 = vld [vmem:[%s11226_s2] sm:$0xf] }
 0x2f8   :  { %5424 = vmatprep.subr.bf16.mxu0 %v8490_v4  ;;  %5957 = vmatprep.subr.bf16.mxu1 %v8493_v60  ;;  %v818_v4 = vsub.s32 1, %v8732_v42  ;;  %v826_v60 = vsub.s32 3, %v8732_v42 }
 0x2fb   :  { %5425 = vmatpush1.bf16.msra.mxu0 %v8488_v5  ;;  %5958 = vmatpush1.bf16.msra.mxu1 %v8491_v6  ;;  %v815_v5 = vrot.slane %v810_v3, %v814_v51  ;;  %v823_v6 = vrot.slane %v810_v3, %v822_v2 }
 0x2fc   :  { %5426 = vmatprep.subr.bf16.mxu0 %v8496_v7  ;;  %5959 = vmatprep.subr.bf16.mxu1 %v8499_v62  ;;  %v819_v7 = vrot.slane %v810_v3, %v818_v4  ;;  %v827_v62 = vrot.slane %v810_v3, %v826_v60 }
 0x2ff   :  { %5427 = vmatpush1.bf16.msra.mxu0 %v8494_v10  ;;  %5960 = vmatpush1.bf16.msra.mxu1 %v8497_v11 }
 0x300   :  { %5437 = vmatprep.subr.bf16.mxu0 %v8502_v12  ;;  %5970 = vmatprep.subr.bf16.mxu1 %v8505_v0 }
 0x302   :  { %5429 = vmatmul.mubr.bf16.vlgmr.msra.gmra.mrb[0].mxu0 %v980_v52  ;;  %5962 = vmatmul.mubr.bf16.vlgmr.msra.gmra.mrb[0].mxu1 %v980_v52 }
 0x303   :  { %5438 = vmatpush1.bf16.msra.mxu0 %v8500_v15  ;;  %5971 = vmatpush1.bf16.msra.mxu1 %v8503_v16 }
 0x304   :  { %5439 = vmatprep.subr.bf16.mxu0 %v8508_v8  ;;  %5972 = vmatprep.subr.bf16.mxu1 %v8511_v9 }
 0x305   :  { %5469 = vmatprep.mubr.bf16.mxu0 %v8583_v22  ;;  %6002 = vmatprep.mubr.bf16.mxu1 %v8583_v22 }
 0x307   :  { %5440 = vmatpush1.bf16.msra.mxu0 %v8506_v17  ;;  %5973 = vmatpush1.bf16.msra.mxu1 %v8509_v18 }
 0x308   :  { %5441 = vmatprep.subr.bf16.mxu0 %v8514_v19  ;;  %5974 = vmatprep.subr.bf16.mxu1 %v8517_v20 }
 0x30b   :  { %5442 = vmatpush1.bf16.msra.mxu0 %v8512_v23  ;;  %5975 = vmatpush1.bf16.msra.mxu1 %v8515_v24 }
 0x30c   :  { %5443 = vmatprep.subr.bf16.mxu0 %v8520_v13  ;;  %5976 = vmatprep.subr.bf16.mxu1 %v8523_v27 }
 0x30f   :  { %5444 = vmatpush1.bf16.msra.mxu0 %v8518_v28  ;;  %5977 = vmatpush1.bf16.msra.mxu1 %v8521_v29 }
 0x310   :  { %7198 = vmatprep.subr.bf16.mxu0 %v8524_v30  ;;  %7220 = vmatprep.subr.bf16.mxu1 %v8525_v31  ;;  %v7165_v30 = vld [vmem:[%s11228_s4] ss:$0 sm:$0xff] }
 0x312   :  { %7163 = vmatmul.mubr.msk.bf16.vlgmr.msra.gmra.mrb[0].mxu0 %vm4941_vm0, %v996_v25  ;;  %7164 = vmatmul.mubr.msk.bf16.vlgmr.msra.gmra.mrb[0].mxu1 %vm4941_vm0, %v996_v25 }
 0x313   :  { %7199 = vmatpush3.bf16.msra.mxu0 %v8526_v32  ;;  %7221 = vmatpush3.bf16.msra.mxu1 %v8527_v33 }
 0x314   :  { %7200 = vmatprep.subr.bf16.mxu0 %v8528_v26  ;;  %7222 = vmatprep.subr.bf16.mxu1 %v8529_v49 }
 0x317   :  { %7201 = vmatpush3.bf16.msra.mxu0 %v8530_v36  ;;  %7223 = vmatpush3.bf16.msra.mxu1 %v8531_v37 }
 0x318   :  { %7202 = vmatprep.subr.bf16.mxu0 %v8532_v21  ;;  %7224 = vmatprep.subr.bf16.mxu1 %v8533_v39 }
 0x31b   :  { %7203 = vmatpush3.bf16.msra.mxu0 %v8534_v40  ;;  %7225 = vmatpush3.bf16.msra.mxu1 %v8535_v41 }
 0x31c   :  { %7204 = vmatprep.subr.bf16.mxu0 %v8536_v34  ;;  %7226 = vmatprep.subr.bf16.mxu1 %v8537_v43 }
 0x31f   :  { %7205 = vmatpush3.bf16.msra.mxu0 %v8538_v45  ;;  %7227 = vmatpush3.bf16.msra.mxu1 %v8539_v46 }
 0x320   :  { %7206 = vmatprep.subr.bf16.mxu0 %v8540_v35  ;;  %7228 = vmatprep.subr.bf16.mxu1 %v8541_v50 }
 0x323   :  { %7207 = vmatpush3.bf16.msra.mxu0 %v8542_v53  ;;  %7229 = vmatpush3.bf16.msra.mxu1 %v8543_v38 }
 0x324   :  { %7208 = vmatprep.subr.bf16.mxu0 %v8544_v54  ;;  %7230 = vmatprep.subr.bf16.mxu1 %v8545_v55 }
 0x327   :  { %7209 = vmatpush3.bf16.msra.mxu0 %v8546_v56  ;;  %7231 = vmatpush3.bf16.msra.mxu1 %v8547_v47 }
 0x328   :  { %7210 = vmatprep.subr.bf16.mxu0 %v8548_v57  ;;  %7232 = vmatprep.subr.bf16.mxu1 %v8549_v58 }
 0x32b   :  { %7211 = vmatpush3.bf16.msra.mxu0 %v8550_v59  ;;  %7233 = vmatpush3.bf16.msra.mxu1 %v8551_v48 }
 0x32c   :  { %7212 = vmatprep.subr.bf16.mxu0 %v8552_v61  ;;  %7234 = vmatprep.subr.bf16.mxu1 %v8553_v63 }
 0x32f   :  { %7213 = vmatpush3.bf16.msra.mxu0 %v8554_v44  ;;  %7235 = vmatpush3.bf16.msra.mxu1 %v8555_v1 }
 0x3e5   :  { %v5471_v10 = vpop.f32.mrb[0].mxu0  ;;  %v6004_v11 = vpop.f32.mrb[0].mxu1 }
 0x3e6   :  { %v7242_v12 = vadd.f32 %v5471_v10, %v815_v5  ;;  %v7244_v0 = vadd.f32 %v6004_v11, %v823_v6  ;;  %v5473_v52 = vpop.f32.mrb[1].mxu0  ;;  %v6006_v15 = vpop.f32.mrb[1].mxu1 }
 0x3e7   :  { %v7243_v16 = vadd.f32 %v5473_v52, %v819_v7  ;;  %v7245_v8 = vadd.f32 %v6006_v15, %v827_v62  ;;  %v5475_v9 = vpop.f32.mrb[2].mxu0  ;;  %v6008_v17 = vpop.f32.mrb[2].mxu1 }
 0x3e8   :  { %v6011_v18 = vmax.f32 %v7242_v12, 0.0  ;;  %v6013_v19 = vmax.f32 %v7244_v0, 0.0  ;;  %v5476_v20 = vpop.f32.mrb[3].mxu0  ;;  %v6009_v22 = vpop.f32.mrb[3].mxu1 }
 0x3e9   :  { %v6012_v23 = vmax.f32 %v7243_v16, 0.0  ;;  %v6014_v42 = vmax.f32 %v7245_v8, 0.0 }
 0x3ea   :  { %v6015_v27 = vpack.c.bf16 %v6011_v18, %v6011_v18  ;;  %v6017_v28 = vpack.c.bf16 %v6013_v19, %v6013_v19 }
 0x3eb   :  { %v6016_v24 = vpack.c.bf16 %v6012_v23, %v6012_v23  ;;  %v6018_v13 = vpack.c.bf16 %v6014_v42, %v6014_v42 }
 0x3ed   :  { %6314 = vmatprep.mubr.bf16.mxu0 %v6016_v24  ;;  %6354 = vmatprep.mubr.bf16.mxu1 %v6018_v13 }
 0x3ee   :  { %6315 = vmatmul.mubr.bf16.vlgmr.msra.gmra.mrb[4].mxu0 %v6015_v27  ;;  %6355 = vmatmul.mubr.bf16.vlgmr.msra.gmra.mrb[4].mxu1 %v6017_v28 }
 0x4c1   :  { %v7214_v29 = vpop.f32.mrb[4].mxu0  ;;  %v7236_v14 = vpop.f32.mrb[4].mxu1 }
 0x4c2   :  { %v7215_v31 = vpop.f32.mrb[5].mxu0  ;;  %v7237_v25 = vpop.f32.mrb[5].mxu1 }
 0x4c3   :  { %v7216_v32 = vadd.f32 %v7215_v31, %v7214_v29  ;;  %v7238_v33 = vadd.f32 %v7237_v25, %v7236_v14  ;;  %v7217_v26 = vpop.f32.mrb[6].mxu0  ;;  %v7239_v49 = vpop.f32.mrb[6].mxu1 }
 0x4c4   :  { %v7218_v36 = vpop.f32.mrb[7].mxu0  ;;  %v7240_v37 = vpop.f32.mrb[7].mxu1 }
 0x4c5   :  { %v6317_v21 = vadd.f32 %v7216_v32, %v7165_v30 }
 0x4c7   :  { %v6357_v39 = vadd.f32 %v7238_v33, %v6317_v21 }
 0x4c9   :  { %6363 = vst.msk [vmem:[#allocation2] sm:$0x3] %vm6362_vm1, %v6357_v39 }
 0x4ca   :  { %8569 = shalt.err (!%p8566_p4)
}
 0x4cb   :  { %s8570_s10 = scalar_lea.hbm %s11229_s5, 32 }
 0x4cc   :  { %p8571_p5 = scmp.ne.s32.totalorder %s11229_s5, %s8570_s10  ;;  %p8574_p6 = scmp.lt.u32.totalorder %s8570_s10, %s11229_s5 }
 0x4ce   :  { %p8576_p7 = pnand %p8574_p6, %p8571_p5 }
 0x4d0   :  { %8579 = shalt.err (!%p8576_p7)
}
 0x4d1   :  { %6373 = dma.vmem_to_hbm [thread:$0]  %s6371_s7, 32, %s11229_s5, [#allocation3]  }
 0x4d2   :  { %8580 = dma.done.wait [#allocation3], 32  }
 0x4d3   :  { %8581 = vsyncadd [#allocation3], 4294967264 }
 0x4d4   :  { %6377 = vsyncpa [#allocation3], 1 }

</bundles_post_ra>
